<compile_context>
chip_gen: v7x
topology: tpu7x:2x2x1
jax: 0.10.0
libtpu: 0.0.40
codegen_flags: <defaults>
</compile_context>

<pallas_src>
import jax
import jax.numpy as jnp
from jax import lax
from jax.experimental import pallas as pl
from jax.experimental.pallas import tpu as pltpu

VMEM_SPEC = pl.BlockSpec(memory_space=pltpu.MemorySpace.VMEM)
ANY_SPEC = pl.BlockSpec(memory_space=pl.ANY)
BN_EPS = 1e-5
BP = 8  # padded batch rows per timestep (one sublane tile)


# ------------------------------ Fused kernel ----------------------------------
def _make_fused_kernel(T, B, D, H, OUT):
    G = 4 * H                      # gate width (= 128 for H=32)
    FC1_READY_T = min(3, T - 1)    # step at which the fc1 prefetch is consumed
    inv_b = 1.0 / float(B)

    def lstm_cell(gates, c_prev):
        # gates: (BP, 4H) pre-activation, PyTorch order i, f, g, o.
        sig = jax.nn.sigmoid(gates)   # one full-vreg EUP pass (covers i, f, o)
        tnh = jnp.tanh(gates)         # one full-vreg EUP pass (covers g)
        i_g = sig[:, 0 * H:1 * H]
        f_g = sig[:, 1 * H:2 * H]
        g_g = tnh[:, 2 * H:3 * H]
        o_g = sig[:, 3 * H:4 * H]
        c = f_g * c_prev + i_g * g_g
        h = o_g * jnp.tanh(c)
        return h, c

    def bn_relu(y, gamma_ref, beta_ref):
        # BatchNorm1d (training): batch stats, biased variance, eps=1e-5.
        # One-pass stats: independent sum / sum-of-squares reduces.
        mean = jnp.sum(y, axis=0, keepdims=True) * inv_b
        ex2 = jnp.sum(y * y, axis=0, keepdims=True) * inv_b
        var = jnp.maximum(ex2 - mean * mean, 0.0)
        y_hat = (y - mean) * lax.rsqrt(var + BN_EPS)
        return jnp.maximum(y_hat * gamma_ref[...] + beta_ref[...], 0.0)

    def kernel(x_ref, wih1_ref, b1_ref, wfused_ref, whh2_ref, b2_ref,
               fc1_w_hbm, fc1_b, bn1_g, bn1_b,
               fc2_w_hbm, fc2_b, bn2_g, bn2_b,
               fc3_w, fc3_b, bn3_g, bn3_b,
               fc4_w, fc4_b, bn4_g, bn4_b,
               fc5_w, fc5_b,
               out_ref,
               fc1_w_vmem, fc2_w_vmem, fc1_sem, fc2_sem):
        # Prefetch the two 512 KB MLP weights behind the serial recurrence.
        fc1_copy = pltpu.make_async_copy(fc1_w_hbm, fc1_w_vmem, fc1_sem)
        fc2_copy = pltpu.make_async_copy(fc2_w_hbm, fc2_w_vmem, fc2_sem)
        fc1_copy.start()
        fc2_copy.start()

        # Hoisted layer-1 input projection (+ bias): one (T*BP, D) x (D, 4H) GEMM.
        gx1 = jnp.dot(x_ref[...], wih1_ref[...],
                      preferred_element_type=jnp.float32) + b1_ref[...]
        w_fused = wfused_ref[...]          # (H, 8H) = [W_hh1 | W_ih2]
        whh2 = whh2_ref[...]               # (H, 4H)
        b2 = b2_ref[...]                   # (1, 4H)

        h1 = jnp.zeros((BP, H), jnp.float32)
        c1 = jnp.zeros((BP, H), jnp.float32)
        h2 = jnp.zeros((BP, H), jnp.float32)
        c2 = jnp.zeros((BP, H), jnp.float32)
        rec1 = jnp.zeros((BP, G), jnp.float32)   # h1_{-1} @ W_hh1 == 0

        h2s = []
        acc = None
        for t in range(T):  # T static -> fully unrolled, one basic block
            # ---- layer 1, step t (vreg-aligned gx1 slice) ----
            gates1 = gx1[t * BP:(t + 1) * BP, :] + rec1
            h1, c1 = lstm_cell(gates1, c1)
            # ---- fused matmul: layer-1 recurrence for t+1 + layer-2 input for t
            fused = jnp.dot(h1, w_fused, preferred_element_type=jnp.float32)
            rec1 = fused[:, :G]
            # ---- layer 2, step t (h2 here is still h2_{t-1}) ----
            gates2 = fused[:, G:] + b2 + jnp.dot(
                h2, whh2, preferred_element_type=jnp.float32)
            h2, c2 = lstm_cell(gates2, c2)
            h2s.append(h2)
            # ---- fc1 folded into the loop (after its prefetch has landed) ----
            if t == FC1_READY_T:
                fc1_copy.wait()   # hidden behind the first FC1_READY_T+1 steps
                a = jnp.dot(h2s[0], fc1_w_vmem[0:H, :],
                            preferred_element_type=jnp.float32)
                for s in range(1, t + 1):
                    a = a + jnp.dot(h2s[s], fc1_w_vmem[s * H:(s + 1) * H, :],
                                    preferred_element_type=jnp.float32)
                acc = a
            elif t > FC1_READY_T:
                acc = acc + jnp.dot(h2, fc1_w_vmem[t * H:(t + 1) * H, :],
                                    preferred_element_type=jnp.float32)

        # Drop the padded rows once, before the batch-statistics BN tail.
        h = acc[:B, :] + fc1_b[...]
        h = bn_relu(h, bn1_g, bn1_b)
        fc2_copy.wait()  # fc2 prefetch hidden behind the whole recurrence + fc1
        h = jnp.dot(h, fc2_w_vmem[...], preferred_element_type=jnp.float32) + fc2_b[...]
        h = bn_relu(h, bn2_g, bn2_b)
        h = jnp.dot(h, fc3_w[...], preferred_element_type=jnp.float32) + fc3_b[...]
        h = bn_relu(h, bn3_g, bn3_b)
        h = jnp.dot(h, fc4_w[...], preferred_element_type=jnp.float32) + fc4_b[...]
        h = bn_relu(h, bn4_g, bn4_b)
        out_ref[...] = (
            jnp.dot(h, fc5_w[...], preferred_element_type=jnp.float32) + fc5_b[...]
        )

    return kernel


# ------------------------------- Full forward ---------------------------------
def lstm_model_forward(x_btd, params):
    # x_btd: (B, T, D), batch_first as in the PyTorch module.
    B, T, D = x_btd.shape
    lstm_layers = params["lstm_layers"]
    assert len(lstm_layers) == 2, "kernel is specialized for the module's 2-layer LSTM"
    assert B <= BP, "kernel pads the batch to 8 rows per step"
    H = lstm_layers[0]["w_hh_t"].shape[0]
    OUT = params["fc5"][0].shape[1]

    # Tiny layout prep (1 KB): time-major, padded to BP rows per step so every
    # per-step gate slice in the kernel is vreg (sublane) aligned.
    x_tbd = jnp.transpose(x_btd, (1, 0, 2)).astype(jnp.float32)          # (T, B, D)
    x_pad = jnp.zeros((T, BP, D), jnp.float32).at[:, :B, :].set(x_tbd)
    x_pad = x_pad.reshape(T * BP, D)

    l1, l2 = lstm_layers
    # Fuse [W_hh1 | W_ih2] so one per-step matmul serves both layers.
    w_fused = jnp.concatenate([l1["w_hh_t"], l2["w_ih_t"]], axis=1)      # (H, 8H)

    w1t, b1f, g1, be1 = params["fc1"]
    w2t, b2f, g2, be2 = params["fc2"]
    w3t, b3f, g3, be3 = params["fc3"]
    w4t, b4f, g4, be4 = params["fc4"]
    w5t, b5f = params["fc5"]

    inputs = [
        x_pad, l1["w_ih_t"], l1["bias"], w_fused, l2["w_hh_t"], l2["bias"],
        w1t, b1f, g1, be1,      # fc1 weight in HBM (prefetched), rest VMEM
        w2t, b2f, g2, be2,      # fc2 weight in HBM (prefetched), rest VMEM
        w3t, b3f, g3, be3,
        w4t, b4f, g4, be4,
        w5t, b5f,
    ]
    in_specs = (
        [VMEM_SPEC] * 6
        + [ANY_SPEC] + [VMEM_SPEC] * 3
        + [ANY_SPEC] + [VMEM_SPEC] * 3
        + [VMEM_SPEC] * 4
        + [VMEM_SPEC] * 4
        + [VMEM_SPEC] * 2
    )

    kernel = _make_fused_kernel(T, B, D, H, OUT)

    return pl.pallas_call(
        kernel,
        out_shape=jax.ShapeDtypeStruct((B, OUT), jnp.float32),
        in_specs=in_specs,
        out_specs=VMEM_SPEC,
        scratch_shapes=[
            pltpu.VMEM(w1t.shape, jnp.float32),   # fc1 weight VMEM home
            pltpu.VMEM(w2t.shape, jnp.float32),   # fc2 weight VMEM home
            pltpu.SemaphoreType.DMA(()),          # fc1 DMA completion
            pltpu.SemaphoreType.DMA(()),          # fc2 DMA completion
        ],
        compiler_params=pltpu.CompilerParams(
            # Sized well under v7x's 64 MiB physical; actual use < 2.5 MiB.
            vmem_limit_bytes=32 * 1024 * 1024,
        ),
    )(*inputs)


# --------------------------- Deterministic params -----------------------------
def init_params(key, input_dim, hidden_dim, output_dim, seq_len, num_layers):
    params = {"lstm_layers": []}
    H = hidden_dim
    k = key
    for layer in range(num_layers):
        d_in = input_dim if layer == 0 else hidden_dim
        k, k1, k2, k3, k4 = jax.random.split(k, 5)
        scale = 1.0 / jnp.sqrt(H)
        w_ih = jax.random.uniform(k1, (4 * H, d_in), jnp.float32, -scale, scale)
        w_hh = jax.random.uniform(k2, (4 * H, H), jnp.float32, -scale, scale)
        b_ih = jax.random.uniform(k3, (4 * H,), jnp.float32, -scale, scale)
        b_hh = jax.random.uniform(k4, (4 * H,), jnp.float32, -scale, scale)
        params["lstm_layers"].append(
            dict(
                w_ih_t=w_ih.T,                          # (d_in, 4H)
                w_hh_t=w_hh.T,                          # (H, 4H)
                bias=(b_ih + b_hh).reshape(1, 4 * H),   # (1, 4H)
            )
        )

    fc_dims = [
        ("fc1", hidden_dim * seq_len, 512, True),
        ("fc2", 512, 256, True),
        ("fc3", 256, 128, True),
        ("fc4", 128, 32, True),
        ("fc5", 32, output_dim, False),
    ]
    for name, fin, fout, has_bn in fc_dims:
        k, k1, k2 = jax.random.split(k, 3)
        bound = 1.0 / jnp.sqrt(fin)
        w = jax.random.uniform(k1, (fout, fin), jnp.float32, -bound, bound)
        b = jax.random.uniform(k2, (fout,), jnp.float32, -bound, bound)
        if has_bn:
            gamma = jnp.ones((1, fout), jnp.float32)   # BatchNorm1d default weight
            beta = jnp.zeros((1, fout), jnp.float32)   # BatchNorm1d default bias
            params[name] = (w.T, b.reshape(1, fout), gamma, beta)
        else:
            params[name] = (w.T, b.reshape(1, fout))
    return params


if __name__ == "__main__":
    # Small shapes consistent with the module's forward pass.
    B, T, D = 2, 8, 4          # batch, seq_len, input_dim
    H, OUT = 32, 10            # hidden_dim, output_dim
    NUM_LAYERS = 2

    key = jax.random.PRNGKey(0)
    key, kx, kp = jax.random.split(key, 3)
    x = jax.random.normal(kx, (B, T, D), jnp.float32)   # (batch, seq, input_dim)
    params = init_params(kp, D, H, OUT, T, NUM_LAYERS)

    fwd = jax.jit(lstm_model_forward)
    out = fwd(x, params)
    out = jax.block_until_ready(out)
    assert out.shape == (B, OUT), out.shape
    assert bool(jnp.all(jnp.isfinite(out)))
    print("KERNEL_OK")
</pallas_src>

<mosaic_0001>
module attributes {stable_mosaic.version = 11 : i64} {
  func.func @kernel(%arg0: memref<64x4xf32, #tpu.memory_space<vmem>>, %arg1: memref<4x128xf32, #tpu.memory_space<vmem>>, %arg2: memref<1x128xf32, #tpu.memory_space<vmem>>, %arg3: memref<32x256xf32, #tpu.memory_space<vmem>>, %arg4: memref<32x128xf32, #tpu.memory_space<vmem>>, %arg5: memref<1x128xf32, #tpu.memory_space<vmem>>, %arg6: memref<256x512xf32, #tpu.memory_space<any>>, %arg7: memref<1x512xf32, #tpu.memory_space<vmem>>, %arg8: memref<1x512xf32, #tpu.memory_space<vmem>>, %arg9: memref<1x512xf32, #tpu.memory_space<vmem>>, %arg10: memref<512x256xf32, #tpu.memory_space<any>>, %arg11: memref<1x256xf32, #tpu.memory_space<vmem>>, %arg12: memref<1x256xf32, #tpu.memory_space<vmem>>, %arg13: memref<1x256xf32, #tpu.memory_space<vmem>>, %arg14: memref<256x128xf32, #tpu.memory_space<vmem>>, %arg15: memref<1x128xf32, #tpu.memory_space<vmem>>, %arg16: memref<1x128xf32, #tpu.memory_space<vmem>>, %arg17: memref<1x128xf32, #tpu.memory_space<vmem>>, %arg18: memref<128x32xf32, #tpu.memory_space<vmem>>, %arg19: memref<1x32xf32, #tpu.memory_space<vmem>>, %arg20: memref<1x32xf32, #tpu.memory_space<vmem>>, %arg21: memref<1x32xf32, #tpu.memory_space<vmem>>, %arg22: memref<32x10xf32, #tpu.memory_space<vmem>>, %arg23: memref<1x10xf32, #tpu.memory_space<vmem>>, %arg24: memref<2x10xf32, #tpu.memory_space<vmem>>, %arg25: memref<256x512xf32, #tpu.memory_space<vmem>>, %arg26: memref<512x256xf32, #tpu.memory_space<vmem>>, %arg27: memref<!tpu.dma_semaphore, #tpu.memory_space<semaphore_mem>>, %arg28: memref<!tpu.dma_semaphore, #tpu.memory_space<semaphore_mem>>) attributes {dimension_semantics = [], scalar_prefetch = 0 : i64, scratch_operands = 4 : i64, tpu.core_type = #tpu.core_type<tc>} {
    tpu.enqueue_dma source(%arg6 : memref<256x512xf32, #tpu.memory_space<any>>) target(%arg25 : memref<256x512xf32, #tpu.memory_space<vmem>>) target_semaphore(%arg27 : memref<!tpu.dma_semaphore, #tpu.memory_space<semaphore_mem>>)
    tpu.enqueue_dma source(%arg10 : memref<512x256xf32, #tpu.memory_space<any>>) target(%arg26 : memref<512x256xf32, #tpu.memory_space<vmem>>) target_semaphore(%arg28 : memref<!tpu.dma_semaphore, #tpu.memory_space<semaphore_mem>>)
    %c0 = arith.constant 0 : index
    %c0_0 = arith.constant 0 : index
    %0 = vector.load %arg0[%c0, %c0_0] : memref<64x4xf32, #tpu.memory_space<vmem>>, vector<64x4xf32>
    %c0_1 = arith.constant 0 : index
    %c0_2 = arith.constant 0 : index
    %1 = vector.load %arg1[%c0_1, %c0_2] : memref<4x128xf32, #tpu.memory_space<vmem>>, vector<4x128xf32>
    %cst = arith.constant dense<0.000000e+00> : vector<64x128xf32>
    %2 = tpu.matmul %0, %1, %cst {dimension_numbers = #tpu.dot_dimension_numbers<[1], [0], [0], [1], [0, 0, 1, 1], [], []>} : vector<64x4xf32>, vector<4x128xf32>, vector<64x128xf32> -> vector<64x128xf32>
    %c0_3 = arith.constant 0 : index
    %c0_4 = arith.constant 0 : index
    %3 = vector.load %arg2[%c0_3, %c0_4] : memref<1x128xf32, #tpu.memory_space<vmem>>, vector<1x128xf32>
    %4 = vector.broadcast %3 : vector<1x128xf32> to vector<64x128xf32>
    %5 = arith.addf %2, %4 : vector<64x128xf32>
    %c0_5 = arith.constant 0 : index
    %c0_6 = arith.constant 0 : index
    %6 = vector.load %arg3[%c0_5, %c0_6] : memref<32x256xf32, #tpu.memory_space<vmem>>, vector<32x256xf32>
    %c0_7 = arith.constant 0 : index
    %c0_8 = arith.constant 0 : index
    %7 = vector.load %arg4[%c0_7, %c0_8] : memref<32x128xf32, #tpu.memory_space<vmem>>, vector<32x128xf32>
    %c0_9 = arith.constant 0 : index
    %c0_10 = arith.constant 0 : index
    %8 = vector.load %arg5[%c0_9, %c0_10] : memref<1x128xf32, #tpu.memory_space<vmem>>, vector<1x128xf32>
    %cst_11 = arith.constant 0.000000e+00 : f32
    %9 = vector.broadcast %cst_11 : f32 to vector<8x32xf32>
    %cst_12 = arith.constant 0.000000e+00 : f32
    %10 = vector.broadcast %cst_12 : f32 to vector<8x32xf32>
    %cst_13 = arith.constant 0.000000e+00 : f32
    %11 = vector.broadcast %cst_13 : f32 to vector<8x32xf32>
    %cst_14 = arith.constant 0.000000e+00 : f32
    %12 = vector.broadcast %cst_14 : f32 to vector<8x128xf32>
    %13 = vector.extract_strided_slice %5 {offsets = [0, 0], sizes = [8, 128], strides = [1, 1]} : vector<64x128xf32> to vector<8x128xf32>
    %14 = arith.addf %13, %12 : vector<8x128xf32>
    %15 = arith.negf %14 : vector<8x128xf32>
    %16 = math.exp %15 : vector<8x128xf32>
    %cst_15 = arith.constant 1.000000e+00 : f32
    %17 = vector.broadcast %cst_15 : f32 to vector<8x128xf32>
    %18 = arith.addf %17, %16 : vector<8x128xf32>
    %19 = arith.divf %17, %18 : vector<8x128xf32>
    %20 = math.tanh %14 : vector<8x128xf32>
    %21 = vector.extract_strided_slice %19 {offsets = [0, 0], sizes = [8, 32], strides = [1, 1]} : vector<8x128xf32> to vector<8x32xf32>
    %22 = vector.extract_strided_slice %19 {offsets = [0, 32], sizes = [8, 32], strides = [1, 1]} : vector<8x128xf32> to vector<8x32xf32>
    %23 = vector.extract_strided_slice %20 {offsets = [0, 64], sizes = [8, 32], strides = [1, 1]} : vector<8x128xf32> to vector<8x32xf32>
    %24 = vector.extract_strided_slice %19 {offsets = [0, 96], sizes = [8, 32], strides = [1, 1]} : vector<8x128xf32> to vector<8x32xf32>
    %25 = arith.mulf %22, %9 : vector<8x32xf32>
    %26 = arith.mulf %21, %23 : vector<8x32xf32>
    %27 = arith.addf %25, %26 : vector<8x32xf32>
    %28 = math.tanh %27 : vector<8x32xf32>
    %29 = arith.mulf %24, %28 : vector<8x32xf32>
    %cst_16 = arith.constant dense<0.000000e+00> : vector<8x256xf32>
    %30 = tpu.matmul %29, %6, %cst_16 {dimension_numbers = #tpu.dot_dimension_numbers<[1], [0], [0], [1], [0, 0, 1, 1], [], []>} : vector<8x32xf32>, vector<32x256xf32>, vector<8x256xf32> -> vector<8x256xf32>
    %31 = vector.extract_strided_slice %30 {offsets = [0, 0], sizes = [8, 128], strides = [1, 1]} : vector<8x256xf32> to vector<8x128xf32>
    %32 = vector.extract_strided_slice %30 {offsets = [0, 128], sizes = [8, 128], strides = [1, 1]} : vector<8x256xf32> to vector<8x128xf32>
    %33 = vector.broadcast %8 : vector<1x128xf32> to vector<8x128xf32>
    %34 = arith.addf %32, %33 : vector<8x128xf32>
    %cst_17 = arith.constant dense<0.000000e+00> : vector<8x128xf32>
    %35 = tpu.matmul %10, %7, %cst_17 {dimension_numbers = #tpu.dot_dimension_numbers<[1], [0], [0], [1], [0, 0, 1, 1], [], []>} : vector<8x32xf32>, vector<32x128xf32>, vector<8x128xf32> -> vector<8x128xf32>
    %36 = arith.addf %34, %35 : vector<8x128xf32>
    %37 = arith.negf %36 : vector<8x128xf32>
    %38 = math.exp %37 : vector<8x128xf32>
    %cst_18 = arith.constant 1.000000e+00 : f32
    %39 = vector.broadcast %cst_18 : f32 to vector<8x128xf32>
    %40 = arith.addf %39, %38 : vector<8x128xf32>
    %41 = arith.divf %39, %40 : vector<8x128xf32>
    %42 = math.tanh %36 : vector<8x128xf32>
    %43 = vector.extract_strided_slice %41 {offsets = [0, 0], sizes = [8, 32], strides = [1, 1]} : vector<8x128xf32> to vector<8x32xf32>
    %44 = vector.extract_strided_slice %41 {offsets = [0, 32], sizes = [8, 32], strides = [1, 1]} : vector<8x128xf32> to vector<8x32xf32>
    %45 = vector.extract_strided_slice %42 {offsets = [0, 64], sizes = [8, 32], strides = [1, 1]} : vector<8x128xf32> to vector<8x32xf32>
    %46 = vector.extract_strided_slice %41 {offsets = [0, 96], sizes = [8, 32], strides = [1, 1]} : vector<8x128xf32> to vector<8x32xf32>
    %47 = arith.mulf %44, %11 : vector<8x32xf32>
    %48 = arith.mulf %43, %45 : vector<8x32xf32>
    %49 = arith.addf %47, %48 : vector<8x32xf32>
    %50 = math.tanh %49 : vector<8x32xf32>
    %51 = arith.mulf %46, %50 : vector<8x32xf32>
    %52 = vector.extract_strided_slice %5 {offsets = [8, 0], sizes = [8, 128], strides = [1, 1]} : vector<64x128xf32> to vector<8x128xf32>
    %53 = arith.addf %52, %31 : vector<8x128xf32>
    %54 = arith.negf %53 : vector<8x128xf32>
    %55 = math.exp %54 : vector<8x128xf32>
    %cst_19 = arith.constant 1.000000e+00 : f32
    %56 = vector.broadcast %cst_19 : f32 to vector<8x128xf32>
    %57 = arith.addf %56, %55 : vector<8x128xf32>
    %58 = arith.divf %56, %57 : vector<8x128xf32>
    %59 = math.tanh %53 : vector<8x128xf32>
    %60 = vector.extract_strided_slice %58 {offsets = [0, 0], sizes = [8, 32], strides = [1, 1]} : vector<8x128xf32> to vector<8x32xf32>
    %61 = vector.extract_strided_slice %58 {offsets = [0, 32], sizes = [8, 32], strides = [1, 1]} : vector<8x128xf32> to vector<8x32xf32>
    %62 = vector.extract_strided_slice %59 {offsets = [0, 64], sizes = [8, 32], strides = [1, 1]} : vector<8x128xf32> to vector<8x32xf32>
    %63 = vector.extract_strided_slice %58 {offsets = [0, 96], sizes = [8, 32], strides = [1, 1]} : vector<8x128xf32> to vector<8x32xf32>
    %64 = arith.mulf %61, %27 : vector<8x32xf32>
    %65 = arith.mulf %60, %62 : vector<8x32xf32>
    %66 = arith.addf %64, %65 : vector<8x32xf32>
    %67 = math.tanh %66 : vector<8x32xf32>
    %68 = arith.mulf %63, %67 : vector<8x32xf32>
    %cst_20 = arith.constant dense<0.000000e+00> : vector<8x256xf32>
    %69 = tpu.matmul %68, %6, %cst_20 {dimension_numbers = #tpu.dot_dimension_numbers<[1], [0], [0], [1], [0, 0, 1, 1], [], []>} : vector<8x32xf32>, vector<32x256xf32>, vector<8x256xf32> -> vector<8x256xf32>
    %70 = vector.extract_strided_slice %69 {offsets = [0, 0], sizes = [8, 128], strides = [1, 1]} : vector<8x256xf32> to vector<8x128xf32>
    %71 = vector.extract_strided_slice %69 {offsets = [0, 128], sizes = [8, 128], strides = [1, 1]} : vector<8x256xf32> to vector<8x128xf32>
    %72 = vector.broadcast %8 : vector<1x128xf32> to vector<8x128xf32>
    %73 = arith.addf %71, %72 : vector<8x128xf32>
    %cst_21 = arith.constant dense<0.000000e+00> : vector<8x128xf32>
    %74 = tpu.matmul %51, %7, %cst_21 {dimension_numbers = #tpu.dot_dimension_numbers<[1], [0], [0], [1], [0, 0, 1, 1], [], []>} : vector<8x32xf32>, vector<32x128xf32>, vector<8x128xf32> -> vector<8x128xf32>
    %75 = arith.addf %73, %74 : vector<8x128xf32>
    %76 = arith.negf %75 : vector<8x128xf32>
    %77 = math.exp %76 : vector<8x128xf32>
    %cst_22 = arith.constant 1.000000e+00 : f32
    %78 = vector.broadcast %cst_22 : f32 to vector<8x128xf32>
    %79 = arith.addf %78, %77 : vector<8x128xf32>
    %80 = arith.divf %78, %79 : vector<8x128xf32>
    %81 = math.tanh %75 : vector<8x128xf32>
    %82 = vector.extract_strided_slice %80 {offsets = [0, 0], sizes = [8, 32], strides = [1, 1]} : vector<8x128xf32> to vector<8x32xf32>
    %83 = vector.extract_strided_slice %80 {offsets = [0, 32], sizes = [8, 32], strides = [1, 1]} : vector<8x128xf32> to vector<8x32xf32>
    %84 = vector.extract_strided_slice %81 {offsets = [0, 64], sizes = [8, 32], strides = [1, 1]} : vector<8x128xf32> to vector<8x32xf32>
    %85 = vector.extract_strided_slice %80 {offsets = [0, 96], sizes = [8, 32], strides = [1, 1]} : vector<8x128xf32> to vector<8x32xf32>
    %86 = arith.mulf %83, %49 : vector<8x32xf32>
    %87 = arith.mulf %82, %84 : vector<8x32xf32>
    %88 = arith.addf %86, %87 : vector<8x32xf32>
    %89 = math.tanh %88 : vector<8x32xf32>
    %90 = arith.mulf %85, %89 : vector<8x32xf32>
    %91 = vector.extract_strided_slice %5 {offsets = [16, 0], sizes = [8, 128], strides = [1, 1]} : vector<64x128xf32> to vector<8x128xf32>
    %92 = arith.addf %91, %70 : vector<8x128xf32>
    %93 = arith.negf %92 : vector<8x128xf32>
    %94 = math.exp %93 : vector<8x128xf32>
    %cst_23 = arith.constant 1.000000e+00 : f32
    %95 = vector.broadcast %cst_23 : f32 to vector<8x128xf32>
    %96 = arith.addf %95, %94 : vector<8x128xf32>
    %97 = arith.divf %95, %96 : vector<8x128xf32>
    %98 = math.tanh %92 : vector<8x128xf32>
    %99 = vector.extract_strided_slice %97 {offsets = [0, 0], sizes = [8, 32], strides = [1, 1]} : vector<8x128xf32> to vector<8x32xf32>
    %100 = vector.extract_strided_slice %97 {offsets = [0, 32], sizes = [8, 32], strides = [1, 1]} : vector<8x128xf32> to vector<8x32xf32>
    %101 = vector.extract_strided_slice %98 {offsets = [0, 64], sizes = [8, 32], strides = [1, 1]} : vector<8x128xf32> to vector<8x32xf32>
    %102 = vector.extract_strided_slice %97 {offsets = [0, 96], sizes = [8, 32], strides = [1, 1]} : vector<8x128xf32> to vector<8x32xf32>
    %103 = arith.mulf %100, %66 : vector<8x32xf32>
    %104 = arith.mulf %99, %101 : vector<8x32xf32>
    %105 = arith.addf %103, %104 : vector<8x32xf32>
    %106 = math.tanh %105 : vector<8x32xf32>
    %107 = arith.mulf %102, %106 : vector<8x32xf32>
    %cst_24 = arith.constant dense<0.000000e+00> : vector<8x256xf32>
    %108 = tpu.matmul %107, %6, %cst_24 {dimension_numbers = #tpu.dot_dimension_numbers<[1], [0], [0], [1], [0, 0, 1, 1], [], []>} : vector<8x32xf32>, vector<32x256xf32>, vector<8x256xf32> -> vector<8x256xf32>
    %109 = vector.extract_strided_slice %108 {offsets = [0, 0], sizes = [8, 128], strides = [1, 1]} : vector<8x256xf32> to vector<8x128xf32>
    %110 = vector.extract_strided_slice %108 {offsets = [0, 128], sizes = [8, 128], strides = [1, 1]} : vector<8x256xf32> to vector<8x128xf32>
    %111 = vector.broadcast %8 : vector<1x128xf32> to vector<8x128xf32>
    %112 = arith.addf %110, %111 : vector<8x128xf32>
    %cst_25 = arith.constant dense<0.000000e+00> : vector<8x128xf32>
    %113 = tpu.matmul %90, %7, %cst_25 {dimension_numbers = #tpu.dot_dimension_numbers<[1], [0], [0], [1], [0, 0, 1, 1], [], []>} : vector<8x32xf32>, vector<32x128xf32>, vector<8x128xf32> -> vector<8x128xf32>
    %114 = arith.addf %112, %113 : vector<8x128xf32>
    %115 = arith.negf %114 : vector<8x128xf32>
    %116 = math.exp %115 : vector<8x128xf32>
    %cst_26 = arith.constant 1.000000e+00 : f32
    %117 = vector.broadcast %cst_26 : f32 to vector<8x128xf32>
    %118 = arith.addf %117, %116 : vector<8x128xf32>
    %119 = arith.divf %117, %118 : vector<8x128xf32>
    %120 = math.tanh %114 : vector<8x128xf32>
    %121 = vector.extract_strided_slice %119 {offsets = [0, 0], sizes = [8, 32], strides = [1, 1]} : vector<8x128xf32> to vector<8x32xf32>
    %122 = vector.extract_strided_slice %119 {offsets = [0, 32], sizes = [8, 32], strides = [1, 1]} : vector<8x128xf32> to vector<8x32xf32>
    %123 = vector.extract_strided_slice %120 {offsets = [0, 64], sizes = [8, 32], strides = [1, 1]} : vector<8x128xf32> to vector<8x32xf32>
    %124 = vector.extract_strided_slice %119 {offsets = [0, 96], sizes = [8, 32], strides = [1, 1]} : vector<8x128xf32> to vector<8x32xf32>
    %125 = arith.mulf %122, %88 : vector<8x32xf32>
    %126 = arith.mulf %121, %123 : vector<8x32xf32>
    %127 = arith.addf %125, %126 : vector<8x32xf32>
    %128 = math.tanh %127 : vector<8x32xf32>
    %129 = arith.mulf %124, %128 : vector<8x32xf32>
    %130 = vector.extract_strided_slice %5 {offsets = [24, 0], sizes = [8, 128], strides = [1, 1]} : vector<64x128xf32> to vector<8x128xf32>
    %131 = arith.addf %130, %109 : vector<8x128xf32>
    %132 = arith.negf %131 : vector<8x128xf32>
    %133 = math.exp %132 : vector<8x128xf32>
    %cst_27 = arith.constant 1.000000e+00 : f32
    %134 = vector.broadcast %cst_27 : f32 to vector<8x128xf32>
    %135 = arith.addf %134, %133 : vector<8x128xf32>
    %136 = arith.divf %134, %135 : vector<8x128xf32>
    %137 = math.tanh %131 : vector<8x128xf32>
    %138 = vector.extract_strided_slice %136 {offsets = [0, 0], sizes = [8, 32], strides = [1, 1]} : vector<8x128xf32> to vector<8x32xf32>
    %139 = vector.extract_strided_slice %136 {offsets = [0, 32], sizes = [8, 32], strides = [1, 1]} : vector<8x128xf32> to vector<8x32xf32>
    %140 = vector.extract_strided_slice %137 {offsets = [0, 64], sizes = [8, 32], strides = [1, 1]} : vector<8x128xf32> to vector<8x32xf32>
    %141 = vector.extract_strided_slice %136 {offsets = [0, 96], sizes = [8, 32], strides = [1, 1]} : vector<8x128xf32> to vector<8x32xf32>
    %142 = arith.mulf %139, %105 : vector<8x32xf32>
    %143 = arith.mulf %138, %140 : vector<8x32xf32>
    %144 = arith.addf %142, %143 : vector<8x32xf32>
    %145 = math.tanh %144 : vector<8x32xf32>
    %146 = arith.mulf %141, %145 : vector<8x32xf32>
    %cst_28 = arith.constant dense<0.000000e+00> : vector<8x256xf32>
    %147 = tpu.matmul %146, %6, %cst_28 {dimension_numbers = #tpu.dot_dimension_numbers<[1], [0], [0], [1], [0, 0, 1, 1], [], []>} : vector<8x32xf32>, vector<32x256xf32>, vector<8x256xf32> -> vector<8x256xf32>
    %148 = vector.extract_strided_slice %147 {offsets = [0, 0], sizes = [8, 128], strides = [1, 1]} : vector<8x256xf32> to vector<8x128xf32>
    %149 = vector.extract_strided_slice %147 {offsets = [0, 128], sizes = [8, 128], strides = [1, 1]} : vector<8x256xf32> to vector<8x128xf32>
    %150 = vector.broadcast %8 : vector<1x128xf32> to vector<8x128xf32>
    %151 = arith.addf %149, %150 : vector<8x128xf32>
    %cst_29 = arith.constant dense<0.000000e+00> : vector<8x128xf32>
    %152 = tpu.matmul %129, %7, %cst_29 {dimension_numbers = #tpu.dot_dimension_numbers<[1], [0], [0], [1], [0, 0, 1, 1], [], []>} : vector<8x32xf32>, vector<32x128xf32>, vector<8x128xf32> -> vector<8x128xf32>
    %153 = arith.addf %151, %152 : vector<8x128xf32>
    %154 = arith.negf %153 : vector<8x128xf32>
    %155 = math.exp %154 : vector<8x128xf32>
    %cst_30 = arith.constant 1.000000e+00 : f32
    %156 = vector.broadcast %cst_30 : f32 to vector<8x128xf32>
    %157 = arith.addf %156, %155 : vector<8x128xf32>
    %158 = arith.divf %156, %157 : vector<8x128xf32>
    %159 = math.tanh %153 : vector<8x128xf32>
    %160 = vector.extract_strided_slice %158 {offsets = [0, 0], sizes = [8, 32], strides = [1, 1]} : vector<8x128xf32> to vector<8x32xf32>
    %161 = vector.extract_strided_slice %158 {offsets = [0, 32], sizes = [8, 32], strides = [1, 1]} : vector<8x128xf32> to vector<8x32xf32>
    %162 = vector.extract_strided_slice %159 {offsets = [0, 64], sizes = [8, 32], strides = [1, 1]} : vector<8x128xf32> to vector<8x32xf32>
    %163 = vector.extract_strided_slice %158 {offsets = [0, 96], sizes = [8, 32], strides = [1, 1]} : vector<8x128xf32> to vector<8x32xf32>
    %164 = arith.mulf %161, %127 : vector<8x32xf32>
    %165 = arith.mulf %160, %162 : vector<8x32xf32>
    %166 = arith.addf %164, %165 : vector<8x32xf32>
    %167 = math.tanh %166 : vector<8x32xf32>
    %168 = arith.mulf %163, %167 : vector<8x32xf32>
    tpu.wait_dma2 semaphore(%arg27 : memref<!tpu.dma_semaphore, #tpu.memory_space<semaphore_mem>>) src(%arg6 : memref<256x512xf32, #tpu.memory_space<any>>) dst(%arg25 : memref<256x512xf32, #tpu.memory_space<vmem>>)
    %c0_31 = arith.constant 0 : index
    %c0_32 = arith.constant 0 : index
    %169 = vector.load %arg25[%c0_31, %c0_32] : memref<256x512xf32, #tpu.memory_space<vmem>>, vector<32x512xf32>
    %cst_33 = arith.constant dense<0.000000e+00> : vector<8x512xf32>
    %170 = tpu.matmul %51, %169, %cst_33 {dimension_numbers = #tpu.dot_dimension_numbers<[1], [0], [0], [1], [0, 0, 1, 1], [], []>} : vector<8x32xf32>, vector<32x512xf32>, vector<8x512xf32> -> vector<8x512xf32>
    %c32 = arith.constant 32 : index
    %c0_34 = arith.constant 0 : index
    %171 = vector.load %arg25[%c32, %c0_34] : memref<256x512xf32, #tpu.memory_space<vmem>>, vector<32x512xf32>
    %cst_35 = arith.constant dense<0.000000e+00> : vector<8x512xf32>
    %172 = tpu.matmul %90, %171, %cst_35 {dimension_numbers = #tpu.dot_dimension_numbers<[1], [0], [0], [1], [0, 0, 1, 1], [], []>} : vector<8x32xf32>, vector<32x512xf32>, vector<8x512xf32> -> vector<8x512xf32>
    %173 = arith.addf %170, %172 : vector<8x512xf32>
    %c64 = arith.constant 64 : index
    %c0_36 = arith.constant 0 : index
    %174 = vector.load %arg25[%c64, %c0_36] : memref<256x512xf32, #tpu.memory_space<vmem>>, vector<32x512xf32>
    %cst_37 = arith.constant dense<0.000000e+00> : vector<8x512xf32>
    %175 = tpu.matmul %129, %174, %cst_37 {dimension_numbers = #tpu.dot_dimension_numbers<[1], [0], [0], [1], [0, 0, 1, 1], [], []>} : vector<8x32xf32>, vector<32x512xf32>, vector<8x512xf32> -> vector<8x512xf32>
    %176 = arith.addf %173, %175 : vector<8x512xf32>
    %c96 = arith.constant 96 : index
    %c0_38 = arith.constant 0 : index
    %177 = vector.load %arg25[%c96, %c0_38] : memref<256x512xf32, #tpu.memory_space<vmem>>, vector<32x512xf32>
    %cst_39 = arith.constant dense<0.000000e+00> : vector<8x512xf32>
    %178 = tpu.matmul %168, %177, %cst_39 {dimension_numbers = #tpu.dot_dimension_numbers<[1], [0], [0], [1], [0, 0, 1, 1], [], []>} : vector<8x32xf32>, vector<32x512xf32>, vector<8x512xf32> -> vector<8x512xf32>
    %179 = arith.addf %176, %178 : vector<8x512xf32>
    %180 = vector.extract_strided_slice %5 {offsets = [32, 0], sizes = [8, 128], strides = [1, 1]} : vector<64x128xf32> to vector<8x128xf32>
    %181 = arith.addf %180, %148 : vector<8x128xf32>
    %182 = arith.negf %181 : vector<8x128xf32>
    %183 = math.exp %182 : vector<8x128xf32>
    %cst_40 = arith.constant 1.000000e+00 : f32
    %184 = vector.broadcast %cst_40 : f32 to vector<8x128xf32>
    %185 = arith.addf %184, %183 : vector<8x128xf32>
    %186 = arith.divf %184, %185 : vector<8x128xf32>
    %187 = math.tanh %181 : vector<8x128xf32>
    %188 = vector.extract_strided_slice %186 {offsets = [0, 0], sizes = [8, 32], strides = [1, 1]} : vector<8x128xf32> to vector<8x32xf32>
    %189 = vector.extract_strided_slice %186 {offsets = [0, 32], sizes = [8, 32], strides = [1, 1]} : vector<8x128xf32> to vector<8x32xf32>
    %190 = vector.extract_strided_slice %187 {offsets = [0, 64], sizes = [8, 32], strides = [1, 1]} : vector<8x128xf32> to vector<8x32xf32>
    %191 = vector.extract_strided_slice %186 {offsets = [0, 96], sizes = [8, 32], strides = [1, 1]} : vector<8x128xf32> to vector<8x32xf32>
    %192 = arith.mulf %189, %144 : vector<8x32xf32>
    %193 = arith.mulf %188, %190 : vector<8x32xf32>
    %194 = arith.addf %192, %193 : vector<8x32xf32>
    %195 = math.tanh %194 : vector<8x32xf32>
    %196 = arith.mulf %191, %195 : vector<8x32xf32>
    %cst_41 = arith.constant dense<0.000000e+00> : vector<8x256xf32>
    %197 = tpu.matmul %196, %6, %cst_41 {dimension_numbers = #tpu.dot_dimension_numbers<[1], [0], [0], [1], [0, 0, 1, 1], [], []>} : vector<8x32xf32>, vector<32x256xf32>, vector<8x256xf32> -> vector<8x256xf32>
    %198 = vector.extract_strided_slice %197 {offsets = [0, 0], sizes = [8, 128], strides = [1, 1]} : vector<8x256xf32> to vector<8x128xf32>
    %199 = vector.extract_strided_slice %197 {offsets = [0, 128], sizes = [8, 128], strides = [1, 1]} : vector<8x256xf32> to vector<8x128xf32>
    %200 = vector.broadcast %8 : vector<1x128xf32> to vector<8x128xf32>
    %201 = arith.addf %199, %200 : vector<8x128xf32>
    %cst_42 = arith.constant dense<0.000000e+00> : vector<8x128xf32>
    %202 = tpu.matmul %168, %7, %cst_42 {dimension_numbers = #tpu.dot_dimension_numbers<[1], [0], [0], [1], [0, 0, 1, 1], [], []>} : vector<8x32xf32>, vector<32x128xf32>, vector<8x128xf32> -> vector<8x128xf32>
    %203 = arith.addf %201, %202 : vector<8x128xf32>
    %204 = arith.negf %203 : vector<8x128xf32>
    %205 = math.exp %204 : vector<8x128xf32>
    %cst_43 = arith.constant 1.000000e+00 : f32
    %206 = vector.broadcast %cst_43 : f32 to vector<8x128xf32>
    %207 = arith.addf %206, %205 : vector<8x128xf32>
    %208 = arith.divf %206, %207 : vector<8x128xf32>
    %209 = math.tanh %203 : vector<8x128xf32>
    %210 = vector.extract_strided_slice %208 {offsets = [0, 0], sizes = [8, 32], strides = [1, 1]} : vector<8x128xf32> to vector<8x32xf32>
    %211 = vector.extract_strided_slice %208 {offsets = [0, 32], sizes = [8, 32], strides = [1, 1]} : vector<8x128xf32> to vector<8x32xf32>
    %212 = vector.extract_strided_slice %209 {offsets = [0, 64], sizes = [8, 32], strides = [1, 1]} : vector<8x128xf32> to vector<8x32xf32>
    %213 = vector.extract_strided_slice %208 {offsets = [0, 96], sizes = [8, 32], strides = [1, 1]} : vector<8x128xf32> to vector<8x32xf32>
    %214 = arith.mulf %211, %166 : vector<8x32xf32>
    %215 = arith.mulf %210, %212 : vector<8x32xf32>
    %216 = arith.addf %214, %215 : vector<8x32xf32>
    %217 = math.tanh %216 : vector<8x32xf32>
    %218 = arith.mulf %213, %217 : vector<8x32xf32>
    %c128 = arith.constant 128 : index
    %c0_44 = arith.constant 0 : index
    %219 = vector.load %arg25[%c128, %c0_44] : memref<256x512xf32, #tpu.memory_space<vmem>>, vector<32x512xf32>
    %cst_45 = arith.constant dense<0.000000e+00> : vector<8x512xf32>
    %220 = tpu.matmul %218, %219, %cst_45 {dimension_numbers = #tpu.dot_dimension_numbers<[1], [0], [0], [1], [0, 0, 1, 1], [], []>} : vector<8x32xf32>, vector<32x512xf32>, vector<8x512xf32> -> vector<8x512xf32>
    %221 = arith.addf %179, %220 : vector<8x512xf32>
    %222 = vector.extract_strided_slice %5 {offsets = [40, 0], sizes = [8, 128], strides = [1, 1]} : vector<64x128xf32> to vector<8x128xf32>
    %223 = arith.addf %222, %198 : vector<8x128xf32>
    %224 = arith.negf %223 : vector<8x128xf32>
    %225 = math.exp %224 : vector<8x128xf32>
    %cst_46 = arith.constant 1.000000e+00 : f32
    %226 = vector.broadcast %cst_46 : f32 to vector<8x128xf32>
    %227 = arith.addf %226, %225 : vector<8x128xf32>
    %228 = arith.divf %226, %227 : vector<8x128xf32>
    %229 = math.tanh %223 : vector<8x128xf32>
    %230 = vector.extract_strided_slice %228 {offsets = [0, 0], sizes = [8, 32], strides = [1, 1]} : vector<8x128xf32> to vector<8x32xf32>
    %231 = vector.extract_strided_slice %228 {offsets = [0, 32], sizes = [8, 32], strides = [1, 1]} : vector<8x128xf32> to vector<8x32xf32>
    %232 = vector.extract_strided_slice %229 {offsets = [0, 64], sizes = [8, 32], strides = [1, 1]} : vector<8x128xf32> to vector<8x32xf32>
    %233 = vector.extract_strided_slice %228 {offsets = [0, 96], sizes = [8, 32], strides = [1, 1]} : vector<8x128xf32> to vector<8x32xf32>
    %234 = arith.mulf %231, %194 : vector<8x32xf32>
    %235 = arith.mulf %230, %232 : vector<8x32xf32>
    %236 = arith.addf %234, %235 : vector<8x32xf32>
    %237 = math.tanh %236 : vector<8x32xf32>
    %238 = arith.mulf %233, %237 : vector<8x32xf32>
    %cst_47 = arith.constant dense<0.000000e+00> : vector<8x256xf32>
    %239 = tpu.matmul %238, %6, %cst_47 {dimension_numbers = #tpu.dot_dimension_numbers<[1], [0], [0], [1], [0, 0, 1, 1], [], []>} : vector<8x32xf32>, vector<32x256xf32>, vector<8x256xf32> -> vector<8x256xf32>
    %240 = vector.extract_strided_slice %239 {offsets = [0, 0], sizes = [8, 128], strides = [1, 1]} : vector<8x256xf32> to vector<8x128xf32>
    %241 = vector.extract_strided_slice %239 {offsets = [0, 128], sizes = [8, 128], strides = [1, 1]} : vector<8x256xf32> to vector<8x128xf32>
    %242 = vector.broadcast %8 : vector<1x128xf32> to vector<8x128xf32>
    %243 = arith.addf %241, %242 : vector<8x128xf32>
    %cst_48 = arith.constant dense<0.000000e+00> : vector<8x128xf32>
    %244 = tpu.matmul %218, %7, %cst_48 {dimension_numbers = #tpu.dot_dimension_numbers<[1], [0], [0], [1], [0, 0, 1, 1], [], []>} : vector<8x32xf32>, vector<32x128xf32>, vector<8x128xf32> -> vector<8x128xf32>
    %245 = arith.addf %243, %244 : vector<8x128xf32>
    %246 = arith.negf %245 : vector<8x128xf32>
    %247 = math.exp %246 : vector<8x128xf32>
    %cst_49 = arith.constant 1.000000e+00 : f32
    %248 = vector.broadcast %cst_49 : f32 to vector<8x128xf32>
    %249 = arith.addf %248, %247 : vector<8x128xf32>
    %250 = arith.divf %248, %249 : vector<8x128xf32>
    %251 = math.tanh %245 : vector<8x128xf32>
    %252 = vector.extract_strided_slice %250 {offsets = [0, 0], sizes = [8, 32], strides = [1, 1]} : vector<8x128xf32> to vector<8x32xf32>
    %253 = vector.extract_strided_slice %250 {offsets = [0, 32], sizes = [8, 32], strides = [1, 1]} : vector<8x128xf32> to vector<8x32xf32>
    %254 = vector.extract_strided_slice %251 {offsets = [0, 64], sizes = [8, 32], strides = [1, 1]} : vector<8x128xf32> to vector<8x32xf32>
    %255 = vector.extract_strided_slice %250 {offsets = [0, 96], sizes = [8, 32], strides = [1, 1]} : vector<8x128xf32> to vector<8x32xf32>
    %256 = arith.mulf %253, %216 : vector<8x32xf32>
    %257 = arith.mulf %252, %254 : vector<8x32xf32>
    %258 = arith.addf %256, %257 : vector<8x32xf32>
    %259 = math.tanh %258 : vector<8x32xf32>
    %260 = arith.mulf %255, %259 : vector<8x32xf32>
    %c160 = arith.constant 160 : index
    %c0_50 = arith.constant 0 : index
    %261 = vector.load %arg25[%c160, %c0_50] : memref<256x512xf32, #tpu.memory_space<vmem>>, vector<32x512xf32>
    %cst_51 = arith.constant dense<0.000000e+00> : vector<8x512xf32>
    %262 = tpu.matmul %260, %261, %cst_51 {dimension_numbers = #tpu.dot_dimension_numbers<[1], [0], [0], [1], [0, 0, 1, 1], [], []>} : vector<8x32xf32>, vector<32x512xf32>, vector<8x512xf32> -> vector<8x512xf32>
    %263 = arith.addf %221, %262 : vector<8x512xf32>
    %264 = vector.extract_strided_slice %5 {offsets = [48, 0], sizes = [8, 128], strides = [1, 1]} : vector<64x128xf32> to vector<8x128xf32>
    %265 = arith.addf %264, %240 : vector<8x128xf32>
    %266 = arith.negf %265 : vector<8x128xf32>
    %267 = math.exp %266 : vector<8x128xf32>
    %cst_52 = arith.constant 1.000000e+00 : f32
    %268 = vector.broadcast %cst_52 : f32 to vector<8x128xf32>
    %269 = arith.addf %268, %267 : vector<8x128xf32>
    %270 = arith.divf %268, %269 : vector<8x128xf32>
    %271 = math.tanh %265 : vector<8x128xf32>
    %272 = vector.extract_strided_slice %270 {offsets = [0, 0], sizes = [8, 32], strides = [1, 1]} : vector<8x128xf32> to vector<8x32xf32>
    %273 = vector.extract_strided_slice %270 {offsets = [0, 32], sizes = [8, 32], strides = [1, 1]} : vector<8x128xf32> to vector<8x32xf32>
    %274 = vector.extract_strided_slice %271 {offsets = [0, 64], sizes = [8, 32], strides = [1, 1]} : vector<8x128xf32> to vector<8x32xf32>
    %275 = vector.extract_strided_slice %270 {offsets = [0, 96], sizes = [8, 32], strides = [1, 1]} : vector<8x128xf32> to vector<8x32xf32>
    %276 = arith.mulf %273, %236 : vector<8x32xf32>
    %277 = arith.mulf %272, %274 : vector<8x32xf32>
    %278 = arith.addf %276, %277 : vector<8x32xf32>
    %279 = math.tanh %278 : vector<8x32xf32>
    %280 = arith.mulf %275, %279 : vector<8x32xf32>
    %cst_53 = arith.constant dense<0.000000e+00> : vector<8x256xf32>
    %281 = tpu.matmul %280, %6, %cst_53 {dimension_numbers = #tpu.dot_dimension_numbers<[1], [0], [0], [1], [0, 0, 1, 1], [], []>} : vector<8x32xf32>, vector<32x256xf32>, vector<8x256xf32> -> vector<8x256xf32>
    %282 = vector.extract_strided_slice %281 {offsets = [0, 0], sizes = [8, 128], strides = [1, 1]} : vector<8x256xf32> to vector<8x128xf32>
    %283 = vector.extract_strided_slice %281 {offsets = [0, 128], sizes = [8, 128], strides = [1, 1]} : vector<8x256xf32> to vector<8x128xf32>
    %284 = vector.broadcast %8 : vector<1x128xf32> to vector<8x128xf32>
    %285 = arith.addf %283, %284 : vector<8x128xf32>
    %cst_54 = arith.constant dense<0.000000e+00> : vector<8x128xf32>
    %286 = tpu.matmul %260, %7, %cst_54 {dimension_numbers = #tpu.dot_dimension_numbers<[1], [0], [0], [1], [0, 0, 1, 1], [], []>} : vector<8x32xf32>, vector<32x128xf32>, vector<8x128xf32> -> vector<8x128xf32>
    %287 = arith.addf %285, %286 : vector<8x128xf32>
    %288 = arith.negf %287 : vector<8x128xf32>
    %289 = math.exp %288 : vector<8x128xf32>
    %cst_55 = arith.constant 1.000000e+00 : f32
    %290 = vector.broadcast %cst_55 : f32 to vector<8x128xf32>
    %291 = arith.addf %290, %289 : vector<8x128xf32>
    %292 = arith.divf %290, %291 : vector<8x128xf32>
    %293 = math.tanh %287 : vector<8x128xf32>
    %294 = vector.extract_strided_slice %292 {offsets = [0, 0], sizes = [8, 32], strides = [1, 1]} : vector<8x128xf32> to vector<8x32xf32>
    %295 = vector.extract_strided_slice %292 {offsets = [0, 32], sizes = [8, 32], strides = [1, 1]} : vector<8x128xf32> to vector<8x32xf32>
    %296 = vector.extract_strided_slice %293 {offsets = [0, 64], sizes = [8, 32], strides = [1, 1]} : vector<8x128xf32> to vector<8x32xf32>
    %297 = vector.extract_strided_slice %292 {offsets = [0, 96], sizes = [8, 32], strides = [1, 1]} : vector<8x128xf32> to vector<8x32xf32>
    %298 = arith.mulf %295, %258 : vector<8x32xf32>
    %299 = arith.mulf %294, %296 : vector<8x32xf32>
    %300 = arith.addf %298, %299 : vector<8x32xf32>
    %301 = math.tanh %300 : vector<8x32xf32>
    %302 = arith.mulf %297, %301 : vector<8x32xf32>
    %c192 = arith.constant 192 : index
    %c0_56 = arith.constant 0 : index
    %303 = vector.load %arg25[%c192, %c0_56] : memref<256x512xf32, #tpu.memory_space<vmem>>, vector<32x512xf32>
    %cst_57 = arith.constant dense<0.000000e+00> : vector<8x512xf32>
    %304 = tpu.matmul %302, %303, %cst_57 {dimension_numbers = #tpu.dot_dimension_numbers<[1], [0], [0], [1], [0, 0, 1, 1], [], []>} : vector<8x32xf32>, vector<32x512xf32>, vector<8x512xf32> -> vector<8x512xf32>
    %305 = arith.addf %263, %304 : vector<8x512xf32>
    %306 = vector.extract_strided_slice %5 {offsets = [56, 0], sizes = [8, 128], strides = [1, 1]} : vector<64x128xf32> to vector<8x128xf32>
    %307 = arith.addf %306, %282 : vector<8x128xf32>
    %308 = arith.negf %307 : vector<8x128xf32>
    %309 = math.exp %308 : vector<8x128xf32>
    %cst_58 = arith.constant 1.000000e+00 : f32
    %310 = vector.broadcast %cst_58 : f32 to vector<8x128xf32>
    %311 = arith.addf %310, %309 : vector<8x128xf32>
    %312 = arith.divf %310, %311 : vector<8x128xf32>
    %313 = math.tanh %307 : vector<8x128xf32>
    %314 = vector.extract_strided_slice %312 {offsets = [0, 0], sizes = [8, 32], strides = [1, 1]} : vector<8x128xf32> to vector<8x32xf32>
    %315 = vector.extract_strided_slice %312 {offsets = [0, 32], sizes = [8, 32], strides = [1, 1]} : vector<8x128xf32> to vector<8x32xf32>
    %316 = vector.extract_strided_slice %313 {offsets = [0, 64], sizes = [8, 32], strides = [1, 1]} : vector<8x128xf32> to vector<8x32xf32>
    %317 = vector.extract_strided_slice %312 {offsets = [0, 96], sizes = [8, 32], strides = [1, 1]} : vector<8x128xf32> to vector<8x32xf32>
    %318 = arith.mulf %315, %278 : vector<8x32xf32>
    %319 = arith.mulf %314, %316 : vector<8x32xf32>
    %320 = arith.addf %318, %319 : vector<8x32xf32>
    %321 = math.tanh %320 : vector<8x32xf32>
    %322 = arith.mulf %317, %321 : vector<8x32xf32>
    %cst_59 = arith.constant dense<0.000000e+00> : vector<8x256xf32>
    %323 = tpu.matmul %322, %6, %cst_59 {dimension_numbers = #tpu.dot_dimension_numbers<[1], [0], [0], [1], [0, 0, 1, 1], [], []>} : vector<8x32xf32>, vector<32x256xf32>, vector<8x256xf32> -> vector<8x256xf32>
    %324 = vector.extract_strided_slice %323 {offsets = [0, 128], sizes = [8, 128], strides = [1, 1]} : vector<8x256xf32> to vector<8x128xf32>
    %325 = vector.broadcast %8 : vector<1x128xf32> to vector<8x128xf32>
    %326 = arith.addf %324, %325 : vector<8x128xf32>
    %cst_60 = arith.constant dense<0.000000e+00> : vector<8x128xf32>
    %327 = tpu.matmul %302, %7, %cst_60 {dimension_numbers = #tpu.dot_dimension_numbers<[1], [0], [0], [1], [0, 0, 1, 1], [], []>} : vector<8x32xf32>, vector<32x128xf32>, vector<8x128xf32> -> vector<8x128xf32>
    %328 = arith.addf %326, %327 : vector<8x128xf32>
    %329 = arith.negf %328 : vector<8x128xf32>
    %330 = math.exp %329 : vector<8x128xf32>
    %cst_61 = arith.constant 1.000000e+00 : f32
    %331 = vector.broadcast %cst_61 : f32 to vector<8x128xf32>
    %332 = arith.addf %331, %330 : vector<8x128xf32>
    %333 = arith.divf %331, %332 : vector<8x128xf32>
    %334 = math.tanh %328 : vector<8x128xf32>
    %335 = vector.extract_strided_slice %333 {offsets = [0, 0], sizes = [8, 32], strides = [1, 1]} : vector<8x128xf32> to vector<8x32xf32>
    %336 = vector.extract_strided_slice %333 {offsets = [0, 32], sizes = [8, 32], strides = [1, 1]} : vector<8x128xf32> to vector<8x32xf32>
    %337 = vector.extract_strided_slice %334 {offsets = [0, 64], sizes = [8, 32], strides = [1, 1]} : vector<8x128xf32> to vector<8x32xf32>
    %338 = vector.extract_strided_slice %333 {offsets = [0, 96], sizes = [8, 32], strides = [1, 1]} : vector<8x128xf32> to vector<8x32xf32>
    %339 = arith.mulf %336, %300 : vector<8x32xf32>
    %340 = arith.mulf %335, %337 : vector<8x32xf32>
    %341 = arith.addf %339, %340 : vector<8x32xf32>
    %342 = math.tanh %341 : vector<8x32xf32>
    %343 = arith.mulf %338, %342 : vector<8x32xf32>
    %c224 = arith.constant 224 : index
    %c0_62 = arith.constant 0 : index
    %344 = vector.load %arg25[%c224, %c0_62] : memref<256x512xf32, #tpu.memory_space<vmem>>, vector<32x512xf32>
    %cst_63 = arith.constant dense<0.000000e+00> : vector<8x512xf32>
    %345 = tpu.matmul %343, %344, %cst_63 {dimension_numbers = #tpu.dot_dimension_numbers<[1], [0], [0], [1], [0, 0, 1, 1], [], []>} : vector<8x32xf32>, vector<32x512xf32>, vector<8x512xf32> -> vector<8x512xf32>
    %346 = arith.addf %305, %345 : vector<8x512xf32>
    %347 = vector.extract_strided_slice %346 {offsets = [0, 0], sizes = [2, 512], strides = [1, 1]} : vector<8x512xf32> to vector<2x512xf32>
    %c0_64 = arith.constant 0 : index
    %c0_65 = arith.constant 0 : index
    %348 = vector.load %arg7[%c0_64, %c0_65] : memref<1x512xf32, #tpu.memory_space<vmem>>, vector<1x512xf32>
    %349 = vector.broadcast %348 : vector<1x512xf32> to vector<2x512xf32>
    %350 = arith.addf %347, %349 : vector<2x512xf32>
    %cst_66 = arith.constant dense<0.000000e+00> : vector<512xf32>
    %351 = vector.multi_reduction <add>, %350, %cst_66 [0] : vector<2x512xf32> to vector<512xf32>
    %352 = vector.shape_cast %351 : vector<512xf32> to vector<1x512xf32>
    %cst_67 = arith.constant 5.000000e-01 : f32
    %353 = vector.broadcast %cst_67 : f32 to vector<1x512xf32>
    %354 = arith.mulf %352, %353 : vector<1x512xf32>
    %355 = arith.mulf %350, %350 : vector<2x512xf32>
    %cst_68 = arith.constant dense<0.000000e+00> : vector<512xf32>
    %356 = vector.multi_reduction <add>, %355, %cst_68 [0] : vector<2x512xf32> to vector<512xf32>
    %357 = vector.shape_cast %356 : vector<512xf32> to vector<1x512xf32>
    %cst_69 = arith.constant 5.000000e-01 : f32
    %358 = vector.broadcast %cst_69 : f32 to vector<1x512xf32>
    %359 = arith.mulf %357, %358 : vector<1x512xf32>
    %360 = arith.mulf %354, %354 : vector<1x512xf32>
    %361 = arith.subf %359, %360 : vector<1x512xf32>
    %cst_70 = arith.constant 0.000000e+00 : f32
    %362 = vector.broadcast %cst_70 : f32 to vector<1x512xf32>
    %363 = arith.maximumf %361, %362 : vector<1x512xf32>
    %364 = vector.broadcast %354 : vector<1x512xf32> to vector<2x512xf32>
    %365 = arith.subf %350, %364 : vector<2x512xf32>
    %cst_71 = arith.constant 9.99999974E-6 : f32
    %366 = vector.broadcast %cst_71 : f32 to vector<1x512xf32>
    %367 = arith.addf %363, %366 : vector<1x512xf32>
    %368 = math.rsqrt %367 : vector<1x512xf32>
    %369 = vector.broadcast %368 : vector<1x512xf32> to vector<2x512xf32>
    %370 = arith.mulf %365, %369 : vector<2x512xf32>
    %c0_72 = arith.constant 0 : index
    %c0_73 = arith.constant 0 : index
    %371 = vector.load %arg8[%c0_72, %c0_73] : memref<1x512xf32, #tpu.memory_space<vmem>>, vector<1x512xf32>
    %372 = vector.broadcast %371 : vector<1x512xf32> to vector<2x512xf32>
    %373 = arith.mulf %370, %372 : vector<2x512xf32>
    %c0_74 = arith.constant 0 : index
    %c0_75 = arith.constant 0 : index
    %374 = vector.load %arg9[%c0_74, %c0_75] : memref<1x512xf32, #tpu.memory_space<vmem>>, vector<1x512xf32>
    %375 = vector.broadcast %374 : vector<1x512xf32> to vector<2x512xf32>
    %376 = arith.addf %373, %375 : vector<2x512xf32>
    %cst_76 = arith.constant 0.000000e+00 : f32
    %377 = vector.broadcast %cst_76 : f32 to vector<2x512xf32>
    %378 = arith.maximumf %376, %377 : vector<2x512xf32>
    tpu.wait_dma2 semaphore(%arg28 : memref<!tpu.dma_semaphore, #tpu.memory_space<semaphore_mem>>) src(%arg10 : memref<512x256xf32, #tpu.memory_space<any>>) dst(%arg26 : memref<512x256xf32, #tpu.memory_space<vmem>>)
    %c0_77 = arith.constant 0 : index
    %c0_78 = arith.constant 0 : index
    %379 = vector.load %arg26[%c0_77, %c0_78] : memref<512x256xf32, #tpu.memory_space<vmem>>, vector<512x256xf32>
    %cst_79 = arith.constant dense<0.000000e+00> : vector<2x256xf32>
    %380 = tpu.matmul %378, %379, %cst_79 {dimension_numbers = #tpu.dot_dimension_numbers<[1], [0], [0], [1], [0, 0, 1, 1], [], []>} : vector<2x512xf32>, vector<512x256xf32>, vector<2x256xf32> -> vector<2x256xf32>
    %c0_80 = arith.constant 0 : index
    %c0_81 = arith.constant 0 : index
    %381 = vector.load %arg11[%c0_80, %c0_81] : memref<1x256xf32, #tpu.memory_space<vmem>>, vector<1x256xf32>
    %382 = vector.broadcast %381 : vector<1x256xf32> to vector<2x256xf32>
    %383 = arith.addf %380, %382 : vector<2x256xf32>
    %cst_82 = arith.constant dense<0.000000e+00> : vector<256xf32>
    %384 = vector.multi_reduction <add>, %383, %cst_82 [0] : vector<2x256xf32> to vector<256xf32>
    %385 = vector.shape_cast %384 : vector<256xf32> to vector<1x256xf32>
    %cst_83 = arith.constant 5.000000e-01 : f32
    %386 = vector.broadcast %cst_83 : f32 to vector<1x256xf32>
    %387 = arith.mulf %385, %386 : vector<1x256xf32>
    %388 = arith.mulf %383, %383 : vector<2x256xf32>
    %cst_84 = arith.constant dense<0.000000e+00> : vector<256xf32>
    %389 = vector.multi_reduction <add>, %388, %cst_84 [0] : vector<2x256xf32> to vector<256xf32>
    %390 = vector.shape_cast %389 : vector<256xf32> to vector<1x256xf32>
    %cst_85 = arith.constant 5.000000e-01 : f32
    %391 = vector.broadcast %cst_85 : f32 to vector<1x256xf32>
    %392 = arith.mulf %390, %391 : vector<1x256xf32>
    %393 = arith.mulf %387, %387 : vector<1x256xf32>
    %394 = arith.subf %392, %393 : vector<1x256xf32>
    %cst_86 = arith.constant 0.000000e+00 : f32
    %395 = vector.broadcast %cst_86 : f32 to vector<1x256xf32>
    %396 = arith.maximumf %394, %395 : vector<1x256xf32>
    %397 = vector.broadcast %387 : vector<1x256xf32> to vector<2x256xf32>
    %398 = arith.subf %383, %397 : vector<2x256xf32>
    %cst_87 = arith.constant 9.99999974E-6 : f32
    %399 = vector.broadcast %cst_87 : f32 to vector<1x256xf32>
    %400 = arith.addf %396, %399 : vector<1x256xf32>
    %401 = math.rsqrt %400 : vector<1x256xf32>
    %402 = vector.broadcast %401 : vector<1x256xf32> to vector<2x256xf32>
    %403 = arith.mulf %398, %402 : vector<2x256xf32>
    %c0_88 = arith.constant 0 : index
    %c0_89 = arith.constant 0 : index
    %404 = vector.load %arg12[%c0_88, %c0_89] : memref<1x256xf32, #tpu.memory_space<vmem>>, vector<1x256xf32>
    %405 = vector.broadcast %404 : vector<1x256xf32> to vector<2x256xf32>
    %406 = arith.mulf %403, %405 : vector<2x256xf32>
    %c0_90 = arith.constant 0 : index
    %c0_91 = arith.constant 0 : index
    %407 = vector.load %arg13[%c0_90, %c0_91] : memref<1x256xf32, #tpu.memory_space<vmem>>, vector<1x256xf32>
    %408 = vector.broadcast %407 : vector<1x256xf32> to vector<2x256xf32>
    %409 = arith.addf %406, %408 : vector<2x256xf32>
    %cst_92 = arith.constant 0.000000e+00 : f32
    %410 = vector.broadcast %cst_92 : f32 to vector<2x256xf32>
    %411 = arith.maximumf %409, %410 : vector<2x256xf32>
    %c0_93 = arith.constant 0 : index
    %c0_94 = arith.constant 0 : index
    %412 = vector.load %arg14[%c0_93, %c0_94] : memref<256x128xf32, #tpu.memory_space<vmem>>, vector<256x128xf32>
    %cst_95 = arith.constant dense<0.000000e+00> : vector<2x128xf32>
    %413 = tpu.matmul %411, %412, %cst_95 {dimension_numbers = #tpu.dot_dimension_numbers<[1], [0], [0], [1], [0, 0, 1, 1], [], []>} : vector<2x256xf32>, vector<256x128xf32>, vector<2x128xf32> -> vector<2x128xf32>
    %c0_96 = arith.constant 0 : index
    %c0_97 = arith.constant 0 : index
    %414 = vector.load %arg15[%c0_96, %c0_97] : memref<1x128xf32, #tpu.memory_space<vmem>>, vector<1x128xf32>
    %415 = vector.broadcast %414 : vector<1x128xf32> to vector<2x128xf32>
    %416 = arith.addf %413, %415 : vector<2x128xf32>
    %cst_98 = arith.constant dense<0.000000e+00> : vector<128xf32>
    %417 = vector.multi_reduction <add>, %416, %cst_98 [0] : vector<2x128xf32> to vector<128xf32>
    %418 = vector.shape_cast %417 : vector<128xf32> to vector<1x128xf32>
    %cst_99 = arith.constant 5.000000e-01 : f32
    %419 = vector.broadcast %cst_99 : f32 to vector<1x128xf32>
    %420 = arith.mulf %418, %419 : vector<1x128xf32>
    %421 = arith.mulf %416, %416 : vector<2x128xf32>
    %cst_100 = arith.constant dense<0.000000e+00> : vector<128xf32>
    %422 = vector.multi_reduction <add>, %421, %cst_100 [0] : vector<2x128xf32> to vector<128xf32>
    %423 = vector.shape_cast %422 : vector<128xf32> to vector<1x128xf32>
    %cst_101 = arith.constant 5.000000e-01 : f32
    %424 = vector.broadcast %cst_101 : f32 to vector<1x128xf32>
    %425 = arith.mulf %423, %424 : vector<1x128xf32>
    %426 = arith.mulf %420, %420 : vector<1x128xf32>
    %427 = arith.subf %425, %426 : vector<1x128xf32>
    %cst_102 = arith.constant 0.000000e+00 : f32
    %428 = vector.broadcast %cst_102 : f32 to vector<1x128xf32>
    %429 = arith.maximumf %427, %428 : vector<1x128xf32>
    %430 = vector.broadcast %420 : vector<1x128xf32> to vector<2x128xf32>
    %431 = arith.subf %416, %430 : vector<2x128xf32>
    %cst_103 = arith.constant 9.99999974E-6 : f32
    %432 = vector.broadcast %cst_103 : f32 to vector<1x128xf32>
    %433 = arith.addf %429, %432 : vector<1x128xf32>
    %434 = math.rsqrt %433 : vector<1x128xf32>
    %435 = vector.broadcast %434 : vector<1x128xf32> to vector<2x128xf32>
    %436 = arith.mulf %431, %435 : vector<2x128xf32>
    %c0_104 = arith.constant 0 : index
    %c0_105 = arith.constant 0 : index
    %437 = vector.load %arg16[%c0_104, %c0_105] : memref<1x128xf32, #tpu.memory_space<vmem>>, vector<1x128xf32>
    %438 = vector.broadcast %437 : vector<1x128xf32> to vector<2x128xf32>
    %439 = arith.mulf %436, %438 : vector<2x128xf32>
    %c0_106 = arith.constant 0 : index
    %c0_107 = arith.constant 0 : index
    %440 = vector.load %arg17[%c0_106, %c0_107] : memref<1x128xf32, #tpu.memory_space<vmem>>, vector<1x128xf32>
    %441 = vector.broadcast %440 : vector<1x128xf32> to vector<2x128xf32>
    %442 = arith.addf %439, %441 : vector<2x128xf32>
    %cst_108 = arith.constant 0.000000e+00 : f32
    %443 = vector.broadcast %cst_108 : f32 to vector<2x128xf32>
    %444 = arith.maximumf %442, %443 : vector<2x128xf32>
    %c0_109 = arith.constant 0 : index
    %c0_110 = arith.constant 0 : index
    %445 = vector.load %arg18[%c0_109, %c0_110] : memref<128x32xf32, #tpu.memory_space<vmem>>, vector<128x32xf32>
    %cst_111 = arith.constant dense<0.000000e+00> : vector<2x32xf32>
    %446 = tpu.matmul %444, %445, %cst_111 {dimension_numbers = #tpu.dot_dimension_numbers<[1], [0], [0], [1], [0, 0, 1, 1], [], []>} : vector<2x128xf32>, vector<128x32xf32>, vector<2x32xf32> -> vector<2x32xf32>
    %c0_112 = arith.constant 0 : index
    %c0_113 = arith.constant 0 : index
    %447 = vector.load %arg19[%c0_112, %c0_113] : memref<1x32xf32, #tpu.memory_space<vmem>>, vector<1x32xf32>
    %448 = vector.broadcast %447 : vector<1x32xf32> to vector<2x32xf32>
    %449 = arith.addf %446, %448 : vector<2x32xf32>
    %cst_114 = arith.constant dense<0.000000e+00> : vector<32xf32>
    %450 = vector.multi_reduction <add>, %449, %cst_114 [0] : vector<2x32xf32> to vector<32xf32>
    %451 = vector.shape_cast %450 : vector<32xf32> to vector<1x32xf32>
    %cst_115 = arith.constant 5.000000e-01 : f32
    %452 = vector.broadcast %cst_115 : f32 to vector<1x32xf32>
    %453 = arith.mulf %451, %452 : vector<1x32xf32>
    %454 = arith.mulf %449, %449 : vector<2x32xf32>
    %cst_116 = arith.constant dense<0.000000e+00> : vector<32xf32>
    %455 = vector.multi_reduction <add>, %454, %cst_116 [0] : vector<2x32xf32> to vector<32xf32>
    %456 = vector.shape_cast %455 : vector<32xf32> to vector<1x32xf32>
    %cst_117 = arith.constant 5.000000e-01 : f32
    %457 = vector.broadcast %cst_117 : f32 to vector<1x32xf32>
    %458 = arith.mulf %456, %457 : vector<1x32xf32>
    %459 = arith.mulf %453, %453 : vector<1x32xf32>
    %460 = arith.subf %458, %459 : vector<1x32xf32>
    %cst_118 = arith.constant 0.000000e+00 : f32
    %461 = vector.broadcast %cst_118 : f32 to vector<1x32xf32>
    %462 = arith.maximumf %460, %461 : vector<1x32xf32>
    %463 = vector.broadcast %453 : vector<1x32xf32> to vector<2x32xf32>
    %464 = arith.subf %449, %463 : vector<2x32xf32>
    %cst_119 = arith.constant 9.99999974E-6 : f32
    %465 = vector.broadcast %cst_119 : f32 to vector<1x32xf32>
    %466 = arith.addf %462, %465 : vector<1x32xf32>
    %467 = math.rsqrt %466 : vector<1x32xf32>
    %468 = vector.broadcast %467 : vector<1x32xf32> to vector<2x32xf32>
    %469 = arith.mulf %464, %468 : vector<2x32xf32>
    %c0_120 = arith.constant 0 : index
    %c0_121 = arith.constant 0 : index
    %470 = vector.load %arg20[%c0_120, %c0_121] : memref<1x32xf32, #tpu.memory_space<vmem>>, vector<1x32xf32>
    %471 = vector.broadcast %470 : vector<1x32xf32> to vector<2x32xf32>
    %472 = arith.mulf %469, %471 : vector<2x32xf32>
    %c0_122 = arith.constant 0 : index
    %c0_123 = arith.constant 0 : index
    %473 = vector.load %arg21[%c0_122, %c0_123] : memref<1x32xf32, #tpu.memory_space<vmem>>, vector<1x32xf32>
    %474 = vector.broadcast %473 : vector<1x32xf32> to vector<2x32xf32>
    %475 = arith.addf %472, %474 : vector<2x32xf32>
    %cst_124 = arith.constant 0.000000e+00 : f32
    %476 = vector.broadcast %cst_124 : f32 to vector<2x32xf32>
    %477 = arith.maximumf %475, %476 : vector<2x32xf32>
    %c0_125 = arith.constant 0 : index
    %c0_126 = arith.constant 0 : index
    %478 = vector.load %arg22[%c0_125, %c0_126] : memref<32x10xf32, #tpu.memory_space<vmem>>, vector<32x10xf32>
    %cst_127 = arith.constant dense<0.000000e+00> : vector<2x10xf32>
    %479 = tpu.matmul %477, %478, %cst_127 {dimension_numbers = #tpu.dot_dimension_numbers<[1], [0], [0], [1], [0, 0, 1, 1], [], []>} : vector<2x32xf32>, vector<32x10xf32>, vector<2x10xf32> -> vector<2x10xf32>
    %c0_128 = arith.constant 0 : index
    %c0_129 = arith.constant 0 : index
    %480 = vector.load %arg23[%c0_128, %c0_129] : memref<1x10xf32, #tpu.memory_space<vmem>>, vector<1x10xf32>
    %481 = vector.broadcast %480 : vector<1x10xf32> to vector<2x10xf32>
    %482 = arith.addf %479, %481 : vector<2x10xf32>
    %c0_130 = arith.constant 0 : index
    %c0_131 = arith.constant 0 : index
    %483 = vector.load %arg24[%c0_130, %c0_131] : memref<2x10xf32, #tpu.memory_space<vmem>>, vector<2x10xf32>
    tpu.vector_store %arg24[%c0_130, %c0_131], %482 {strides = array<i32>} : memref<2x10xf32, #tpu.memory_space<vmem>>, vector<2x10xf32>,
    return
  }
}

</mosaic_0001>

<bundles_post_ra>
// kernel: lstm_model_forward.1
= control target key start
LH: loop header
LB: loop body
LE: loop exit
PB: predicated region body
PF: predicated region fallthrough
CT: control target
= control target key end

     0   :  { %s5971_s0 = inlined_call_operand.vmem [shape: f32[64,4], index: 0, kind: input, shape index: {}]   ;;  %s5972_s1 = inlined_call_operand.vmem [shape: f32[4,128], index: 1, kind: input, shape index: {}]   ;;  %s5973_s2 = inlined_call_operand.vmem [shape: f32[1,128], index: 2, kind: input, shape index: {}]   ;;  %s5974_s3 = inlined_call_operand.vmem [shape: f32[32,256], index: 3, kind: input, shape index: {}]   ;;  %s5975_s4 = inlined_call_operand.vmem [shape: f32[32,128], index: 4, kind: input, shape index: {}]   ;;  %s5976_s5 = inlined_call_operand.vmem [shape: f32[1,128], index: 5, kind: input, shape index: {}]   ;;  %s5977_s6 = inlined_call_operand.hbm [shape: f32[256,512], index: 6, kind: input, shape index: {}]   ;;  %s5978_s7 = inlined_call_operand.vmem [shape: f32[1,512], index: 7, kind: input, shape index: {}]   ;;  %s5979_s8 = inlined_call_operand.vmem [shape: f32[1,512], index: 8, kind: input, shape index: {}]   ;;  %s5980_s9 = inlined_call_operand.vmem [shape: f32[1,512], index: 9, kind: input, shape index: {}]   ;;  %s5981_s10 = inlined_call_operand.hbm [shape: f32[512,256], index: 10, kind: input, shape index: {}]   ;;  %s5982_s11 = inlined_call_operand.vmem [shape: f32[1,256], index: 11, kind: input, shape index: {}]   ;;  %s5983_s12 = inlined_call_operand.vmem [shape: f32[1,256], index: 12, kind: input, shape index: {}]   ;;  %s5984_s13 = inlined_call_operand.vmem [shape: f32[1,256], index: 13, kind: input, shape index: {}]   ;;  %s5985_s14 = inlined_call_operand.vmem [shape: f32[256,128], index: 14, kind: input, shape index: {}]   ;;  %s5986_s15 = inlined_call_operand.vmem [shape: f32[1,128], index: 15, kind: input, shape index: {}]   ;;  %s5987_s16 = inlined_call_operand.vmem [shape: f32[1,128], index: 16, kind: input, shape index: {}]   ;;  %s5988_s17 = inlined_call_operand.vmem [shape: f32[1,128], index: 17, kind: input, shape index: {}]   ;;  %s5989_s18 = inlined_call_operand.vmem [shape: f32[128,32], index: 18, kind: input, shape index: {}]   ;;  %s5990_s19 = inlined_call_operand.vmem [shape: f32[1,32], index: 19, kind: input, shape index: {}]   ;;  %s5991_s20 = inlined_call_operand.vmem [shape: f32[1,32], index: 20, kind: input, shape index: {}]   ;;  %s5992_s21 = inlined_call_operand.vmem [shape: f32[1,32], index: 21, kind: input, shape index: {}]   ;;  %s5993_s22 = inlined_call_operand.vmem [shape: f32[32,10], index: 22, kind: input, shape index: {}]   ;;  %s5994_s23 = inlined_call_operand.vmem [shape: f32[1,10], index: 23, kind: input, shape index: {}]   ;;  %s5995_s24 = inlined_call_operand.hbm [shape: f32[2,10], index: 24, kind: output, shape index: {}]  }
   0x1   :  { %6000 = sst [smem:[#allocation17_spill]] %s5971_s0 }
   0x2   :  { %6001 = sst [smem:[#allocation18_spill]] %s5972_s1 }
   0x3   :  { %6002 = sst [smem:[#allocation19_spill]] %s5973_s2 }
   0x4   :  { %6003 = sst [smem:[#allocation20_spill]] %s5974_s3 }
   0x5   :  { %6004 = sst [smem:[#allocation21_spill]] %s5975_s4 }
   0x6   :  { %6005 = sst [smem:[#allocation22_spill]] %s5976_s5 }
   0x7   :  { %6006 = sst [smem:[#allocation23_spill]] %s5977_s6 }
   0x8   :  { %6007 = sst [smem:[#allocation24_spill]] %s5978_s7 }
   0x9   :  { %6008 = sst [smem:[#allocation25_spill]] %s5979_s8 }
   0xa   :  { %s6009_s27 = sld [smem:[#allocation18_spill]]  ;;  %vm137_vm0 = vcmask 1043456   ;;  %s6010_s2 = sld [smem:[#allocation17_spill]]  ;;  %vm112_vm1 = vcmask 31744  }
  0x10   :  { %v104_v0 = vld [vmem:[%s6009_s27] sm:$0xf]  ;;  %v97_v2 = vld [vmem:[%s6010_s2 + $0x8] sm:$0xff] }
  0x11   :  { %v96_v1 = vld [vmem:[%s6010_s2] sm:$0xff]  ;;  %4290 = vmatprep.subr.msk.mxu1 %vm137_vm0, %v104_v0 }
  0x12   :  { %4292 = vmatprep.mubr.msk.f32.mxu1 %vm112_vm1, %v96_v1 }
  0x13   :  { %29 = vsyncpa [#allocation7], 0  ;;  %4291 = vmatpush3.msk.msra.mxu1 %vm137_vm0, %v104_v0  ;;  %s6011_s3 = sld [smem:[#allocation19_spill]]  ;;  %s5124_s25 = smov 64   ;;  %v98_v22 = vld [vmem:[%s6010_s2 + $0x10] sm:$0xff]  ;;  %v99_v23 = vld [vmem:[%s6010_s2 + $0x18] sm:$0xff] }
  0x14   :  { %4293 = vmatmul.mubr.msk.f32.vlgmr.msra.gmra.mrb[0].mxu1 %vm112_vm1, %v97_v2  ;;  %s5125_s8 = smov 32   ;;  %s6012_s5 = sld [smem:[#allocation20_spill]]  ;;  %v5126_v24 = vmov 0.0   ;;  %v100_v26 = vld [vmem:[%s6010_s2 + $0x20] sm:$0xff]  ;;  %v101_v31 = vld [vmem:[%s6010_s2 + $0x28] sm:$0xff]  ;;  %v102_v34 = vld [vmem:[%s6010_s2 + $0x30] sm:$0xff] }
  0x15   :  { %964 = vmatprep.mubr.f32.mxu0 %v5126_v24  ;;  %4295 = vmatprep.mubr.msk.f32.mxu1 %vm112_vm1, %v98_v22  ;;  %v103_v35 = vld [vmem:[%s6010_s2 + $0x38] sm:$0xff]  ;;  %v5127_v36 = vmov 0.0|0.0   ;;  %s6013_s29 = sld [smem:[#allocation21_spill]]  ;;  %vm287_vm2 = vcmask 261120   ;;  %vm5128_vm3 = vmmov 0   ;;  %s5129_s28 = smov [#allocation2]  }
  0x16   :  { %s81_s2 = sshll.u32 %s5129_s28, 4  ;;  %s5130_s6 = smov [#allocation3]   ;;  %s82_s2 = int_to_ptr.vmem [resolvable:$true] %s81_s2 }
  0x17   :  { %s6015_s30 = sld [smem:[#allocation23_spill]] }
  0x18   :  { %4296 = vmatmul.mubr.msk.f32.gmra.mrb[2].mxu1 %vm112_vm1, %v99_v23 }
  0x19   :  { %v5271_v3 = vld [vmem:[%s6011_s3] ss:$0 sm:$0xff]  ;;  %4298 = vmatprep.mubr.msk.f32.mxu1 %vm112_vm1, %v100_v26 }
  0x1a   :  { %v247_v17 = vld [vmem:[%s6012_s5 + $0x8] sm:$0xff]  ;;  %v249_v18 = vld [vmem:[%s6012_s5 + $0x18] sm:$0xff]  ;;  %v246_v19 = vld [vmem:[%s6012_s5] sm:$0xff] }
  0x1b   :  { %v5290_v20 = vpack.c.bf16 %v249_v18, %v247_v17  ;;  %v248_v21 = vld [vmem:[%s6012_s5 + $0x10] sm:$0xff]  ;;  %v251_v27 = vld [vmem:[%s6012_s5 + $0x28] sm:$0xff]  ;;  %v253_v28 = vld [vmem:[%s6012_s5 + $0x38] sm:$0xff] }
  0x1c   :  { %v5302_v25 = vpack.c.bf16 %v248_v21, %v246_v19  ;;  %v250_v29 = vld [vmem:[%s6012_s5 + $0x20] sm:$0xff]  ;;  %v252_v30 = vld [vmem:[%s6012_s5 + $0x30] sm:$0xff]  ;;  %v5327_v32 = vpack.c.bf16 %v253_v28, %v251_v27  ;;  %4299 = vmatmul.mubr.msk.f32.gmra.mrb[4].mxu1 %vm112_vm1, %v101_v31  ;;  %v255_v51 = vld [vmem:[%s6013_s29 + $0x8] sm:$0xff]  ;;  %s6014_s5 = sld [smem:[#allocation22_spill]] }
  0x1d   :  { %4439 = vmatprep.subr.bf16.mxu1 %v5290_v20  ;;  %v5329_v33 = vpack.c.bf16 %v252_v30, %v250_v29  ;;  %4481 = vmatprep.subr.bf16.mxu0 %v5290_v20  ;;  %v254_v50 = vld [vmem:[%s6013_s29] sm:$0xff]  ;;  %v256_v53 = vld [vmem:[%s6013_s29 + $0x10] sm:$0xff]  ;;  %v257_v54 = vld [vmem:[%s6013_s29 + $0x18] sm:$0xff]  ;;  %s92_s29 = sshll.u32 %s5130_s6, 4  ;;  %s5052_s3 = scalar_lea.hbm %s6015_s30, 16384  ;;  %s93_s29 = int_to_ptr.vmem [resolvable:$true] %s92_s29 }
  0x1e   :  { %4441 = vmatpush1.bf16.msra.mxu1 %v5302_v25  ;;  %4483 = vmatpush1.bf16.msra.mxu0 %v5302_v25  ;;  %v5372_v52 = vpack.c.bf16 %v255_v51, %v254_v50  ;;  %v5382_v56 = vpack.c.bf16 %v257_v54, %v256_v53  ;;  %p5053_p0 = scmp.ne.s32.totalorder %s6015_s30, %s5052_s3  ;;  %p5056_p1 = scmp.lt.u32.totalorder %s5052_s3, %s6015_s30 }
  0x1f   :  { %4443 = vmatprep.subr.bf16.mxu1 %v5327_v32  ;;  %4485 = vmatprep.subr.bf16.mxu0 %v5327_v32 }
  0x20   :  { %4301 = vmatprep.mubr.msk.f32.mxu1 %vm112_vm1, %v102_v34  ;;  %p5058_p2 = pnand %p5056_p1, %p5053_p0 }
  0x21   :  { %4302 = vmatmul.mubr.msk.f32.gmra.mrb[6].mxu1 %vm112_vm1, %v103_v35 }
  0x22   :  { %4445 = vmatpush1.bf16.msra.mxu1 %v5329_v33  ;;  %4487 = vmatpush1.bf16.msra.mxu0 %v5329_v33  ;;  %v5400_v61 = vld [vmem:[%s6014_s5] ss:$0 sm:$0xff] }
  0x23   :  { %4446 = vmatprep.subr.bf16.mxu1 %v5127_v36  ;;  %354 = vmatprep.mubr.f32.mxu1 %v5126_v24 }
  0xe7   :  { %v5273_v4 = vpop.f32.mrb[0].mxu1 }
  0xe8   :  { %v207_v5 = vpop.f32.mrb[1].mxu1  ;;  %v213_v57 = vadd.f32 %v5273_v4, %v5271_v3 }
  0xe9   :  { %v208_v6 = vadd.f32 %v5271_v3, %v207_v5 }
  0xeb   :  { %4908 = vtanh.f32 %v208_v6  ;;  %v4126_v8 = vmul.f32 -1.442695, %v208_v6  ;;  %v5350_v40 = vpop.f32.mrb[2].mxu1 }
  0xec   :  { %v5352_v41 = vpop.f32.mrb[3].mxu1 }
  0xed   :  { %4910 = vpow2.f32 %v4126_v8 }
  0xef   :  { %v4300_v42 = vpop.f32.mrb[4].mxu1 }
  0xf0   :  { %v5355_v43 = vadd.f32 %v4300_v42, %v5271_v3  ;;  %v227_v44 = vpop.f32.mrb[5].mxu1 }
  0xf1   :  { %v5358_v45 = vadd.f32 %v5271_v3, %v227_v44 }
  0xf4   :  { %v4303_v46 = vpop.f32.mrb[6].mxu1 }
  0xf5   :  { %v4909_v7 = vpop.eup %4908  ;;  %v5361_v47 = vadd.f32 %v4303_v46, %v5271_v3  ;;  %v237_v48 = vpop.f32.mrb[7].mxu1 }
  0xf6   :  { %269 = vrot.lane.b32.xlu0 %v4909_v7, %s5124_s25  ;;  %v5364_v49 = vadd.f32 %v5271_v3, %v237_v48 }
  0xf7   :  { %v4911_v9 = vpop.eup %4910 }
  0xf8   :  { %v263_v10 = vadd.f32 1.0, %v4911_v9 }
  0xfa   :  { %4912 = vrcp.f32 %v263_v10 }
 0x104   :  { %v4913_v11 = vpop.eup %4912 }
 0x105   :  { %v267_v14 = vmul.f32 0.0, %v4913_v11 }
 0x168   :  { %v270_v12 = vpop.permute.xlu0 %269 }
 0x169   :  { %v272_v13 = vmul.f32 %v4913_v11, %v270_v12 }
 0x16b   :  { %274 = vrot.lane.b32.xlu0 %v272_v13, %s5125_s8 }
 0x1dd   :  { %v275_v15 = vpop.permute.xlu0 %274 }
 0x1de   :  { %v5278_v16 = vadd.f32 %v275_v15, %v267_v14 }
 0x1e0   :  { %4914 = vtanh.f32 %v5278_v16 }
 0x1ea   :  { %v4915_v37 = vpop.eup %4914 }
 0x1eb   :  { %280 = vrot.lane.b32.xlu1 %v4915_v37, %s5124_s25  ;;  %v218_v37 = vadd.f32 %v5271_v3, %v5352_v41 }
 0x25d   :  { %v281_v38 = vpop.permute.xlu1 %280 }
 0x25e   :  { %v283_v39 = vmul.f32 %v4913_v11, %v281_v38 }
 0x260   :  { %285 = vrot.lane.b32.xlu1 %v283_v39, %s5125_s8 }
 0x2d2   :  { %v286_v55 = vpop.permute.xlu1 %285 }
 0x2d3   :  { %4127 = vmatmul.mubr.msk.f32.vlgmr.msra.gmra.mrb[8].mxu1 %vm287_vm2, %v286_v55 }
 0x2d4   :  { %4448 = vmatpush3.bf16.msra.mxu1 %v5372_v52  ;;  %4312 = vmatprep.mubr.msk.f32.mxu1 %vm5128_vm3, %v5126_v24 }
 0x2d5   :  { %4449 = vmatprep.subr.bf16.mxu1 %v5127_v36 }
 0x2d8   :  { %4451 = vmatpush3.bf16.msra.mxu1 %v5382_v56 }
 0x2d9   :  { %4453 = vmatprep.subr.bf16.mxu1 %v5290_v20 }
 0x2db   :  { %4313 = vmatmul.mubr.f32.vlgmr.msra.gmra.mrb[10].mxu1 %v5126_v24 }
 0x2dc   :  { %4455 = vmatpush1.bf16.msra.mxu1 %v5302_v25  ;;  %560 = vmatprep.mubr.f32.mxu1 %v5126_v24 }
 0x2dd   :  { %4457 = vmatprep.subr.bf16.mxu1 %v5327_v32 }
 0x2e0   :  { %4459 = vmatpush1.bf16.msra.mxu1 %v5329_v33 }
 0x2e1   :  { %4460 = vmatprep.subr.bf16.mxu1 %v5127_v36 }
 0x3a6   :  { %v356_v58 = vpop.f32.mrb[8].mxu1 }
 0x3a7   :  { %v466_v59 = vadd.f32 %v356_v58, %v213_v57  ;;  %v358_v60 = vpop.f32.mrb[9].mxu1 }
 0x3a8   :  { %v367_v62 = vadd.f32 %v5400_v61, %v358_v60 }
 0x3a9   :  { %4916 = vtanh.f32 %v466_v59  ;;  %v4130_v4 = vmul.f32 -1.442695, %v466_v59 }
 0x3ae   :  { %v437_v63 = vpop.f32.mrb[10].mxu1 }
 0x3af   :  { %v441_v0 = vadd.f32 %v437_v63, %v367_v62  ;;  %v4314_v1 = vpop.f32.mrb[11].mxu1 }
 0x3b1   :  { %4918 = vtanh.f32 %v441_v0  ;;  %v4129_v6 = vmul.f32 -1.442695, %v441_v0 }
 0x3b2   :  { %4920 = vpow2.f32 %v4130_v4 }
 0x3b3   :  { %v4917_v2 = vpop.eup %4916  ;;  %4922 = vpow2.f32 %v4129_v6 }
 0x3b4   :  { %476 = vrot.lane.b32.xlu0 %v4917_v2, %s5124_s25 }
 0x3bb   :  { %v4919_v5 = vpop.eup %4918 }
 0x3bc   :  { %451 = vrot.lane.b32.xlu1 %v4919_v5, %s5124_s25  ;;  %v4921_v7 = vpop.eup %4920 }
 0x3bd   :  { %v470_v8 = vadd.f32 1.0, %v4921_v7  ;;  %v4923_v9 = vpop.eup %4922 }
 0x3be   :  { %v445_v10 = vadd.f32 1.0, %v4923_v9 }
 0x3bf   :  { %4924 = vrcp.f32 %v470_v8 }
 0x3c0   :  { %4926 = vrcp.f32 %v445_v10 }
 0x3c9   :  { %v4925_v11 = vpop.eup %4924 }
 0x3ca   :  { %v4927_v14 = vpop.eup %4926  ;;  %v474_v18 = vmul.f32 %v4925_v11, %v5278_v16 }
 0x3cb   :  { %v449_v22 = vmul.f32 0.0, %v4927_v14 }
 0x426   :  { %v477_v12 = vpop.permute.xlu0 %476 }
 0x427   :  { %v479_v13 = vmul.f32 %v4925_v11, %v477_v12 }
 0x429   :  { %481 = vrot.lane.b32.xlu0 %v479_v13, %s5125_s8 }
 0x42e   :  { %v452_v15 = vpop.permute.xlu1 %451 }
 0x42f   :  { %v454_v17 = vmul.f32 %v4927_v14, %v452_v15 }
 0x431   :  { %456 = vrot.lane.b32.xlu1 %v454_v17, %s5125_s8 }
 0x49b   :  { %v482_v19 = vpop.permute.xlu0 %481 }
 0x49c   :  { %v484_v21 = vadd.f32 %v482_v19, %v474_v18  ;;  %v223_v19 = vadd.f32 %v5350_v40, %v5271_v3 }
 0x49e   :  { %4928 = vtanh.f32 %v484_v21 }
 0x4a3   :  { %v457_v23 = vpop.permute.xlu1 %456 }
 0x4a4   :  { %v459_v26 = vadd.f32 %v457_v23, %v449_v22 }
 0x4a6   :  { %4930 = vtanh.f32 %v459_v26 }
 0x4a8   :  { %v4929_v27 = vpop.eup %4928 }
 0x4a9   :  { %487 = vrot.lane.b32.xlu0 %v4929_v27, %s5124_s25 }
 0x4b0   :  { %v4931_v28 = vpop.eup %4930 }
 0x4b1   :  { %462 = vrot.lane.b32.xlu1 %v4931_v28, %s5124_s25 }
 0x51b   :  { %v488_v29 = vpop.permute.xlu0 %487 }
 0x51c   :  { %v490_v30 = vmul.f32 %v4925_v11, %v488_v29 }
 0x51e   :  { %492 = vrot.lane.b32.xlu0 %v490_v30, %s5125_s8 }
 0x523   :  { %v463_v31 = vpop.permute.xlu1 %462 }
 0x524   :  { %v465_v34 = vmul.f32 %v4927_v14, %v463_v31 }
 0x526   :  { %569 = vrot.lane.b32.xlu1 %v465_v34, %s5125_s8 }
 0x590   :  { %v493_v16 = vpop.permute.xlu0 %492 }
 0x591   :  { %4131 = vmatmul.mubr.msk.f32.vlgmr.msra.gmra.mrb[12].mxu1 %vm287_vm2, %v493_v16 }
 0x592   :  { %4462 = vmatpush3.bf16.msra.mxu1 %v5372_v52  ;;  %4323 = vmatprep.mubr.msk.f32.mxu1 %vm5128_vm3, %v5126_v24 }
 0x593   :  { %4463 = vmatprep.subr.bf16.mxu1 %v5127_v36 }
 0x596   :  { %4465 = vmatpush3.bf16.msra.mxu1 %v5382_v56 }
 0x597   :  { %4467 = vmatprep.subr.bf16.mxu1 %v5290_v20 }
 0x598   :  { %v5419_v35 = vpop.permute.xlu1 %569 }
 0x599   :  { %4324 = vmatmul.mubr.msk.f32.vlgmr.msra.gmra.mrb[14].mxu1 %vm287_vm2, %v5419_v35 }
 0x59a   :  { %4469 = vmatpush1.bf16.msra.mxu1 %v5302_v25  ;;  %762 = vmatprep.mubr.f32.mxu1 %v5126_v24 }
 0x59b   :  { %4471 = vmatprep.subr.bf16.mxu1 %v5327_v32 }
 0x59e   :  { %4473 = vmatpush1.bf16.msra.mxu1 %v5329_v33 }
 0x59f   :  { %4474 = vmatprep.subr.bf16.mxu1 %v5127_v36 }
 0x664   :  { %v562_v38 = vpop.f32.mrb[12].mxu1 }
 0x665   :  { %v668_v39 = vadd.f32 %v562_v38, %v218_v37  ;;  %v564_v42 = vpop.f32.mrb[13].mxu1 }
 0x666   :  { %v567_v44 = vadd.f32 %v5400_v61, %v564_v42 }
 0x667   :  { %4932 = vtanh.f32 %v668_v39  ;;  %v4134_v54 = vmul.f32 -1.442695, %v668_v39 }
 0x66c   :  { %v639_v46 = vpop.f32.mrb[14].mxu1 }
 0x66d   :  { %v643_v48 = vadd.f32 %v639_v46, %v567_v44  ;;  %v4325_v50 = vpop.f32.mrb[15].mxu1 }
 0x66f   :  { %4934 = vtanh.f32 %v643_v48  ;;  %v4133_v55 = vmul.f32 -1.442695, %v643_v48 }
 0x670   :  { %4936 = vpow2.f32 %v4134_v54 }
 0x671   :  { %v4933_v51 = vpop.eup %4932  ;;  %4938 = vpow2.f32 %v4133_v55 }
 0x672   :  { %678 = vrot.lane.b32.xlu0 %v4933_v51, %s5124_s25 }
 0x679   :  { %v4935_v53 = vpop.eup %4934 }
 0x67a   :  { %653 = vrot.lane.b32.xlu1 %v4935_v53, %s5124_s25  ;;  %v4937_v41 = vpop.eup %4936 }
 0x67b   :  { %v672_v57 = vadd.f32 1.0, %v4937_v41  ;;  %v4939_v58 = vpop.eup %4938 }
 0x67c   :  { %v647_v59 = vadd.f32 1.0, %v4939_v58 }
 0x67d   :  { %4940 = vrcp.f32 %v672_v57 }
 0x67e   :  { %4942 = vrcp.f32 %v647_v59 }
 0x687   :  { %v4941_v60 = vpop.eup %4940 }
 0x688   :  { %v4943_v0 = vpop.eup %4942  ;;  %v676_v5 = vmul.f32 %v4941_v60, %v484_v21 }
 0x689   :  { %v651_v7 = vmul.f32 %v4943_v0, %v459_v26 }
 0x6e4   :  { %v679_v62 = vpop.permute.xlu0 %678 }
 0x6e5   :  { %v681_v63 = vmul.f32 %v4941_v60, %v679_v62 }
 0x6e7   :  { %683 = vrot.lane.b32.xlu0 %v681_v63, %s5125_s8 }
 0x6ec   :  { %v654_v1 = vpop.permute.xlu1 %653 }
 0x6ed   :  { %v656_v2 = vmul.f32 %v4943_v0, %v654_v1 }
 0x6ef   :  { %658 = vrot.lane.b32.xlu1 %v656_v2, %s5125_s8 }
 0x759   :  { %v684_v4 = vpop.permute.xlu0 %683 }
 0x75a   :  { %v686_v6 = vadd.f32 %v684_v4, %v676_v5 }
 0x75c   :  { %4944 = vtanh.f32 %v686_v6 }
 0x761   :  { %v659_v8 = vpop.permute.xlu1 %658 }
 0x762   :  { %v661_v9 = vadd.f32 %v659_v8, %v651_v7 }
 0x764   :  { %4946 = vtanh.f32 %v661_v9 }
 0x766   :  { %v4945_v10 = vpop.eup %4944 }
 0x767   :  { %689 = vrot.lane.b32.xlu0 %v4945_v10, %s5124_s25 }
 0x76e   :  { %v4947_v11 = vpop.eup %4946 }
 0x76f   :  { %664 = vrot.lane.b32.xlu1 %v4947_v11, %s5124_s25 }
 0x7d9   :  { %v690_v12 = vpop.permute.xlu0 %689 }
 0x7da   :  { %v692_v13 = vmul.f32 %v4941_v60, %v690_v12 }
 0x7dc   :  { %694 = vrot.lane.b32.xlu0 %v692_v13, %s5125_s8 }
 0x7e1   :  { %v665_v14 = vpop.permute.xlu1 %664 }
 0x7e2   :  { %v667_v15 = vmul.f32 %v4943_v0, %v665_v14 }
 0x7e4   :  { %771 = vrot.lane.b32.xlu1 %v667_v15, %s5125_s8 }
 0x84e   :  { %v695_v17 = vpop.permute.xlu0 %694 }
 0x84f   :  { %4135 = vmatmul.mubr.msk.f32.vlgmr.msra.gmra.mrb[16].mxu1 %vm287_vm2, %v695_v17 }
 0x850   :  { %4476 = vmatpush3.bf16.msra.mxu1 %v5372_v52  ;;  %4334 = vmatprep.mubr.msk.f32.mxu1 %vm5128_vm3, %v5126_v24 }
 0x851   :  { %4477 = vmatprep.subr.bf16.mxu1 %v5127_v36 }
 0x854   :  { %4479 = vmatpush3.bf16.msra.mxu1 %v5382_v56 }
 0x855   :  { %4488 = vmatprep.subr.bf16.mxu1 %v5127_v36 }
 0x856   :  { %v5446_v18 = vpop.permute.xlu1 %771 }
 0x857   :  { %4335 = vmatmul.mubr.msk.f32.vlgmr.msra.gmra.mrb[18].mxu1 %vm287_vm2, %v5446_v18 }
 0x858   :  { %4490 = vmatpush3.bf16.msra.mxu1 %v5372_v52  ;;  %4345 = vmatprep.mubr.msk.f32.mxu1 %vm5128_vm3, %v5126_v24 }
 0x859   :  { %4491 = vmatprep.subr.bf16.mxu1 %v5127_v36 }
 0x85c   :  { %4493 = vmatpush3.bf16.msra.mxu1 %v5382_v56 }
 0x922   :  { %v764_v21 = vpop.f32.mrb[16].mxu1 }
 0x923   :  { %v870_v22 = vadd.f32 %v764_v21, %v223_v19  ;;  %v766_v23 = vpop.f32.mrb[17].mxu1 }
 0x924   :  { %v769_v26 = vadd.f32 %v5400_v61, %v766_v23 }
 0x925   :  { %4948 = vtanh.f32 %v870_v22  ;;  %v4138_v34 = vmul.f32 -1.442695, %v870_v22 }
 0x92a   :  { %v841_v27 = vpop.f32.mrb[18].mxu1 }
 0x92b   :  { %v845_v28 = vadd.f32 %v841_v27, %v769_v26  ;;  %v4336_v29 = vpop.f32.mrb[19].mxu1 }
 0x92d   :  { %4950 = vtanh.f32 %v845_v28  ;;  %v4137_v16 = vmul.f32 -1.442695, %v845_v28 }
 0x92e   :  { %4952 = vpow2.f32 %v4138_v34 }
 0x92f   :  { %v4949_v30 = vpop.eup %4948  ;;  %4954 = vpow2.f32 %v4137_v16 }
 0x930   :  { %880 = vrot.lane.b32.xlu0 %v4949_v30, %s5124_s25 }
 0x937   :  { %v4951_v31 = vpop.eup %4950 }
 0x938   :  { %855 = vrot.lane.b32.xlu1 %v4951_v31, %s5124_s25  ;;  %v4953_v3 = vpop.eup %4952 }
 0x939   :  { %v874_v40 = vadd.f32 1.0, %v4953_v3  ;;  %v4955_v37 = vpop.eup %4954 }
 0x93a   :  { %v849_v38 = vadd.f32 1.0, %v4955_v37 }
 0x93b   :  { %4956 = vrcp.f32 %v874_v40 }
 0x93c   :  { %4958 = vrcp.f32 %v849_v38 }
 0x945   :  { %v4957_v39 = vpop.eup %4956 }
 0x946   :  { %v4959_v46 = vpop.eup %4958  ;;  %v878_v51 = vmul.f32 %v4957_v39, %v686_v6 }
 0x947   :  { %v853_v55 = vmul.f32 %v4959_v46, %v661_v9 }
 0x9a2   :  { %v881_v42 = vpop.permute.xlu0 %880 }
 0x9a3   :  { %v883_v44 = vmul.f32 %v4957_v39, %v881_v42 }
 0x9a5   :  { %885 = vrot.lane.b32.xlu0 %v883_v44, %s5125_s8 }
 0x9aa   :  { %v856_v48 = vpop.permute.xlu1 %855 }
 0x9ab   :  { %v858_v50 = vmul.f32 %v4959_v46, %v856_v48 }
 0x9ad   :  { %860 = vrot.lane.b32.xlu1 %v858_v50, %s5125_s8 }
 0xa17   :  { %v886_v53 = vpop.permute.xlu0 %885 }
 0xa18   :  { %v5462_v54 = vadd.f32 %v886_v53, %v878_v51 }
 0xa1a   :  { %4960 = vtanh.f32 %v5462_v54 }
 0xa1f   :  { %v861_v41 = vpop.permute.xlu1 %860 }
 0xa20   :  { %v863_v57 = vadd.f32 %v861_v41, %v853_v55 }
 0xa22   :  { %4962 = vtanh.f32 %v863_v57 }
 0xa24   :  { %v4961_v58 = vpop.eup %4960 }
 0xa25   :  { %891 = vrot.lane.b32.xlu0 %v4961_v58, %s5124_s25 }
 0xa2c   :  { %v4963_v59 = vpop.eup %4962 }
 0xa2d   :  { %866 = vrot.lane.b32.xlu1 %v4963_v59, %s5124_s25 }
 0xa97   :  { %v892_v60 = vpop.permute.xlu0 %891 }
 0xa98   :  { %v894_v62 = vmul.f32 %v4957_v39, %v892_v60 }
 0xa9a   :  { %896 = vrot.lane.b32.xlu0 %v894_v62, %s5125_s8 }
 0xa9f   :  { %v867_v63 = vpop.permute.xlu1 %866 }
 0xaa0   :  { %v869_v0 = vmul.f32 %v4959_v46, %v867_v63 }
 0xaa2   :  { %973 = vrot.lane.b32.xlu1 %v869_v0, %s5125_s8 }
 0xb0c   :  { %v897_v1 = vpop.permute.xlu0 %896 }
 0xb0d   :  { %4139 = vmatmul.mubr.msk.f32.vlgmr.msra.gmra.mrb[0].mxu0 %vm287_vm2, %v897_v1 }
 0xb14   :  { %v5470_v2 = vpop.permute.xlu1 %973 }
 0xb15   :  { %4346 = vmatmul.mubr.msk.f32.vlgmr.msra.gmra.mrb[20].mxu1 %vm287_vm2, %v5470_v2 }
 0xbe0   :  { %v966_v5 = vpop.f32.mrb[0].mxu0 }
 0xbe1   :  { %v968_v4 = vpop.f32.mrb[1].mxu0 }
 0xbe2   :  { %v971_v6 = vadd.f32 %v5400_v61, %v968_v4 }
 0xbe8   :  { %v1043_v7 = vpop.f32.mrb[20].mxu1 }
 0xbe9   :  { %v1047_v8 = vadd.f32 %v1043_v7, %v971_v6  ;;  %v4347_v9 = vpop.f32.mrb[21].mxu1 }
 0xbeb   :  { %4964 = vtanh.f32 %v1047_v8  ;;  %v4141_v11 = vmul.f32 -1.442695, %v1047_v8 }
 0xbed   :  { %4966 = vpow2.f32 %v4141_v11 }
 0xbf5   :  { %v4965_v10 = vpop.eup %4964 }
 0xbf6   :  { %1057 = vrot.lane.b32.xlu0 %v4965_v10, %s5124_s25 }
 0xbf7   :  { %v4967_v12 = vpop.eup %4966 }
 0xbf8   :  { %v1051_v13 = vadd.f32 1.0, %v4967_v12 }
 0xbfa   :  { %4968 = vrcp.f32 %v1051_v13 }
 0xc04   :  { %v4969_v14 = vpop.eup %4968 }
 0xc05   :  { %v1055_v19 = vmul.f32 %v4969_v14, %v863_v57 }
 0xc68   :  { %v1058_v15 = vpop.permute.xlu0 %1057 }
 0xc69   :  { %v1060_v17 = vmul.f32 %v4969_v14, %v1058_v15 }
 0xc6b   :  { %1062 = vrot.lane.b32.xlu1 %v1060_v17, %s5125_s8 }
 0xcdd   :  { %v1063_v21 = vpop.permute.xlu1 %1062 }
 0xcde   :  { %v5477_v22 = vadd.f32 %v1063_v21, %v1055_v19 }
 0xcdf   :  { %5061 = shalt.err (!%p5058_p2)  }
 0xce0   :  { %s5062_s5 = scalar_lea.vmem %s82_s2, 16384  ;;  %p5067_p4 = scmp.lt.s32.totalorder %s82_s2, %s82_s2 }
 0xce1   :  { %p5063_p3 = scmp.ne.s32.totalorder %s82_s2, %s5062_s5  ;;  %p5068_p5 = scmp.lt.s32.totalorder %s5062_s5, %s5062_s5 }
 0xce3   :  { %p5069_p6 = por %p5068_p5, %p5067_p4 }
 0xce5   :  { %p5070_p7 = pnand %p5069_p6, %p5063_p3 }
 0xce7   :  { %5073 = shalt.err (!%p5070_p7)  }
 0xce8   :  { %84 = dma.hbm_to_vmem [thread:$0]  %s6015_s30, 16384, %s82_s2, [#allocation4] }
 0xce9   :  { %s5074_s4 = scalar_lea.hbm %s5981_s10, 16384 }
 0xcea   :  { %p5075_p8 = scmp.ne.s32.totalorder %s5981_s10, %s5074_s4  ;;  %p5078_p9 = scmp.lt.u32.totalorder %s5074_s4, %s5981_s10 }
 0xcec   :  { %p5080_p10 = pnand %p5078_p9, %p5075_p8 }
 0xcee   :  { %5083 = shalt.err (!%p5080_p10)  }
 0xcef   :  { %s5084_s5 = scalar_lea.vmem %s93_s29, 16384  ;;  %p5089_p12 = scmp.lt.s32.totalorder %s93_s29, %s93_s29 }
 0xcf0   :  { %p5085_p11 = scmp.ne.s32.totalorder %s93_s29, %s5084_s5  ;;  %p5090_p13 = scmp.lt.s32.totalorder %s5084_s5, %s5084_s5 }
 0xcf2   :  { %p5091_p0 = por %p5090_p13, %p5089_p12 }
 0xcf4   :  { %p5092_p1 = pnand %p5091_p0, %p5085_p11 }
 0xcf6   :  { %5095 = shalt.err (!%p5092_p1)  }
 0xcf7   :  { %95 = dma.hbm_to_vmem [thread:$0]  %s5981_s10, 16384, %s93_s29, [#allocation5]  ;;  %4970 = vtanh.f32 %v5477_v22  ;;  %v1721_v28 = vadd.f32 %v966_v5, %v5358_v45 }
 0xd01   :  { %v4971_v23 = vpop.eup %4970 }
 0xd02   :  { %1068 = vrot.lane.b32.xlu0 %v4971_v23, %s5124_s25 }
 0xd74   :  { %v1069_v26 = vpop.permute.xlu0 %1068 }
 0xd75   :  { %v5505_v27 = vmul.f32 %v4969_v14, %v1069_v26 }
 0xd76   :  { %5118 = dma.done.wait [#allocation4], 16384 }
 0xd77   :  { %5119 = vsyncadd [#allocation4], 4294950912  ;;  %1243 = vmatprep.mubr.f32.mxu1 %v5126_v24  ;;  %1172 = vmatprep.mubr.f32.mxu0 %v5126_v24  ;;  %4972 = vtanh.f32 %v1721_v28  ;;  %v4150_v30 = vmul.f32 -1.442695, %v1721_v28  ;;  %v1095_v39 = vld [vmem:[#allocation2 + $0x98] sm:$0xff]  ;;  %v1094_v44 = vld [vmem:[#allocation2 + $0x90] sm:$0xff] }
 0xd78   :  { %v1099_v42 = vld [vmem:[#allocation2 + $0xb8] sm:$0xff]  ;;  %v1098_v48 = vld [vmem:[#allocation2 + $0xb0] sm:$0xff]  ;;  %v1093_v58 = vld [vmem:[#allocation2 + $0x88] sm:$0xff]  ;;  %s6016_s28 = sld [smem:[#allocation24_spill]]  ;;  %vm3202_vm4 = vcmask 1041408   ;;  %s6017_s6 = sld [smem:[#allocation25_spill]] }
 0xd79   :  { %4974 = vpow2.f32 %v4150_v30  ;;  %v4502_v46 = vpack.c.bf16 %v1099_v42, %v1095_v39  ;;  %v1103_v50 = vld [vmem:[#allocation2 + $0xd8] sm:$0xff]  ;;  %v4504_v53 = vpack.c.bf16 %v1098_v48, %v1094_v44  ;;  %v1102_v41 = vld [vmem:[#allocation2 + $0xd0] sm:$0xff]  ;;  %v1097_v59 = vld [vmem:[#allocation2 + $0xa8] sm:$0xff] }
 0xd7a   :  { %v1107_v51 = vld [vmem:[#allocation2 + $0xf8] sm:$0xff]  ;;  %v1106_v57 = vld [vmem:[#allocation2 + $0xf0] sm:$0xff]  ;;  %v4494_v63 = vpack.c.bf16 %v1097_v59, %v1093_v58  ;;  %v1092_v0 = vld [vmem:[#allocation2 + $0x80] sm:$0xff] }
 0xd7b   :  { %v4506_v55 = vpack.c.bf16 %v1107_v51, %v1103_v50  ;;  %4503 = vmatprep.subr.bf16.mxu1 %v4502_v46  ;;  %v1083_v60 = vld [vmem:[#allocation2 + $0x38] sm:$0xff]  ;;  %v4508_v62 = vpack.c.bf16 %v1106_v57, %v1102_v41  ;;  %v1096_v1 = vld [vmem:[#allocation2 + $0xa0] sm:$0xff]  ;;  %v1078_v5 = vld [vmem:[#allocation2 + $0x10] sm:$0xff] }
 0xd7c   :  { %4505 = vmatpush1.bf16.msra.mxu1 %v4504_v53  ;;  %v4496_v6 = vpack.c.bf16 %v1096_v1, %v1092_v0  ;;  %v1082_v7 = vld [vmem:[#allocation2 + $0x30] sm:$0xff]  ;;  %v1101_v8 = vld [vmem:[#allocation2 + $0xc8] sm:$0xff]  ;;  %4495 = vmatprep.subr.bf16.mxu0 %v4494_v63  ;;  %v1087_v11 = vld [vmem:[#allocation2 + $0x58] sm:$0xff] }
 0xd7d   :  { %4507 = vmatprep.subr.bf16.mxu1 %v4506_v55  ;;  %v1105_v9 = vld [vmem:[#allocation2 + $0xe8] sm:$0xff]  ;;  %v1091_v12 = vld [vmem:[#allocation2 + $0x78] sm:$0xff]  ;;  %v1100_v13 = vld [vmem:[#allocation2 + $0xc0] sm:$0xff]  ;;  %v4520_v15 = vpack.c.bf16 %v1082_v7, %v1078_v5 }
 0xd7e   :  { %v4498_v10 = vpack.c.bf16 %v1105_v9, %v1101_v8  ;;  %4497 = vmatpush1.bf16.msra.mxu0 %v4496_v6  ;;  %v1104_v14 = vld [vmem:[#allocation2 + $0xe0] sm:$0xff]  ;;  %v1086_v19 = vld [vmem:[#allocation2 + $0x50] sm:$0xff]  ;;  %v1077_v21 = vld [vmem:[#allocation2 + $0x8] sm:$0xff]  ;;  %v4522_v26 = vpack.c.bf16 %v1091_v12, %v1087_v11 }
 0xd7f   :  { %v4500_v17 = vpack.c.bf16 %v1104_v14, %v1100_v13  ;;  %v1081_v23 = vld [vmem:[#allocation2 + $0x28] sm:$0xff]  ;;  %v1090_v28 = vld [vmem:[#allocation2 + $0x70] sm:$0xff]  ;;  %v1076_v30 = vld [vmem:[#allocation2] sm:$0xff] }
 0xd80   :  { %4509 = vmatpush1.bf16.msra.mxu1 %v4508_v62  ;;  %4499 = vmatprep.subr.bf16.mxu0 %v4498_v10  ;;  %v4524_v39 = vpack.c.bf16 %v1090_v28, %v1086_v19  ;;  %v1394_v44 = vld [vmem:[#allocation2 + $0x110] sm:$0xff]  ;;  %v1403_v51 = vld [vmem:[#allocation2 + $0x158] sm:$0xff]  ;;  %v1084_v53 = vld [vmem:[#allocation2 + $0x40] sm:$0xff] }
 0xd81   :  { %v4973_v29 = vpop.eup %4972  ;;  %v1398_v46 = vld [vmem:[#allocation2 + $0x130] sm:$0xff]  ;;  %v1088_v55 = vld [vmem:[#allocation2 + $0x60] sm:$0xff]  ;;  %v1407_v41 = vld [vmem:[#allocation2 + $0x178] sm:$0xff] }
 0xd82   :  { %1731 = vrot.lane.b32.xlu0 %v4973_v29, %s5124_s25  ;;  %v4510_v29 = vpack.c.bf16 %v1081_v23, %v1077_v21  ;;  %4501 = vmatpush1.bf16.msra.mxu0 %v4500_v17  ;;  %v1393_v57 = vld [vmem:[#allocation2 + $0x108] sm:$0xff]  ;;  %v4536_v59 = vpack.c.bf16 %v1398_v46, %v1394_v44  ;;  %v1406_v62 = vld [vmem:[#allocation2 + $0x170] sm:$0xff]  ;;  %v4538_v63 = vpack.c.bf16 %v1407_v41, %v1403_v51  ;;  %v1557_v1 = vld [vmem:[#allocation2 + $0x198] sm:$0xff] }
 0xd83   :  { %v4975_v31 = vpop.eup %4974  ;;  %4143 = vmatmul.mubr.msk.f32.vlgmr.msra.gmra.mrb[22].mxu1 %vm287_vm2, %v5446_v18  ;;  %v1397_v58 = vld [vmem:[#allocation2 + $0x128] sm:$0xff]  ;;  %v1392_v5 = vld [vmem:[#allocation2 + $0x100] sm:$0xff]  ;;  %v1561_v6 = vld [vmem:[#allocation2 + $0x1b8] sm:$0xff] }
 0xd84   :  { %v1725_v34 = vadd.f32 1.0, %v4975_v31  ;;  %v1080_v31 = vld [vmem:[#allocation2 + $0x20] sm:$0xff]  ;;  %4511 = vmatprep.subr.bf16.mxu0 %v4510_v29  ;;  %1385 = vmatprep.mubr.f32.mxu1 %v5126_v24  ;;  %v4526_v0 = vpack.c.bf16 %v1397_v58, %v1393_v57  ;;  %v1405_v7 = vld [vmem:[#allocation2 + $0x168] sm:$0xff]  ;;  %v1556_v9 = vld [vmem:[#allocation2 + $0x190] sm:$0xff]  ;;  %v4550_v11 = vpack.c.bf16 %v1561_v6, %v1557_v1 }
 0xd85   :  { %v4512_v42 = vpack.c.bf16 %v1080_v31, %v1076_v30  ;;  %4142 = vmatmul.mubr.msk.f32.vlgmr.msra.gmra.mrb[2].mxu0 %vm287_vm2, %v5446_v18  ;;  %v1560_v10 = vld [vmem:[#allocation2 + $0x1b0] sm:$0xff]  ;;  %v1565_v13 = vld [vmem:[#allocation2 + $0x1d8] sm:$0xff]  ;;  %v1400_v14 = vld [vmem:[#allocation2 + $0x140] sm:$0xff] }
 0xd86   :  { %4976 = vrcp.f32 %v1725_v34  ;;  %1314 = vmatprep.mubr.f32.mxu0 %v5126_v24  ;;  %v1569_v17 = vld [vmem:[#allocation2 + $0x1f8] sm:$0xff]  ;;  %v1555_v19 = vld [vmem:[#allocation2 + $0x188] sm:$0xff]  ;;  %v4552_v23 = vpack.c.bf16 %v1560_v10, %v1556_v9  ;;  %v1564_v28 = vld [vmem:[#allocation2 + $0x1d0] sm:$0xff] }
 0xd87   :  { %4513 = vmatpush1.bf16.msra.mxu0 %v4512_v42  ;;  %v1559_v21 = vld [vmem:[#allocation2 + $0x1a8] sm:$0xff]  ;;  %v4554_v29 = vpack.c.bf16 %v1569_v17, %v1565_v13  ;;  %v1568_v30 = vld [vmem:[#allocation2 + $0x1f0] sm:$0xff]  ;;  %v1562_v42 = vld [vmem:[#allocation2 + $0x1c0] sm:$0xff] }
 0xd88   :  { %v4542_v31 = vpack.c.bf16 %v1559_v21, %v1555_v19  ;;  %v1566_v44 = vld [vmem:[#allocation2 + $0x1e0] sm:$0xff]  ;;  %v1923_v17 = vld [vmem:[#allocation2 + $0x228] sm:$0xff]  ;;  %v1921_v19 = vld [vmem:[#allocation2 + $0x218] sm:$0xff] }
 0xd89   :  { %v4548_v46 = vpack.c.bf16 %v1566_v44, %v1562_v42  ;;  %v1930_v42 = vld [vmem:[#allocation2 + $0x260] sm:$0xff]  ;;  %v1928_v44 = vld [vmem:[#allocation2 + $0x250] sm:$0xff] }
 0xd90   :  { %v5511_v16 = vpop.eup %4976 }
 0xd91   :  { %v1729_v40 = vmul.f32 %v5511_v16, %v5462_v54  ;;  %v1079_v54 = vld [vmem:[#allocation2 + $0x18] sm:$0xff] }
 0xd92   :  { %v4518_v4 = vpack.c.bf16 %v1083_v60, %v1079_v54  ;;  %v4516_v54 = vpack.c.bf16 %v1088_v55, %v1084_v53  ;;  %v1402_v60 = vld [vmem:[#allocation2 + $0x150] sm:$0xff] }
 0xd93   :  { %v4540_v18 = vpack.c.bf16 %v1406_v62, %v1402_v60 }
 0xd94   :  { %4519 = vmatprep.subr.bf16.mxu1 %v4518_v4  ;;  %v1396_v4 = vld [vmem:[#allocation2 + $0x120] sm:$0xff] }
 0xd95   :  { %4521 = vmatpush1.bf16.msra.mxu1 %v4520_v15  ;;  %v4528_v8 = vpack.c.bf16 %v1396_v4, %v1392_v5  ;;  %v1404_v15 = vld [vmem:[#allocation2 + $0x160] sm:$0xff] }
 0xd96   :  { %4523 = vmatprep.subr.bf16.mxu1 %v4522_v26  ;;  %v4532_v26 = vpack.c.bf16 %v1404_v15, %v1400_v14  ;;  %v1919_v15 = vld [vmem:[#allocation2 + $0x208] sm:$0xff] }
 0xd97   :  { %v4572_v21 = vpack.c.bf16 %v1923_v17, %v1919_v15 }
 0xd99   :  { %4525 = vmatpush1.bf16.msra.mxu1 %v4524_v39 }
 0xd9c   :  { %4145 = vmatmul.mubr.msk.f32.vlgmr.msra.gmra.mrb[22].mxu1 %vm287_vm2, %v5419_v35 }
 0xd9d   :  { %1543 = vmatprep.mubr.f32.mxu1 %v5126_v24 }
 0xdf4   :  { %v1732_v3 = vpop.permute.xlu0 %1731 }
 0xdf5   :  { %v1734_v45 = vmul.f32 %v5511_v16, %v1732_v3  ;;  %v1395_v3 = vld [vmem:[#allocation2 + $0x118] sm:$0xff] }
 0xdf7   :  { %1736 = vrot.lane.b32.xlu0 %v1734_v45, %s5125_s8  ;;  %v1399_v45 = vld [vmem:[#allocation2 + $0x138] sm:$0xff] }
 0xdf8   :  { %v4534_v48 = vpack.c.bf16 %v1399_v45, %v1395_v3  ;;  %v1558_v3 = vld [vmem:[#allocation2 + $0x1a0] sm:$0xff]  ;;  %v1563_v45 = vld [vmem:[#allocation2 + $0x1c8] sm:$0xff] }
 0xdfa   :  { %4535 = vmatprep.subr.bf16.mxu1 %v4534_v48 }
 0xdfb   :  { %4537 = vmatpush1.bf16.msra.mxu1 %v4536_v59 }
 0xdfc   :  { %4539 = vmatprep.subr.bf16.mxu1 %v4538_v63 }
 0xdff   :  { %4541 = vmatpush1.bf16.msra.mxu1 %v4540_v18 }
 0xe00   :  { %4551 = vmatprep.subr.bf16.mxu1 %v4550_v11 }
 0xe02   :  { %4147 = vmatmul.mubr.msk.f32.vlgmr.msra.gmra.mrb[22].mxu1 %vm287_vm2, %v5470_v2 }
 0xe03   :  { %4553 = vmatpush1.bf16.msra.mxu1 %v4552_v23  ;;  %1710 = vmatprep.mubr.f32.mxu1 %v5126_v24  ;;  %v1925_v23 = vld [vmem:[#allocation2 + $0x238] sm:$0xff] }
 0xe04   :  { %4555 = vmatprep.subr.bf16.mxu1 %v4554_v29 }
 0xe69   :  { %v1737_v37 = vpop.permute.xlu0 %1736 }
 0xe6a   :  { %v5517_v38 = vadd.f32 %v1737_v37, %v1729_v40  ;;  %v1085_v40 = vld [vmem:[#allocation2 + $0x48] sm:$0xff] }
 0xe6b   :  { %v1089_v37 = vld [vmem:[#allocation2 + $0x68] sm:$0xff] }
 0xe6c   :  { %4978 = vtanh.f32 %v5517_v38  ;;  %v4514_v50 = vpack.c.bf16 %v1089_v37, %v1085_v40  ;;  %v1567_v40 = vld [vmem:[#allocation2 + $0x1e8] sm:$0xff] }
 0xe6d   :  { %v4546_v39 = vpack.c.bf16 %v1567_v40, %v1563_v45  ;;  %v1929_v45 = vld [vmem:[#allocation2 + $0x258] sm:$0xff] }
 0xe6e   :  { %4515 = vmatprep.subr.bf16.mxu0 %v4514_v50  ;;  %v1933_v40 = vld [vmem:[#allocation2 + $0x278] sm:$0xff] }
 0xe6f   :  { %4517 = vmatpush1.bf16.msra.mxu0 %v4516_v54 }
 0xe70   :  { %4527 = vmatprep.subr.bf16.mxu0 %v4526_v0 }
 0xe72   :  { %4144 = vmatmul.mubr.msk.f32.vlgmr.msra.gmra.mrb[2].mxu0 %vm287_vm2, %v5419_v35  ;;  %v4556_v35 = vpack.c.bf16 %v1568_v30, %v1564_v28  ;;  %v1922_v28 = vld [vmem:[#allocation2 + $0x220] sm:$0xff]  ;;  %v1920_v30 = vld [vmem:[#allocation2 + $0x210] sm:$0xff] }
 0xe73   :  { %4529 = vmatpush1.bf16.msra.mxu0 %v4528_v8  ;;  %1472 = vmatprep.mubr.f32.mxu0 %v5126_v24 }
 0xe74   :  { %4557 = vmatpush1.bf16.msra.mxu1 %v4556_v35 }
 0xe75   :  { %4566 = vmatprep.subr.bf16.mxu1 %v5127_v36 }
 0xe76   :  { %v4979_v34 = vpop.eup %4978 }
 0xe77   :  { %1742 = vrot.lane.b32.xlu1 %v4979_v34, %s5124_s25  ;;  %v1554_v34 = vld [vmem:[#allocation2 + $0x180] sm:$0xff] }
 0xe78   :  { %v4544_v37 = vpack.c.bf16 %v1558_v3, %v1554_v34  ;;  %v1927_v34 = vld [vmem:[#allocation2 + $0x248] sm:$0xff] }
 0xe79   :  { %v1931_v3 = vld [vmem:[#allocation2 + $0x268] sm:$0xff] }
 0xe7a   :  { %v4576_v35 = vpack.c.bf16 %v1931_v3, %v1927_v34  ;;  %v2289_v34 = vld [vmem:[#allocation2 + $0x2b8] sm:$0xff]  ;;  %v2286_v3 = vld [vmem:[#allocation2 + $0x2a0] sm:$0xff] }
 0xe7b   :  { %1571 = vrot.lane.b32.xlu1 %v5505_v27, %s5125_s8  ;;  %v1401_v27 = vld [vmem:[#allocation2 + $0x148] sm:$0xff] }
 0xe7c   :  { %v4530_v12 = vpack.c.bf16 %v1405_v7, %v1401_v27 }
 0xe7e   :  { %4531 = vmatprep.subr.bf16.mxu0 %v4530_v12 }
 0xe7f   :  { %4533 = vmatpush1.bf16.msra.mxu0 %v4532_v26  ;;  %v1918_v26 = vld [vmem:[#allocation2 + $0x200] sm:$0xff] }
 0xe80   :  { %4543 = vmatprep.subr.bf16.mxu0 %v4542_v31  ;;  %v4574_v29 = vpack.c.bf16 %v1922_v28, %v1918_v26  ;;  %v1924_v31 = vld [vmem:[#allocation2 + $0x230] sm:$0xff] }
 0xe82   :  { %4146 = vmatmul.mubr.msk.f32.vlgmr.msra.gmra.mrb[2].mxu0 %vm287_vm2, %v5470_v2 }
 0xe83   :  { %4545 = vmatpush1.bf16.msra.mxu0 %v4544_v37  ;;  %1639 = vmatprep.mubr.f32.mxu0 %v5126_v24  ;;  %v4584_v37 = vpack.c.bf16 %v1933_v40, %v1929_v45  ;;  %v2284_v40 = vld [vmem:[#allocation2 + $0x290] sm:$0xff] }
 0xe84   :  { %4547 = vmatprep.subr.bf16.mxu0 %v4546_v39  ;;  %v1926_v39 = vld [vmem:[#allocation2 + $0x240] sm:$0xff] }
 0xe87   :  { %4549 = vmatpush1.bf16.msra.mxu0 %v4548_v46  ;;  %v4578_v46 = vpack.c.bf16 %v1930_v42, %v1926_v39  ;;  %v2295_v39 = vld [vmem:[#allocation2 + $0x2e8] sm:$0xff]  ;;  %v2293_v42 = vld [vmem:[#allocation2 + $0x2d8] sm:$0xff] }
 0xe88   :  { %4559 = vmatprep.subr.bf16.mxu0 %v5290_v20 }
 0xee9   :  { %v1743_v48 = vpop.permute.xlu1 %1742 }
 0xeea   :  { %v1745_v50 = vmul.f32 %v5511_v16, %v1743_v48  ;;  %v1932_v48 = vld [vmem:[#allocation2 + $0x270] sm:$0xff] }
 0xeec   :  { %1747 = vrot.lane.b32.xlu0 %v1745_v50, %s5125_s8  ;;  %v4586_v50 = vpack.c.bf16 %v1932_v48, %v1928_v44  ;;  %v2297_v44 = vld [vmem:[#allocation2 + $0x2f8] sm:$0xff] }
 0xeed   :  { %v1572_v51 = vpop.permute.xlu1 %1571  ;;  %v4614_v48 = vpack.c.bf16 %v2297_v44, %v2293_v42  ;;  %v2652_v44 = vld [vmem:[#allocation2 + $0x330] sm:$0xff] }
 0xeee   :  { %4149 = vmatmul.mubr.msk.f32.vlgmr.msra.gmra.mrb[22].mxu1 %vm287_vm2, %v1572_v51  ;;  %4148 = vmatmul.mubr.msk.f32.vlgmr.msra.gmra.mrb[2].mxu0 %vm287_vm2, %v1572_v51 }
 0xeef   :  { %4568 = vmatpush3.bf16.msra.mxu1 %v5372_v52  ;;  %4356 = vmatprep.mubr.msk.f32.mxu1 %vm5128_vm3, %v5126_v24 }
 0xef0   :  { %4569 = vmatprep.subr.bf16.mxu1 %v5127_v36  ;;  %4561 = vmatpush1.bf16.msra.mxu0 %v5302_v25 }
 0xef1   :  { %4563 = vmatprep.subr.bf16.mxu0 %v5327_v32  ;;  %1815 = vmatprep.mubr.f32.mxu0 %v5126_v24 }
 0xef3   :  { %4571 = vmatpush3.bf16.msra.mxu1 %v5382_v56 }
 0xef4   :  { %4565 = vmatpush1.bf16.msra.mxu0 %v5329_v33 }
 0xef5   :  { %4573 = vmatprep.subr.bf16.mxu0 %v4572_v21 }
 0xef6   :  { %4357 = vmatmul.mubr.msk.f32.vlgmr.msra.gmra.mrb[24].mxu1 %vm287_vm2, %v1572_v51 }
 0xef7   :  { %2074 = vmatprep.mubr.f32.mxu1 %v5126_v24 }
 0xf5e   :  { %v1748_v2 = vpop.permute.xlu0 %1747 }
 0xf5f   :  { %4151 = vmatmul.mubr.msk.f32.vlgmr.msra.gmra.mrb[4].mxu0 %vm287_vm2, %v1748_v2 }
 0xf60   :  { %2003 = vmatprep.mubr.f32.mxu0 %v5126_v24  ;;  %4575 = vmatpush1.bf16.msra.mxu0 %v4574_v29  ;;  %v2287_v29 = vld [vmem:[#allocation2 + $0x2a8] sm:$0xff] }
 0xf61   :  { %4577 = vmatprep.subr.bf16.mxu0 %v4576_v35  ;;  %v2288_v35 = vld [vmem:[#allocation2 + $0x2b0] sm:$0xff] }
 0xf64   :  { %4579 = vmatpush1.bf16.msra.mxu0 %v4578_v46 }
 0xf65   :  { %4589 = vmatprep.subr.bf16.mxu0 %v5290_v20 }
 0xfc9   :  { %v1889_v16 = vpop.f32.mrb[24].mxu1 }
 0xfca   :  { %v4358_v53 = vpop.f32.mrb[25].mxu1 }
0x1032   :  { %v1817_v55 = vpop.f32.mrb[4].mxu0 }
0x1033   :  { %v2085_v41 = vadd.f32 %v1817_v55, %v5355_v43  ;;  %v1819_v57 = vpop.f32.mrb[5].mxu0 }
0x1034   :  { %v1822_v58 = vadd.f32 %v5400_v61, %v1819_v57 }
0x1035   :  { %4980 = vtanh.f32 %v2085_v41  ;;  %v4156_v62 = vmul.f32 -1.442695, %v2085_v41 }
0x1036   :  { %v1893_v59 = vadd.f32 %v1889_v16, %v1822_v58 }
0x1038   :  { %4982 = vtanh.f32 %v1893_v59  ;;  %v4153_v63 = vmul.f32 -1.442695, %v1893_v59 }
0x1039   :  { %4984 = vpow2.f32 %v4156_v62 }
0x103a   :  { %4986 = vpow2.f32 %v4153_v63 }
0x103f   :  { %v4981_v54 = vpop.eup %4980 }
0x1040   :  { %2095 = vrot.lane.b32.xlu0 %v4981_v54, %s5124_s25 }
0x1042   :  { %v4983_v60 = vpop.eup %4982 }
0x1043   :  { %1903 = vrot.lane.b32.xlu1 %v4983_v60, %s5124_s25  ;;  %v4985_v0 = vpop.eup %4984 }
0x1044   :  { %v4987_v1 = vpop.eup %4986  ;;  %v2089_v5 = vadd.f32 1.0, %v4985_v0 }
0x1045   :  { %v1897_v43 = vadd.f32 1.0, %v4987_v1 }
0x1046   :  { %4988 = vrcp.f32 %v2089_v5 }
0x1047   :  { %4990 = vrcp.f32 %v1897_v43 }
0x1050   :  { %v4989_v4 = vpop.eup %4988 }
0x1051   :  { %v4991_v7 = vpop.eup %4990  ;;  %v2093_v9 = vmul.f32 %v4989_v4, %v5517_v38  ;;  %v4580_v38 = vpack.c.bf16 %v1925_v23, %v1921_v19 }
0x1052   :  { %v1901_v12 = vmul.f32 %v4991_v7, %v5477_v22  ;;  %v4582_v22 = vpack.c.bf16 %v1924_v31, %v1920_v30  ;;  %v2285_v30 = vld [vmem:[#allocation2 + $0x298] sm:$0xff] }
0x1053   :  { %4581 = vmatprep.subr.bf16.mxu1 %v4580_v38  ;;  %v2283_v38 = vld [vmem:[#allocation2 + $0x288] sm:$0xff] }
0x1054   :  { %4583 = vmatpush1.bf16.msra.mxu1 %v4582_v22  ;;  %v4602_v31 = vpack.c.bf16 %v2287_v29, %v2283_v38  ;;  %v2282_v22 = vld [vmem:[#allocation2 + $0x280] sm:$0xff] }
0x1055   :  { %4585 = vmatprep.subr.bf16.mxu1 %v4584_v37  ;;  %v4604_v45 = vpack.c.bf16 %v2286_v3, %v2282_v22  ;;  %v2291_v37 = vld [vmem:[#allocation2 + $0x2c8] sm:$0xff] }
0x1056   :  { %v4606_v46 = vpack.c.bf16 %v2295_v39, %v2291_v37  ;;  %v2647_v3 = vld [vmem:[#allocation2 + $0x308] sm:$0xff]  ;;  %v2646_v37 = vld [vmem:[#allocation2 + $0x300] sm:$0xff] }
0x1058   :  { %4587 = vmatpush1.bf16.msra.mxu1 %v4586_v50  ;;  %v2290_v50 = vld [vmem:[#allocation2 + $0x2c0] sm:$0xff] }
0x1059   :  { %4596 = vmatprep.subr.bf16.mxu1 %v5127_v36 }
0x10b2   :  { %v2096_v6 = vpop.permute.xlu0 %2095 }
0x10b3   :  { %v2098_v27 = vmul.f32 %v4989_v4, %v2096_v6 }
0x10b5   :  { %2100 = vrot.lane.b32.xlu0 %v2098_v27, %s5125_s8  ;;  %v1904_v18 = vpop.permute.xlu1 %1903 }
0x10b6   :  { %v1906_v8 = vmul.f32 %v4991_v7, %v1904_v18 }
0x10b8   :  { %1908 = vrot.lane.b32.xlu1 %v1906_v8, %s5125_s8 }
0x1127   :  { %v2101_v10 = vpop.permute.xlu0 %2100 }
0x1128   :  { %v5567_v11 = vadd.f32 %v2101_v10, %v2093_v9 }
0x112a   :  { %4992 = vtanh.f32 %v5567_v11  ;;  %v1909_v13 = vpop.permute.xlu1 %1908 }
0x112b   :  { %v5571_v14 = vadd.f32 %v1909_v13, %v1901_v12 }
0x112d   :  { %4994 = vtanh.f32 %v5571_v14 }
0x1134   :  { %v4993_v51 = vpop.eup %4992 }
0x1135   :  { %2106 = vrot.lane.b32.xlu0 %v4993_v51, %s5124_s25  ;;  %v2294_v51 = vld [vmem:[#allocation2 + $0x2e0] sm:$0xff] }
0x1137   :  { %v4995_v2 = vpop.eup %4994 }
0x1138   :  { %1914 = vrot.lane.b32.xlu1 %v4995_v2, %s5124_s25  ;;  %v2292_v2 = vld [vmem:[#allocation2 + $0x2d0] sm:$0xff] }
0x11a7   :  { %v2107_v16 = vpop.permute.xlu0 %2106 }
0x11a8   :  { %v2109_v53 = vmul.f32 %v4989_v4, %v2107_v16  ;;  %v4608_v16 = vpack.c.bf16 %v2294_v51, %v2290_v50  ;;  %v2657_v50 = vld [vmem:[#allocation2 + $0x358] sm:$0xff] }
0x11a9   :  { %v2661_v51 = vld [vmem:[#allocation2 + $0x378] sm:$0xff] }
0x11aa   :  { %2111 = vrot.lane.b32.xlu0 %v2109_v53, %s5125_s8  ;;  %v1915_v55 = vpop.permute.xlu1 %1914  ;;  %v2296_v53 = vld [vmem:[#allocation2 + $0x2f0] sm:$0xff] }
0x11ab   :  { %v1917_v41 = vmul.f32 %v4991_v7, %v1915_v55  ;;  %v4616_v55 = vpack.c.bf16 %v2296_v53, %v2292_v2  ;;  %v2654_v53 = vld [vmem:[#allocation2 + $0x340] sm:$0xff] }
0x11ad   :  { %1935 = vrot.lane.b32.xlu1 %v1917_v41, %s5125_s8 }
0x121c   :  { %v2112_v58 = vpop.permute.xlu0 %2111 }
0x121f   :  { %v1936_v57 = vpop.permute.xlu1 %1935 }
0x1220   :  { %4154 = vmatmul.mubr.msk.f32.vlgmr.msra.gmra.mrb[2].mxu0 %vm287_vm2, %v1936_v57  ;;  %4155 = vmatmul.mubr.msk.f32.vlgmr.msra.gmra.mrb[22].mxu1 %vm287_vm2, %v1936_v57 }
0x1221   :  { %4591 = vmatpush1.bf16.msra.mxu0 %v5302_v25  ;;  %4598 = vmatpush3.bf16.msra.mxu1 %v5372_v52 }
0x1222   :  { %4593 = vmatprep.subr.bf16.mxu0 %v5327_v32  ;;  %4599 = vmatprep.subr.bf16.mxu1 %v5127_v36 }
0x1223   :  { %2179 = vmatprep.mubr.f32.mxu0 %v5126_v24  ;;  %4367 = vmatprep.mubr.msk.f32.mxu1 %vm5128_vm3, %v5126_v24 }
0x1225   :  { %4595 = vmatpush1.bf16.msra.mxu0 %v5329_v33  ;;  %4601 = vmatpush3.bf16.msra.mxu1 %v5382_v56 }
0x1226   :  { %4603 = vmatprep.subr.bf16.mxu0 %v4602_v31 }
0x1228   :  { %4157 = vmatmul.mubr.msk.f32.vlgmr.msra.gmra.mrb[6].mxu0 %vm287_vm2, %v2112_v58  ;;  %4368 = vmatmul.mubr.msk.f32.vlgmr.msra.gmra.mrb[26].mxu1 %vm287_vm2, %v1936_v57 }
0x1229   :  { %2367 = vmatprep.mubr.f32.mxu0 %v5126_v24  ;;  %2438 = vmatprep.mubr.f32.mxu1 %v5126_v24 }
0x122a   :  { %4605 = vmatpush1.bf16.msra.mxu0 %v4604_v45  ;;  %v2649_v45 = vld [vmem:[#allocation2 + $0x318] sm:$0xff] }
0x122b   :  { %4607 = vmatprep.subr.bf16.mxu0 %v4606_v46  ;;  %v2655_v46 = vld [vmem:[#allocation2 + $0x348] sm:$0xff] }
0x122e   :  { %4609 = vmatpush1.bf16.msra.mxu0 %v4608_v16  ;;  %v4644_v16 = vpack.c.bf16 %v2661_v51, %v2657_v50  ;;  %v3178_v50 = vlaneseq }
0x122f   :  { %4619 = vmatprep.subr.bf16.mxu0 %v5290_v20 }
0x1230   :  { %v3179_v51 = vshrl.u32 %v3178_v50, 7 }
0x12fb   :  { %v2181_v59 = vpop.f32.mrb[6].mxu0  ;;  %v2253_v54 = vpop.f32.mrb[26].mxu1 }
0x12fc   :  { %v2449_v60 = vadd.f32 %v2181_v59, %v5364_v49  ;;  %v2183_v62 = vpop.f32.mrb[7].mxu0  ;;  %v4369_v63 = vpop.f32.mrb[27].mxu1 }
0x12fd   :  { %v2186_v0 = vadd.f32 %v5400_v61, %v2183_v62 }
0x12fe   :  { %4996 = vtanh.f32 %v2449_v60  ;;  %v4162_v4 = vmul.f32 -1.442695, %v2449_v60 }
0x12ff   :  { %v2257_v1 = vadd.f32 %v2253_v54, %v2186_v0 }
0x1301   :  { %4998 = vtanh.f32 %v2257_v1  ;;  %v4159_v6 = vmul.f32 -1.442695, %v2257_v1 }
0x1302   :  { %5000 = vpow2.f32 %v4162_v4 }
0x1303   :  { %5002 = vpow2.f32 %v4159_v6 }
0x1308   :  { %v4997_v5 = vpop.eup %4996 }
0x1309   :  { %2459 = vrot.lane.b32.xlu0 %v4997_v5, %s5124_s25 }
0x130b   :  { %v4999_v43 = vpop.eup %4998 }
0x130c   :  { %2267 = vrot.lane.b32.xlu1 %v4999_v43, %s5124_s25  ;;  %v5001_v27 = vpop.eup %5000 }
0x130d   :  { %v5003_v7 = vpop.eup %5002  ;;  %v2453_v49 = vadd.f32 1.0, %v5001_v27 }
0x130e   :  { %v2261_v18 = vadd.f32 1.0, %v5003_v7 }
0x130f   :  { %5004 = vrcp.f32 %v2453_v49 }
0x1310   :  { %5006 = vrcp.f32 %v2261_v18 }
0x1319   :  { %v5005_v8 = vpop.eup %5004 }
0x131a   :  { %v5007_v12 = vpop.eup %5006  ;;  %v2457_v17 = vmul.f32 %v5005_v8, %v5567_v11  ;;  %v4610_v11 = vpack.c.bf16 %v2289_v34, %v2285_v30 }
0x131b   :  { %v2265_v23 = vmul.f32 %v5007_v12, %v5571_v14  ;;  %v4612_v14 = vpack.c.bf16 %v2288_v35, %v2284_v40  ;;  %v2653_v35 = vld [vmem:[#allocation2 + $0x338] sm:$0xff] }
0x131c   :  { %4611 = vmatprep.subr.bf16.mxu1 %v4610_v11  ;;  %v2651_v11 = vld [vmem:[#allocation2 + $0x328] sm:$0xff]  ;;  %v4640_v39 = vpack.c.bf16 %v2653_v35, %v2649_v45  ;;  %v3017_v35 = vld [vmem:[#allocation2 + $0x3c0] sm:$0xff] }
0x131d   :  { %4613 = vmatpush1.bf16.msra.mxu1 %v4612_v14  ;;  %v4632_v40 = vpack.c.bf16 %v2651_v11, %v2647_v3  ;;  %v2650_v14 = vld [vmem:[#allocation2 + $0x320] sm:$0xff]  ;;  %v3022_v3 = vld [vmem:[#allocation2 + $0x3e8] sm:$0xff]  ;;  %v3020_v11 = vld [vmem:[#allocation2 + $0x3d8] sm:$0xff] }
0x131e   :  { %4615 = vmatprep.subr.bf16.mxu1 %v4614_v48  ;;  %v4634_v42 = vpack.c.bf16 %v2650_v14, %v2646_v37  ;;  %v2659_v48 = vld [vmem:[#allocation2 + $0x368] sm:$0xff]  ;;  %v3021_v37 = vld [vmem:[#allocation2 + $0x3e0] sm:$0xff]  ;;  %v3019_v14 = vld [vmem:[#allocation2 + $0x3d0] sm:$0xff] }
0x131f   :  { %v4636_v2 = vpack.c.bf16 %v2659_v48, %v2655_v46 }
0x1321   :  { %4617 = vmatpush1.bf16.msra.mxu1 %v4616_v55  ;;  %v2658_v55 = vld [vmem:[#allocation2 + $0x360] sm:$0xff] }
0x1322   :  { %4626 = vmatprep.subr.bf16.mxu1 %v5127_v36 }
0x137b   :  { %v2460_v9 = vpop.permute.xlu0 %2459 }
0x137c   :  { %v2462_v10 = vmul.f32 %v5005_v8, %v2460_v9 }
0x137e   :  { %2464 = vrot.lane.b32.xlu0 %v2462_v10, %s5125_s8  ;;  %v2268_v13 = vpop.permute.xlu1 %2267 }
0x137f   :  { %v2270_v15 = vmul.f32 %v5007_v12, %v2268_v13 }
0x1381   :  { %2272 = vrot.lane.b32.xlu1 %v2270_v15, %s5125_s8 }
0x13f0   :  { %v2465_v19 = vpop.permute.xlu0 %2464 }
0x13f1   :  { %v5602_v21 = vadd.f32 %v2465_v19, %v2457_v17 }
0x13f3   :  { %5008 = vtanh.f32 %v5602_v21  ;;  %v2273_v26 = vpop.permute.xlu1 %2272 }
0x13f4   :  { %v5606_v28 = vadd.f32 %v2273_v26, %v2265_v23 }
0x13f6   :  { %5010 = vtanh.f32 %v5606_v28 }
0x13fd   :  { %v5009_v41 = vpop.eup %5008 }
0x13fe   :  { %2470 = vrot.lane.b32.xlu0 %v5009_v41, %s5124_s25  ;;  %v2656_v41 = vld [vmem:[#allocation2 + $0x350] sm:$0xff] }
0x1400   :  { %v5011_v57 = vpop.eup %5010 }
0x1401   :  { %2278 = vrot.lane.b32.xlu1 %v5011_v57, %s5124_s25  ;;  %v4638_v57 = vpack.c.bf16 %v2658_v55, %v2654_v53  ;;  %v3176_v53 = vld [vmem:[%s6016_s28] sm:$0xf]  ;;  %v5677_v55 = vsub.s32 1, %v3179_v51 }
0x1470   :  { %v2471_v58 = vpop.permute.xlu0 %2470 }
0x1471   :  { %v2473_v59 = vmul.f32 %v5005_v8, %v2471_v58  ;;  %v2660_v58 = vld [vmem:[#allocation2 + $0x370] sm:$0xff] }
0x1473   :  { %2475 = vrot.lane.b32.xlu0 %v2473_v59, %s5125_s8  ;;  %v2279_v54 = vpop.permute.xlu1 %2278  ;;  %v4646_v59 = vpack.c.bf16 %v2660_v58, %v2656_v41  ;;  %v5679_v41 = vsub.s32 3, %v3179_v51 }
0x1474   :  { %v2281_v60 = vmul.f32 %v5007_v12, %v2279_v54 }
0x1476   :  { %2299 = vrot.lane.b32.xlu1 %v2281_v60, %s5125_s8 }
0x14e5   :  { %v2476_v63 = vpop.permute.xlu0 %2475 }
0x14e8   :  { %v2300_v62 = vpop.permute.xlu1 %2299 }
0x14e9   :  { %4160 = vmatmul.mubr.msk.f32.vlgmr.msra.gmra.mrb[2].mxu0 %vm287_vm2, %v2300_v62  ;;  %4161 = vmatmul.mubr.msk.f32.vlgmr.msra.gmra.mrb[22].mxu1 %vm287_vm2, %v2300_v62 }
0x14ea   :  { %4621 = vmatpush1.bf16.msra.mxu0 %v5302_v25  ;;  %4628 = vmatpush3.bf16.msra.mxu1 %v5372_v52 }
0x14eb   :  { %4623 = vmatprep.subr.bf16.mxu0 %v5327_v32  ;;  %4629 = vmatprep.subr.bf16.mxu1 %v5127_v36 }
0x14ec   :  { %2543 = vmatprep.mubr.f32.mxu0 %v5126_v24  ;;  %4378 = vmatprep.mubr.msk.f32.mxu1 %vm5128_vm3, %v5126_v24 }
0x14ee   :  { %4625 = vmatpush1.bf16.msra.mxu0 %v5329_v33  ;;  %4631 = vmatpush3.bf16.msra.mxu1 %v5382_v56 }
0x14ef   :  { %4633 = vmatprep.subr.bf16.mxu0 %v4632_v40  ;;  %4641 = vmatprep.subr.bf16.mxu1 %v4640_v39  ;;  %v4668_v39 = vpack.c.bf16 %v3021_v37, %v3017_v35 }
0x14f1   :  { %4163 = vmatmul.mubr.msk.f32.vlgmr.msra.gmra.mrb[8].mxu0 %vm287_vm2, %v2476_v63  ;;  %4379 = vmatmul.mubr.msk.f32.vlgmr.msra.gmra.mrb[28].mxu1 %vm287_vm2, %v2300_v62 }
0x14f2   :  { %2731 = vmatprep.mubr.f32.mxu0 %v5126_v24  ;;  %2802 = vmatprep.mubr.f32.mxu1 %v5126_v24 }
0x14f3   :  { %4635 = vmatpush1.bf16.msra.mxu0 %v4634_v42  ;;  %v3023_v42 = vld [vmem:[#allocation2 + $0x3f0] sm:$0xff] }
0x14f4   :  { %4637 = vmatprep.subr.bf16.mxu0 %v4636_v2  ;;  %v5670_v2 = vsub.s32 0, %v3179_v51 }
0x14f7   :  { %4639 = vmatpush1.bf16.msra.mxu0 %v4638_v57  ;;  %v3181_v57 = vrot.slane %v3176_v53, %v5670_v2 }
0x14f8   :  { %4649 = vmatprep.subr.bf16.mxu0 %v5290_v20 }
0x15c4   :  { %v2545_v0 = vpop.f32.mrb[8].mxu0  ;;  %v2617_v1 = vpop.f32.mrb[28].mxu1 }
0x15c5   :  { %v2813_v5 = vadd.f32 %v2545_v0, %v5361_v47  ;;  %v2547_v43 = vpop.f32.mrb[9].mxu0  ;;  %v4380_v4 = vpop.f32.mrb[29].mxu1 }
0x15c6   :  { %v2550_v6 = vadd.f32 %v5400_v61, %v2547_v43 }
0x15c7   :  { %5012 = vtanh.f32 %v2813_v5  ;;  %v4168_v18 = vmul.f32 -1.442695, %v2813_v5 }
0x15c8   :  { %v2621_v27 = vadd.f32 %v2617_v1, %v2550_v6 }
0x15ca   :  { %5014 = vtanh.f32 %v2621_v27  ;;  %v4165_v8 = vmul.f32 -1.442695, %v2621_v27 }
0x15cb   :  { %5016 = vpow2.f32 %v4168_v18 }
0x15cc   :  { %5018 = vpow2.f32 %v4165_v8 }
0x15d1   :  { %v5013_v7 = vpop.eup %5012 }
0x15d2   :  { %2823 = vrot.lane.b32.xlu0 %v5013_v7, %s5124_s25 }
0x15d4   :  { %v5015_v49 = vpop.eup %5014 }
0x15d5   :  { %2631 = vrot.lane.b32.xlu1 %v5015_v49, %s5124_s25  ;;  %v5017_v9 = vpop.eup %5016 }
0x15d6   :  { %v5019_v10 = vpop.eup %5018  ;;  %v2817_v47 = vadd.f32 1.0, %v5017_v9 }
0x15d7   :  { %v2625_v12 = vadd.f32 1.0, %v5019_v10 }
0x15d8   :  { %5020 = vrcp.f32 %v2817_v47 }
0x15d9   :  { %5022 = vrcp.f32 %v2625_v12  ;;  %v3014_v12 = vld [vmem:[#allocation2 + $0x3a8] sm:$0xff] }
0x15e2   :  { %v5021_v13 = vpop.eup %5020 }
0x15e3   :  { %v5023_v19 = vpop.eup %5022  ;;  %v2821_v38 = vmul.f32 %v5021_v13, %v5602_v21  ;;  %v2648_v21 = vld [vmem:[#allocation2 + $0x310] sm:$0xff] }
0x15e4   :  { %v2629_v31 = vmul.f32 %v5023_v19, %v5606_v28  ;;  %v4642_v28 = vpack.c.bf16 %v2652_v44, %v2648_v21  ;;  %v4676_v21 = vpack.c.bf16 %v3023_v42, %v3019_v14 }
0x15e6   :  { %4643 = vmatpush1.bf16.msra.mxu1 %v4642_v28 }
0x15e7   :  { %4645 = vmatprep.subr.bf16.mxu1 %v4644_v16  ;;  %v5672_v16 = vsub.s32 2, %v3179_v51 }
0x15e9   :  { %v3189_v58 = vrot.slane %v3176_v53, %v5672_v16 }
0x15ea   :  { %4647 = vmatpush1.bf16.msra.mxu1 %v4646_v59  ;;  %v3185_v59 = vrot.slane %v3176_v53, %v5677_v55 }
0x15eb   :  { %4656 = vmatprep.subr.bf16.mxu1 %v5127_v36 }
0x1644   :  { %v2824_v15 = vpop.permute.xlu0 %2823 }
0x1645   :  { %v2826_v17 = vmul.f32 %v5021_v13, %v2824_v15 }
0x1647   :  { %2828 = vrot.lane.b32.xlu0 %v2826_v17, %s5125_s8  ;;  %v2632_v23 = vpop.permute.xlu1 %2631  ;;  %v3016_v17 = vld [vmem:[#allocation2 + $0x3b8] sm:$0xff] }
0x1648   :  { %v2634_v26 = vmul.f32 %v5023_v19, %v2632_v23  ;;  %v3013_v23 = vld [vmem:[#allocation2 + $0x3a0] sm:$0xff] }
0x164a   :  { %2636 = vrot.lane.b32.xlu1 %v2634_v26, %s5125_s8 }
0x16b9   :  { %v2829_v29 = vpop.permute.xlu0 %2828 }
0x16ba   :  { %v2831_v30 = vadd.f32 %v2829_v29, %v2821_v38  ;;  %v3011_v29 = vld [vmem:[#allocation2 + $0x390] sm:$0xff] }
0x16bc   :  { %5024 = vtanh.f32 %v2831_v30  ;;  %v2637_v34 = vpop.permute.xlu1 %2636  ;;  %v3015_v30 = vld [vmem:[#allocation2 + $0x3b0] sm:$0xff] }
0x16bd   :  { %v5638_v22 = vadd.f32 %v2637_v34, %v2629_v31  ;;  %v3018_v31 = vld [vmem:[#allocation2 + $0x3c8] sm:$0xff]  ;;  %v4672_v34 = vpack.c.bf16 %v3015_v30, %v3011_v29 }
0x16be   :  { %v4666_v45 = vpack.c.bf16 %v3022_v3, %v3018_v31 }
0x16bf   :  { %5026 = vtanh.f32 %v5638_v22 }
0x16c6   :  { %v5025_v54 = vpop.eup %5024 }
0x16c7   :  { %2834 = vrot.lane.b32.xlu0 %v5025_v54, %s5124_s25  ;;  %v3193_v54 = vrot.slane %v3176_v53, %v5679_v41 }
0x16c9   :  { %v5027_v60 = vpop.eup %5026 }
0x16ca   :  { %2642 = vrot.lane.b32.xlu1 %v5027_v60, %s5124_s25 }
0x1739   :  { %v2835_v62 = vpop.permute.xlu0 %2834 }
0x173a   :  { %v2837_v63 = vmul.f32 %v5021_v13, %v2835_v62  ;;  %v3012_v13 = vld [vmem:[#allocation2 + $0x398] sm:$0xff] }
0x173b   :  { %v4670_v26 = vpack.c.bf16 %v3016_v17, %v3012_v13 }
0x173c   :  { %2839 = vrot.lane.b32.xlu0 %v2837_v63, %s5125_s8  ;;  %v2643_v0 = vpop.permute.xlu1 %2642 }
0x173d   :  { %v2645_v1 = vmul.f32 %v5023_v19, %v2643_v0  ;;  %v3009_v19 = vld [vmem:[#allocation2 + $0x380] sm:$0xff] }
0x173e   :  { %v4664_v38 = vpack.c.bf16 %v3013_v23, %v3009_v19 }
0x173f   :  { %2663 = vrot.lane.b32.xlu1 %v2645_v1, %s5125_s8 }
0x17ae   :  { %v2840_v20 = vpop.permute.xlu0 %2839 }
0x17b1   :  { %v2664_v5 = vpop.permute.xlu1 %2663 }
0x17b2   :  { %4166 = vmatmul.mubr.msk.f32.vlgmr.msra.gmra.mrb[2].mxu0 %vm287_vm2, %v2664_v5  ;;  %4167 = vmatmul.mubr.msk.f32.vlgmr.msra.gmra.mrb[22].mxu1 %vm287_vm2, %v2664_v5 }
0x17b3   :  { %4651 = vmatpush1.bf16.msra.mxu0 %v5302_v25  ;;  %4658 = vmatpush3.bf16.msra.mxu1 %v5372_v52 }
0x17b4   :  { %4653 = vmatprep.subr.bf16.mxu0 %v5327_v32  ;;  %4659 = vmatprep.subr.bf16.mxu1 %v5127_v36 }
0x17b5   :  { %2907 = vmatprep.mubr.f32.mxu0 %v5126_v24  ;;  %4389 = vmatprep.mubr.msk.f32.mxu1 %vm5128_vm3, %v5126_v24 }
0x17b7   :  { %4655 = vmatpush1.bf16.msra.mxu0 %v5329_v33  ;;  %4661 = vmatpush3.bf16.msra.mxu1 %v5382_v56 }
0x17b8   :  { %4671 = vmatprep.subr.bf16.mxu1 %v4670_v26 }
0x17ba   :  { %4169 = vmatmul.mubr.msk.f32.vlgmr.msra.gmra.mrb[10].mxu0 %vm287_vm2, %v2840_v20  ;;  %4390 = vmatmul.mubr.msk.f32.vlgmr.msra.gmra.mrb[30].mxu1 %vm287_vm2, %v2664_v5 }
0x17bb   :  { %3094 = vmatprep.mubr.f32.mxu0 %v5126_v24  ;;  %3165 = vmatprep.mubr.f32.mxu1 %v5126_v24 }
0x17bc   :  { %4673 = vmatpush1.bf16.msra.mxu1 %v4672_v34 }
0x188d   :  { %v2909_v25 = vpop.f32.mrb[10].mxu0  ;;  %v2980_v32 = vpop.f32.mrb[30].mxu1 }
0x188e   :  { %v2910_v52 = vpop.f32.mrb[11].mxu0  ;;  %v4391_v43 = vpop.f32.mrb[31].mxu1 }
0x188f   :  { %v2913_v4 = vadd.f32 %v5400_v61, %v2910_v52  ;;  %v3010_v61 = vld [vmem:[#allocation2 + $0x388] sm:$0xff] }
0x1890   :  { %v4662_v15 = vpack.c.bf16 %v3014_v12, %v3010_v61 }
0x1891   :  { %v2984_v6 = vadd.f32 %v2980_v32, %v2913_v4 }
0x1892   :  { %4663 = vmatprep.subr.bf16.mxu0 %v4662_v15 }
0x1893   :  { %5028 = vtanh.f32 %v2984_v6  ;;  %v4171_v56 = vmul.f32 -1.442695, %v2984_v6  ;;  %4665 = vmatpush1.bf16.msra.mxu0 %v4664_v38 }
0x1894   :  { %4667 = vmatprep.subr.bf16.mxu0 %v4666_v45 }
0x1895   :  { %5030 = vpow2.f32 %v4171_v56 }
0x1897   :  { %4669 = vmatpush1.bf16.msra.mxu0 %v4668_v39 }
0x189d   :  { %v5029_v33 = vpop.eup %5028 }
0x189e   :  { %2994 = vrot.lane.b32.xlu1 %v5029_v33, %s5124_s25 }
0x189f   :  { %v5031_v27 = vpop.eup %5030 }
0x18a0   :  { %v2988_v7 = vadd.f32 1.0, %v5031_v27 }
0x18a2   :  { %5032 = vrcp.f32 %v2988_v7 }
0x18ac   :  { %v5033_v49 = vpop.eup %5032 }
0x18ad   :  { %v2992_v9 = vmul.f32 %v5033_v49, %v5638_v22  ;;  %v3024_v22 = vld [vmem:[#allocation2 + $0x3f8] sm:$0xff] }
0x18ae   :  { %v4674_v40 = vpack.c.bf16 %v3024_v22, %v3020_v11 }
0x18b0   :  { %4675 = vmatprep.subr.bf16.mxu1 %v4674_v40 }
0x18b1   :  { %4677 = vmatpush1.bf16.msra.mxu1 %v4676_v21 }
0x1910   :  { %v2995_v18 = vpop.permute.xlu1 %2994 }
0x1911   :  { %v2997_v8 = vmul.f32 %v5033_v49, %v2995_v18 }
0x1913   :  { %2999 = vrot.lane.b32.xlu0 %v2997_v8, %s5125_s8 }
0x1985   :  { %v3000_v10 = vpop.permute.xlu0 %2999 }
0x1986   :  { %v3002_v47 = vadd.f32 %v3000_v10, %v2992_v9 }
0x1988   :  { %5034 = vtanh.f32 %v3002_v47 }
0x1992   :  { %v5035_v44 = vpop.eup %5034 }
0x1993   :  { %3005 = vrot.lane.b32.xlu1 %v5035_v44, %s5124_s25 }
0x1a05   :  { %v3006_v46 = vpop.permute.xlu1 %3005 }
0x1a06   :  { %v3008_v28 = vmul.f32 %v5033_v49, %v3006_v46 }
0x1a08   :  { %3026 = vrot.lane.b32.xlu0 %v3008_v28, %s5125_s8 }
0x1a7a   :  { %v3027_v48 = vpop.permute.xlu0 %3026 }
0x1a7b   :  { %4172 = vmatmul.mubr.msk.f32.vlgmr.msra.gmra.mrb[2].mxu0 %vm287_vm2, %v3027_v48  ;;  %4173 = vmatmul.mubr.msk.f32.vlgmr.msra.gmra.mrb[22].mxu1 %vm287_vm2, %v3027_v48 }
0x1b4e   :  { %v3096_v60 = vpop.f32.mrb[2].mxu0  ;;  %v3167_v62 = vpop.f32.mrb[22].mxu1 }
0x1b4f   :  { %v5685_v63 = vadd.f32 %v3181_v57, %v3096_v60  ;;  %v5687_v0 = vadd.f32 %v3189_v58, %v3167_v62  ;;  %v3098_v1 = vpop.f32.mrb[3].mxu0  ;;  %v3169_v5 = vpop.f32.mrb[23].mxu1 }
0x1b50   :  { %v5689_v20 = vadd.f32 %v3185_v59, %v3098_v1  ;;  %v5691_v25 = vadd.f32 %v3193_v54, %v3169_v5 }
0x1b51   :  { %v3203_v32 = vsel %vm3202_vm4, %v5685_v63, 0.0  ;;  %v3235_v52 = vmul.f32 %v5685_v63, %v5685_v63  ;;  %v3217_v43 = vsel %vm3202_vm4, %v5687_v0, 0.0  ;;  %v3237_v4 = vmul.f32 %v5687_v0, %v5687_v0 }
0x1b52   :  { %v3204_v6 = vrot.slane %v3203_v32, 4  ;;  %v3218_v33 = vrot.slane %v3217_v43, 4  ;;  %v3210_v56 = vsel %vm3202_vm4, %v5689_v20, 0.0  ;;  %v3236_v27 = vmul.f32 %v5689_v20, %v5689_v20 }
0x1b53   :  { %v3239_v7 = vsel %vm3202_vm4, %v3235_v52, 0.0  ;;  %v3253_v49 = vsel %vm3202_vm4, %v3237_v4, 0.0  ;;  %v3211_v18 = vrot.slane %v3210_v56, 4  ;;  %v3224_v8 = vsel %vm3202_vm4, %v5691_v25, 0.0 }
0x1b54   :  { %v3205_v9 = vadd.f32 %v3204_v6, %v3203_v32  ;;  %v3240_v10 = vrot.slane %v3239_v7, 4  ;;  %v3219_v47 = vadd.f32 %v3218_v33, %v3217_v43  ;;  %v3254_v61 = vrot.slane %v3253_v49, 4 }
0x1b55   :  { %v3212_v12 = vadd.f32 %v3211_v18, %v3210_v56  ;;  %v3246_v13 = vsel %vm3202_vm4, %v3236_v27, 0.0  ;;  %v3225_v15 = vrot.slane %v3224_v8, 4  ;;  %v3238_v17 = vmul.f32 %v5691_v25, %v5691_v25 }
0x1b56   :  { %v3206_v19 = vrot.slane %v3205_v9, 2  ;;  %v3241_v23 = vadd.f32 %v3240_v10, %v3239_v7  ;;  %v3220_v26 = vrot.slane %v3219_v47, 2  ;;  %v3255_v38 = vadd.f32 %v3254_v61, %v3253_v49 }
0x1b57   :  { %v3213_v29 = vrot.slane %v3212_v12, 2  ;;  %v3247_v30 = vrot.slane %v3246_v13, 4  ;;  %v3226_v31 = vadd.f32 %v3225_v15, %v3224_v8  ;;  %v3260_v34 = vsel %vm3202_vm4, %v3238_v17, 0.0 }
0x1b58   :  { %v3207_v3 = vadd.f32 %v3206_v19, %v3205_v9  ;;  %v3242_v11 = vrot.slane %v3241_v23, 2  ;;  %v3221_v22 = vadd.f32 %v3220_v26, %v3219_v47  ;;  %v3256_v45 = vrot.slane %v3255_v38, 2 }
0x1b59   :  { %v3214_v40 = vadd.f32 %v3213_v29, %v3212_v12  ;;  %v3248_v35 = vadd.f32 %v3247_v30, %v3246_v13  ;;  %v3227_v37 = vrot.slane %v3226_v31, 2  ;;  %v3261_v14 = vrot.slane %v3260_v34, 4 }
0x1b5a   :  { %v3208_v39 = vrot.slane %v3207_v3, 1  ;;  %v3243_v42 = vadd.f32 %v3242_v11, %v3241_v23  ;;  %v3222_v21 = vrot.slane %v3221_v22, 1  ;;  %v3257_v44 = vadd.f32 %v3256_v45, %v3255_v38  ;;  %v3325_v45 = vld [vmem:[%s5980_s9] sm:$0xf] }
0x1b5b   :  { %v3215_v46 = vrot.slane %v3214_v40, 1  ;;  %v3249_v28 = vrot.slane %v3248_v35, 2  ;;  %v3228_v48 = vadd.f32 %v3227_v37, %v3226_v31  ;;  %v3262_v50 = vadd.f32 %v3261_v14, %v3260_v34 }
0x1b5c   :  { %v3209_v51 = vadd.f32 %v3208_v39, %v3207_v3  ;;  %v3244_v53 = vrot.slane %v3243_v42, 1  ;;  %v3223_v57 = vadd.f32 %v3222_v21, %v3221_v22  ;;  %v3258_v58 = vrot.slane %v3257_v44, 1  ;;  %v3299_v22 = vld [vmem:[%s6017_s6] sm:$0xf] }
0x1b5d   :  { %v3216_v59 = vadd.f32 %v3215_v46, %v3214_v40  ;;  %v3250_v54 = vadd.f32 %v3249_v28, %v3248_v35  ;;  %v3229_v60 = vrot.slane %v3228_v48, 1  ;;  %v3263_v62 = vrot.slane %v3262_v50, 2 }
0x1b5e   :  { %v3231_v1 = vmul.f32 0.5, %v3209_v51  ;;  %v3245_v5 = vadd.f32 %v3244_v53, %v3243_v42  ;;  %v3233_v32 = vmul.f32 0.5, %v3223_v57  ;;  %v3259_v52 = vadd.f32 %v3258_v58, %v3257_v44 }
0x1b5f   :  { %v3232_v43 = vmul.f32 0.5, %v3216_v59  ;;  %v3251_v4 = vrot.slane %v3250_v54, 1  ;;  %v3230_v6 = vadd.f32 %v3229_v60, %v3228_v48  ;;  %v3264_v33 = vadd.f32 %v3263_v62, %v3262_v50 }
0x1b60   :  { %v3267_v56 = vmul.f32 0.5, %v3245_v5  ;;  %v3271_v27 = vmul.f32 %v3231_v1, %v3231_v1  ;;  %v3269_v7 = vmul.f32 0.5, %v3259_v52  ;;  %v3273_v49 = vmul.f32 %v3233_v32, %v3233_v32 }
0x1b61   :  { %v3252_v18 = vadd.f32 %v3251_v4, %v3250_v54  ;;  %v3272_v8 = vmul.f32 %v3232_v43, %v3232_v43  ;;  %v3234_v10 = vmul.f32 0.5, %v3230_v6  ;;  %v3265_v47 = vrot.slane %v3264_v33, 1 }
0x1b62   :  { %v3275_v9 = vsub.f32 %v3267_v56, %v3271_v27  ;;  %v3277_v61 = vsub.f32 %v3269_v7, %v3273_v49  ;;  %v3283_v40 = vsub.f32 %v5685_v63, %v3231_v1  ;;  %v3304_v35 = vrot.slane %v3299_v22, %v5670_v2 }
0x1b63   :  { %v3268_v12 = vmul.f32 0.5, %v3252_v18  ;;  %v3266_v15 = vadd.f32 %v3265_v47, %v3264_v33  ;;  %v3274_v17 = vmul.f32 %v3234_v10, %v3234_v10  ;;  %v3285_v14 = vsub.f32 %v5687_v0, %v3233_v32 }
0x1b64   :  { %v3279_v13 = vmax.f32 %v3275_v9, 0.0  ;;  %v3281_v19 = vmax.f32 %v3277_v61, 0.0  ;;  %v3312_v39 = vrot.slane %v3299_v22, %v5672_v16  ;;  %v3330_v44 = vrot.slane %v3325_v45, %v5670_v2 }
0x1b65   :  { %v3276_v23 = vsub.f32 %v3268_v12, %v3272_v8  ;;  %v3270_v38 = vmul.f32 0.5, %v3266_v15  ;;  %v3338_v28 = vrot.slane %v3325_v45, %v5672_v16  ;;  %v3284_v48 = vsub.f32 %v5689_v20, %v3232_v43 }
0x1b66   :  { %v3287_v26 = vadd.f32 1e-05, %v3279_v13  ;;  %v3289_v29 = vadd.f32 1e-05, %v3281_v19  ;;  %v3308_v50 = vrot.slane %v3299_v22, %v5677_v55  ;;  %v3334_v58 = vrot.slane %v3325_v45, %v5677_v55 }
0x1b67   :  { %v3280_v30 = vmax.f32 %v3276_v23, 0.0  ;;  %v3278_v31 = vsub.f32 %v3270_v38, %v3274_v17  ;;  %v3286_v59 = vsub.f32 %v5691_v25, %v3234_v10  ;;  %v3316_v54 = vrot.slane %v3299_v22, %v5679_v41 }
0x1b68   :  { %5036 = vrsqrt.f32 %v3287_v26  ;;  %v3342_v5 = vrot.slane %v3325_v45, %v5679_v41 }
0x1b69   :  { %5038 = vrsqrt.f32 %v3289_v29  ;;  %v3288_v34 = vadd.f32 1e-05, %v3280_v30  ;;  %v3282_v3 = vmax.f32 %v3278_v31, 0.0 }
0x1b6b   :  { %5040 = vrsqrt.f32 %v3288_v34  ;;  %v3290_v11 = vadd.f32 1e-05, %v3282_v3 }
0x1b6d   :  { %5042 = vrsqrt.f32 %v3290_v11 }
0x1b72   :  { %v5037_v37 = vpop.eup %5036 }
0x1b73   :  { %v5039_v42 = vpop.eup %5038  ;;  %v3295_v21 = vmul.f32 %v5037_v37, %v3283_v40 }
0x1b74   :  { %v3297_v46 = vmul.f32 %v5039_v42, %v3285_v14 }
0x1b75   :  { %v5041_v51 = vpop.eup %5040  ;;  %v3321_v63 = vmul.f32 %v3304_v35, %v3295_v21 }
0x1b76   :  { %v3323_v53 = vmul.f32 %v3312_v39, %v3297_v46  ;;  %v3296_v57 = vmul.f32 %v5041_v51, %v3284_v48 }
0x1b77   :  { %v5728_v0 = vadd.f32 %v3330_v44, %v3321_v63  ;;  %v5043_v60 = vpop.eup %5042 }
0x1b78   :  { %v5732_v62 = vadd.f32 %v3338_v28, %v3323_v53  ;;  %v3322_v16 = vmul.f32 %v3308_v50, %v3296_v57  ;;  %v3298_v1 = vmul.f32 %v5043_v60, %v3286_v59 }
0x1b79   :  { %v3351_v20 = vmax.f32 %v5728_v0, 0.0 }
0x1b7a   :  { %v3353_v32 = vmax.f32 %v5732_v62, 0.0  ;;  %v3348_v52 = vadd.f32 %v3334_v58, %v3322_v16  ;;  %v3324_v43 = vmul.f32 %v3316_v54, %v3298_v1 }
0x1b7c   :  { %v3352_v4 = vmax.f32 %v3348_v52, 0.0  ;;  %v5737_v6 = vadd.f32 %v3342_v5, %v3324_v43 }
0x1b7e   :  { %v3354_v25 = vmax.f32 %v5737_v6, 0.0 }
0x1b7f   :  { %5120 = dma.done.wait [#allocation5], 16384 }
0x1b80   :  { %5121 = vsyncadd [#allocation5], 4294950912  ;;  %3563 = vmatprep.mubr.f32.mxu0 %v3352_v4  ;;  %v3360_v33 = vld [vmem:[#allocation3 + $0x8] sm:$0xff]  ;;  %v3362_v56 = vld [vmem:[#allocation3 + $0x18] sm:$0xff]  ;;  %vm3962_vm5 = vcmask 254976   ;;  %s5131_s3 = smov [#allocation6]  }
0x1b81   :  { %v3359_v27 = vld [vmem:[#allocation3] sm:$0xff]  ;;  %v4678_v7 = vpack.c.bf16 %v3362_v56, %v3360_v33  ;;  %v3361_v49 = vld [vmem:[#allocation3 + $0x10] sm:$0xff]  ;;  %v3364_v18 = vld [vmem:[#allocation3 + $0x28] sm:$0xff]  ;;  %s4096_s27 = sshll.u32 %s5131_s3, 4  ;;  %vm4088_vm6 = vcmask 74752   ;;  %s4097_s27 = int_to_ptr.vmem [resolvable:$true] %s4096_s27 }
0x1b82   :  { %v3366_v8 = vld [vmem:[#allocation3 + $0x38] sm:$0xff]  ;;  %v4680_v41 = vpack.c.bf16 %v3361_v49, %v3359_v27  ;;  %v3363_v10 = vld [vmem:[#allocation3 + $0x20] sm:$0xff]  ;;  %v3365_v47 = vld [vmem:[#allocation3 + $0x30] sm:$0xff]  ;;  %p5101_p3 = scmp.lt.s32.totalorder %s4097_s27, %s4097_s27 }
0x1b83   :  { %v4682_v9 = vpack.c.bf16 %v3366_v8, %v3364_v18  ;;  %v3368_v61 = vld [vmem:[#allocation3 + $0x48] sm:$0xff]  ;;  %4679 = vmatprep.subr.bf16.mxu0 %v4678_v7  ;;  %v3370_v12 = vld [vmem:[#allocation3 + $0x58] sm:$0xff]  ;;  %v4684_v13 = vpack.c.bf16 %v3365_v47, %v3363_v10  ;;  %v3367_v17 = vld [vmem:[#allocation3 + $0x40] sm:$0xff] }
0x1b84   :  { %4681 = vmatpush1.bf16.msra.mxu0 %v4680_v41  ;;  %v4686_v15 = vpack.c.bf16 %v3370_v12, %v3368_v61  ;;  %v3369_v19 = vld [vmem:[#allocation3 + $0x50] sm:$0xff]  ;;  %v3372_v23 = vld [vmem:[#allocation3 + $0x68] sm:$0xff]  ;;  %v3374_v26 = vld [vmem:[#allocation3 + $0x78] sm:$0xff] }
0x1b85   :  { %4683 = vmatprep.subr.bf16.mxu0 %v4682_v9  ;;  %v4688_v38 = vpack.c.bf16 %v3369_v19, %v3367_v17  ;;  %v4690_v29 = vpack.c.bf16 %v3374_v26, %v3372_v23  ;;  %v3371_v30 = vld [vmem:[#allocation3 + $0x60] sm:$0xff]  ;;  %v3373_v31 = vld [vmem:[#allocation3 + $0x70] sm:$0xff]  ;;  %v3376_v34 = vld [vmem:[#allocation3 + $0x88] sm:$0xff] }
0x1b86   :  { %v3378_v3 = vld [vmem:[#allocation3 + $0x98] sm:$0xff]  ;;  %v4692_v11 = vpack.c.bf16 %v3373_v31, %v3371_v30  ;;  %v3375_v45 = vld [vmem:[#allocation3 + $0x80] sm:$0xff]  ;;  %v3377_v40 = vld [vmem:[#allocation3 + $0x90] sm:$0xff] }
0x1b87   :  { %v4694_v22 = vpack.c.bf16 %v3378_v3, %v3376_v34  ;;  %v3380_v35 = vld [vmem:[#allocation3 + $0xa8] sm:$0xff]  ;;  %v3382_v37 = vld [vmem:[#allocation3 + $0xb8] sm:$0xff]  ;;  %v4696_v14 = vpack.c.bf16 %v3377_v40, %v3375_v45  ;;  %v3379_v42 = vld [vmem:[#allocation3 + $0xa0] sm:$0xff] }
0x1b88   :  { %4685 = vmatpush1.bf16.msra.mxu0 %v4684_v13  ;;  %v4698_v39 = vpack.c.bf16 %v3382_v37, %v3380_v35  ;;  %v3381_v21 = vld [vmem:[#allocation3 + $0xb0] sm:$0xff]  ;;  %v3384_v44 = vld [vmem:[#allocation3 + $0xc8] sm:$0xff]  ;;  %v3386_v46 = vld [vmem:[#allocation3 + $0xd8] sm:$0xff] }
0x1b89   :  { %4687 = vmatprep.subr.bf16.mxu0 %v4686_v15  ;;  %v4700_v28 = vpack.c.bf16 %v3381_v21, %v3379_v42  ;;  %v4702_v48 = vpack.c.bf16 %v3386_v46, %v3384_v44  ;;  %v3383_v50 = vld [vmem:[#allocation3 + $0xc0] sm:$0xff]  ;;  %v3385_v51 = vld [vmem:[#allocation3 + $0xd0] sm:$0xff]  ;;  %v3388_v63 = vld [vmem:[#allocation3 + $0xe8] sm:$0xff] }
0x1b8a   :  { %v3390_v53 = vld [vmem:[#allocation3 + $0xf8] sm:$0xff]  ;;  %v4704_v57 = vpack.c.bf16 %v3385_v51, %v3383_v50  ;;  %v3387_v59 = vld [vmem:[#allocation3 + $0xe0] sm:$0xff]  ;;  %v3389_v54 = vld [vmem:[#allocation3 + $0xf0] sm:$0xff] }
0x1b8b   :  { %v4706_v58 = vpack.c.bf16 %v3390_v53, %v3388_v63  ;;  %v3392_v60 = vld [vmem:[#allocation3 + $0x108] sm:$0xff]  ;;  %v3394_v16 = vld [vmem:[#allocation3 + $0x118] sm:$0xff]  ;;  %v4708_v1 = vpack.c.bf16 %v3389_v54, %v3387_v59  ;;  %v3391_v52 = vld [vmem:[#allocation3 + $0x100] sm:$0xff] }
0x1b8c   :  { %4689 = vmatpush1.bf16.msra.mxu0 %v4688_v38  ;;  %v4710_v5 = vpack.c.bf16 %v3394_v16, %v3392_v60  ;;  %v3393_v43 = vld [vmem:[#allocation3 + $0x110] sm:$0xff]  ;;  %v3396_v4 = vld [vmem:[#allocation3 + $0x128] sm:$0xff]  ;;  %v3398_v33 = vld [vmem:[#allocation3 + $0x138] sm:$0xff] }
0x1b8d   :  { %4691 = vmatprep.subr.bf16.mxu0 %v4690_v29  ;;  %v4712_v56 = vpack.c.bf16 %v3393_v43, %v3391_v52  ;;  %v4714_v27 = vpack.c.bf16 %v3398_v33, %v3396_v4  ;;  %v3395_v7 = vld [vmem:[#allocation3 + $0x120] sm:$0xff]  ;;  %v3397_v49 = vld [vmem:[#allocation3 + $0x130] sm:$0xff]  ;;  %v3400_v18 = vld [vmem:[#allocation3 + $0x148] sm:$0xff] }
0x1b8e   :  { %v3402_v8 = vld [vmem:[#allocation3 + $0x158] sm:$0xff]  ;;  %v4716_v41 = vpack.c.bf16 %v3397_v49, %v3395_v7  ;;  %v3399_v10 = vld [vmem:[#allocation3 + $0x140] sm:$0xff]  ;;  %v3401_v47 = vld [vmem:[#allocation3 + $0x150] sm:$0xff] }
0x1b8f   :  { %v4718_v9 = vpack.c.bf16 %v3402_v8, %v3400_v18  ;;  %v3404_v61 = vld [vmem:[#allocation3 + $0x168] sm:$0xff]  ;;  %v3406_v12 = vld [vmem:[#allocation3 + $0x178] sm:$0xff]  ;;  %v4720_v13 = vpack.c.bf16 %v3401_v47, %v3399_v10  ;;  %v3403_v17 = vld [vmem:[#allocation3 + $0x160] sm:$0xff] }
0x1b90   :  { %4693 = vmatpush1.bf16.msra.mxu0 %v4692_v11  ;;  %v4722_v15 = vpack.c.bf16 %v3406_v12, %v3404_v61  ;;  %v3405_v19 = vld [vmem:[#allocation3 + $0x170] sm:$0xff]  ;;  %v3408_v23 = vld [vmem:[#allocation3 + $0x188] sm:$0xff]  ;;  %v3410_v26 = vld [vmem:[#allocation3 + $0x198] sm:$0xff] }
0x1b91   :  { %4695 = vmatprep.subr.bf16.mxu0 %v4694_v22  ;;  %v4724_v38 = vpack.c.bf16 %v3405_v19, %v3403_v17  ;;  %v4726_v29 = vpack.c.bf16 %v3410_v26, %v3408_v23  ;;  %v3407_v30 = vld [vmem:[#allocation3 + $0x180] sm:$0xff]  ;;  %v3409_v31 = vld [vmem:[#allocation3 + $0x190] sm:$0xff]  ;;  %v3412_v34 = vld [vmem:[#allocation3 + $0x1a8] sm:$0xff] }
0x1b92   :  { %v3414_v3 = vld [vmem:[#allocation3 + $0x1b8] sm:$0xff]  ;;  %v4728_v11 = vpack.c.bf16 %v3409_v31, %v3407_v30  ;;  %v3411_v45 = vld [vmem:[#allocation3 + $0x1a0] sm:$0xff]  ;;  %v3413_v40 = vld [vmem:[#allocation3 + $0x1b0] sm:$0xff] }
0x1b93   :  { %v4730_v22 = vpack.c.bf16 %v3414_v3, %v3412_v34  ;;  %v3416_v35 = vld [vmem:[#allocation3 + $0x1c8] sm:$0xff]  ;;  %v3418_v37 = vld [vmem:[#allocation3 + $0x1d8] sm:$0xff]  ;;  %v3415_v42 = vld [vmem:[#allocation3 + $0x1c0] sm:$0xff] }
0x1b94   :  { %4697 = vmatpush1.bf16.msra.mxu0 %v4696_v14  ;;  %v4732_v14 = vpack.c.bf16 %v3413_v40, %v3411_v45  ;;  %v3417_v21 = vld [vmem:[#allocation3 + $0x1d0] sm:$0xff]  ;;  %v3420_v44 = vld [vmem:[#allocation3 + $0x1e8] sm:$0xff]  ;;  %v3422_v46 = vld [vmem:[#allocation3 + $0x1f8] sm:$0xff] }
0x1b95   :  { %4699 = vmatprep.subr.bf16.mxu0 %v4698_v39  ;;  %v4734_v39 = vpack.c.bf16 %v3418_v37, %v3416_v35  ;;  %v3419_v50 = vld [vmem:[#allocation3 + $0x1e0] sm:$0xff]  ;;  %v3421_v51 = vld [vmem:[#allocation3 + $0x1f0] sm:$0xff]  ;;  %v3424_v63 = vld [vmem:[#allocation3 + $0x208] sm:$0xff] }
0x1b96   :  { %v3426_v53 = vld [vmem:[#allocation3 + $0x218] sm:$0xff]  ;;  %v3423_v59 = vld [vmem:[#allocation3 + $0x200] sm:$0xff]  ;;  %v3425_v54 = vld [vmem:[#allocation3 + $0x210] sm:$0xff] }
0x1b97   :  { %v3428_v60 = vld [vmem:[#allocation3 + $0x228] sm:$0xff]  ;;  %v3430_v16 = vld [vmem:[#allocation3 + $0x238] sm:$0xff]  ;;  %v3427_v52 = vld [vmem:[#allocation3 + $0x220] sm:$0xff] }
0x1b98   :  { %4701 = vmatpush1.bf16.msra.mxu0 %v4700_v28  ;;  %v4736_v28 = vpack.c.bf16 %v3417_v21, %v3415_v42  ;;  %v3429_v43 = vld [vmem:[#allocation3 + $0x230] sm:$0xff]  ;;  %v3432_v4 = vld [vmem:[#allocation3 + $0x248] sm:$0xff]  ;;  %v3434_v33 = vld [vmem:[#allocation3 + $0x258] sm:$0xff] }
0x1b99   :  { %4703 = vmatprep.subr.bf16.mxu0 %v4702_v48  ;;  %v4738_v48 = vpack.c.bf16 %v3422_v46, %v3420_v44  ;;  %v3431_v7 = vld [vmem:[#allocation3 + $0x240] sm:$0xff]  ;;  %v3433_v49 = vld [vmem:[#allocation3 + $0x250] sm:$0xff]  ;;  %v3436_v18 = vld [vmem:[#allocation3 + $0x268] sm:$0xff] }
0x1b9a   :  { %v3438_v8 = vld [vmem:[#allocation3 + $0x278] sm:$0xff]  ;;  %v3435_v10 = vld [vmem:[#allocation3 + $0x260] sm:$0xff]  ;;  %v3437_v47 = vld [vmem:[#allocation3 + $0x270] sm:$0xff] }
0x1b9b   :  { %v3440_v61 = vld [vmem:[#allocation3 + $0x288] sm:$0xff]  ;;  %v3442_v0 = vld [vmem:[#allocation3 + $0x298] sm:$0xff]  ;;  %v3439_v6 = vld [vmem:[#allocation3 + $0x280] sm:$0xff] }
0x1b9c   :  { %4705 = vmatpush1.bf16.msra.mxu0 %v4704_v57  ;;  %v4740_v57 = vpack.c.bf16 %v3421_v51, %v3419_v50  ;;  %v4758_v12 = vpack.c.bf16 %v3442_v0, %v3440_v61  ;;  %v3443_v23 = vld [vmem:[#allocation3 + $0x2a0] sm:$0xff]  ;;  %v3445_v26 = vld [vmem:[#allocation3 + $0x2b0] sm:$0xff] }
0x1b9d   :  { %4707 = vmatprep.subr.bf16.mxu0 %v4706_v58  ;;  %v4742_v58 = vpack.c.bf16 %v3426_v53, %v3424_v63  ;;  %v4764_v30 = vpack.c.bf16 %v3445_v26, %v3443_v23  ;;  %v3447_v34 = vld [vmem:[#allocation3 + $0x2c0] sm:$0xff]  ;;  %v3449_v3 = vld [vmem:[#allocation3 + $0x2d0] sm:$0xff] }
0x1b9e   :  { %v4768_v45 = vpack.c.bf16 %v3449_v3, %v3447_v34  ;;  %v3451_v35 = vld [vmem:[#allocation3 + $0x2e0] sm:$0xff]  ;;  %v3453_v37 = vld [vmem:[#allocation3 + $0x2f0] sm:$0xff]  ;;  %v3736_v34 = vld [vmem:[%s5985_s14 + $0x88] sm:$0xff] }
0x1b9f   :  { %v4772_v42 = vpack.c.bf16 %v3453_v37, %v3451_v35  ;;  %v3455_v44 = vld [vmem:[#allocation3 + $0x300] sm:$0xff]  ;;  %v3457_v46 = vld [vmem:[#allocation3 + $0x310] sm:$0xff]  ;;  %v3722_v37 = vld [vmem:[%s5985_s14 + $0x18] sm:$0xff] }
0x1ba0   :  { %4709 = vmatpush1.bf16.msra.mxu0 %v4708_v1  ;;  %v4744_v1 = vpack.c.bf16 %v3425_v54, %v3423_v59  ;;  %v4776_v50 = vpack.c.bf16 %v3457_v46, %v3455_v44  ;;  %v3459_v63 = vld [vmem:[#allocation3 + $0x320] sm:$0xff]  ;;  %v3461_v53 = vld [vmem:[#allocation3 + $0x330] sm:$0xff]  ;;  %v3724_v46 = vld [vmem:[%s5985_s14 + $0x28] sm:$0xff] }
0x1ba1   :  { %4711 = vmatprep.subr.bf16.mxu0 %v4710_v5  ;;  %v4746_v5 = vpack.c.bf16 %v3430_v16, %v3428_v60  ;;  %v4780_v59 = vpack.c.bf16 %v3461_v53, %v3459_v63  ;;  %v3463_v60 = vld [vmem:[#allocation3 + $0x340] sm:$0xff]  ;;  %v3465_v16 = vld [vmem:[#allocation3 + $0x350] sm:$0xff]  ;;  %v3726_v53 = vld [vmem:[%s5985_s14 + $0x38] sm:$0xff] }
0x1ba2   :  { %v3475_v61 = vld [vmem:[#allocation3 + $0x3a0] sm:$0xff]  ;;  %v3477_v0 = vld [vmem:[#allocation3 + $0x3b0] sm:$0xff] }
0x1ba3   :  { %v3737_v62 = vld [vmem:[%s5985_s14 + $0x90] sm:$0xff]  ;;  %v3723_v44 = vld [vmem:[%s5985_s14 + $0x20] sm:$0xff] }
0x1ba4   :  { %4713 = vmatpush1.bf16.msra.mxu0 %v4712_v56  ;;  %v4748_v56 = vpack.c.bf16 %v3429_v43, %v3427_v52  ;;  %v4784_v52 = vpack.c.bf16 %v3465_v16, %v3463_v60  ;;  %v3721_v35 = vld [vmem:[%s5985_s14 + $0x10] sm:$0xff]  ;;  %v3727_v60 = vld [vmem:[%s5985_s14 + $0x40] sm:$0xff]  ;;  %v3728_v16 = vld [vmem:[%s5985_s14 + $0x48] sm:$0xff] }
0x1ba5   :  { %4715 = vmatprep.subr.bf16.mxu0 %v4714_v27  ;;  %v4750_v27 = vpack.c.bf16 %v3434_v33, %v3432_v4  ;;  %v3467_v4 = vld [vmem:[#allocation3 + $0x360] sm:$0xff]  ;;  %v3469_v33 = vld [vmem:[#allocation3 + $0x370] sm:$0xff] }
0x1ba6   :  { %v3725_v63 = vld [vmem:[%s5985_s14 + $0x30] sm:$0xff] }
0x1ba8   :  { %4717 = vmatpush1.bf16.msra.mxu0 %v4716_v41  ;;  %v4752_v41 = vpack.c.bf16 %v3433_v49, %v3431_v7  ;;  %v4788_v7 = vpack.c.bf16 %v3469_v33, %v3467_v4  ;;  %v3729_v4 = vld [vmem:[%s5985_s14 + $0x50] sm:$0xff]  ;;  %v3730_v33 = vld [vmem:[%s5985_s14 + $0x58] sm:$0xff] }
0x1ba9   :  { %4719 = vmatprep.subr.bf16.mxu0 %v4718_v9  ;;  %v4754_v9 = vpack.c.bf16 %v3438_v8, %v3436_v18  ;;  %v3471_v18 = vld [vmem:[#allocation3 + $0x380] sm:$0xff]  ;;  %v3473_v8 = vld [vmem:[#allocation3 + $0x390] sm:$0xff] }
0x1bac   :  { %4721 = vmatpush1.bf16.msra.mxu0 %v4720_v13  ;;  %v3444_v13 = vld [vmem:[#allocation3 + $0x2a8] sm:$0xff] }
0x1bad   :  { %4723 = vmatprep.subr.bf16.mxu0 %v4722_v15  ;;  %v3446_v15 = vld [vmem:[#allocation3 + $0x2b8] sm:$0xff] }
0x1bae   :  { %v4762_v19 = vpack.c.bf16 %v3446_v15, %v3444_v13  ;;  %v3479_v13 = vld [vmem:[#allocation3 + $0x3c0] sm:$0xff]  ;;  %v3481_v15 = vld [vmem:[#allocation3 + $0x3d0] sm:$0xff] }
0x1baf   :  { %v4800_v23 = vpack.c.bf16 %v3481_v15, %v3479_v13 }
0x1bb0   :  { %4725 = vmatpush1.bf16.msra.mxu0 %v4724_v38  ;;  %v3448_v38 = vld [vmem:[#allocation3 + $0x2c8] sm:$0xff] }
0x1bb1   :  { %4727 = vmatprep.subr.bf16.mxu0 %v4726_v29  ;;  %v3450_v29 = vld [vmem:[#allocation3 + $0x2d8] sm:$0xff] }
0x1bb2   :  { %v4766_v31 = vpack.c.bf16 %v3450_v29, %v3448_v38  ;;  %v3483_v38 = vld [vmem:[#allocation3 + $0x3e0] sm:$0xff]  ;;  %v3485_v29 = vld [vmem:[#allocation3 + $0x3f0] sm:$0xff] }
0x1bb4   :  { %4729 = vmatpush1.bf16.msra.mxu0 %v4728_v11  ;;  %v3452_v11 = vld [vmem:[#allocation3 + $0x2e8] sm:$0xff] }
0x1bb5   :  { %4731 = vmatprep.subr.bf16.mxu0 %v4730_v22  ;;  %v3454_v22 = vld [vmem:[#allocation3 + $0x2f8] sm:$0xff] }
0x1bb6   :  { %v4770_v40 = vpack.c.bf16 %v3454_v22, %v3452_v11  ;;  %v3719_v11 = vld [vmem:[%s5985_s14] sm:$0xff]  ;;  %v3720_v22 = vld [vmem:[%s5985_s14 + $0x8] sm:$0xff] }
0x1bb8   :  { %4733 = vmatpush1.bf16.msra.mxu0 %v4732_v14  ;;  %v3456_v14 = vld [vmem:[#allocation3 + $0x308] sm:$0xff] }
0x1bb9   :  { %4735 = vmatprep.subr.bf16.mxu0 %v4734_v39  ;;  %v3458_v39 = vld [vmem:[#allocation3 + $0x318] sm:$0xff] }
0x1bba   :  { %v4774_v21 = vpack.c.bf16 %v3458_v39, %v3456_v14  ;;  %v4812_v14 = vpack.c.bf16 %v3722_v37, %v3721_v35  ;;  %v3739_v39 = vld [vmem:[%s5985_s14 + $0xa0] sm:$0xff] }
0x1bbc   :  { %4737 = vmatpush1.bf16.msra.mxu0 %v4736_v28  ;;  %v3460_v28 = vld [vmem:[#allocation3 + $0x328] sm:$0xff] }
0x1bbd   :  { %4739 = vmatprep.subr.bf16.mxu0 %v4738_v48  ;;  %v3462_v48 = vld [vmem:[#allocation3 + $0x338] sm:$0xff] }
0x1bbe   :  { %v4778_v51 = vpack.c.bf16 %v3462_v48, %v3460_v28  ;;  %v4816_v28 = vpack.c.bf16 %v3724_v46, %v3723_v44  ;;  %v3741_v48 = vld [vmem:[%s5985_s14 + $0xb0] sm:$0xff] }
0x1bc0   :  { %4741 = vmatpush1.bf16.msra.mxu0 %v4740_v57  ;;  %v3464_v57 = vld [vmem:[#allocation3 + $0x348] sm:$0xff] }
0x1bc1   :  { %4743 = vmatprep.subr.bf16.mxu0 %v4742_v58  ;;  %v3466_v58 = vld [vmem:[#allocation3 + $0x358] sm:$0xff] }
0x1bc2   :  { %v4782_v54 = vpack.c.bf16 %v3466_v58, %v3464_v57  ;;  %v4820_v57 = vpack.c.bf16 %v3726_v53, %v3725_v63  ;;  %v3743_v58 = vld [vmem:[%s5985_s14 + $0xc0] sm:$0xff] }
0x1bc3   :  { %3564 = vmatmul.mubr.f32.vlgmr.msra.gmra.mrb[12].mxu0 %v3351_v20  ;;  %v4756_v20 = vpack.c.bf16 %v3437_v47, %v3435_v10  ;;  %v4792_v10 = vpack.c.bf16 %v3473_v8, %v3471_v18  ;;  %v3731_v18 = vld [vmem:[%s5985_s14 + $0x60] sm:$0xff]  ;;  %v3732_v8 = vld [vmem:[%s5985_s14 + $0x68] sm:$0xff] }
0x1bc4   :  { %4745 = vmatpush1.bf16.msra.mxu0 %v4744_v1  ;;  %3634 = vmatprep.mubr.f32.mxu0 %v3354_v25  ;;  %v3441_v25 = vld [vmem:[#allocation3 + $0x290] sm:$0xff]  ;;  %v3468_v1 = vld [vmem:[#allocation3 + $0x368] sm:$0xff] }
0x1bc5   :  { %4747 = vmatprep.subr.bf16.mxu0 %v4746_v5  ;;  %v4760_v17 = vpack.c.bf16 %v3441_v25, %v3439_v6  ;;  %v3470_v5 = vld [vmem:[#allocation3 + $0x378] sm:$0xff]  ;;  %v4796_v6 = vpack.c.bf16 %v3477_v0, %v3475_v61 }
0x1bc6   :  { %v4786_v43 = vpack.c.bf16 %v3470_v5, %v3468_v1  ;;  %v4824_v1 = vpack.c.bf16 %v3728_v16, %v3727_v60  ;;  %v3745_v5 = vld [vmem:[%s5985_s14 + $0xd0] sm:$0xff]  ;;  %v3734_v61 = vld [vmem:[%s5985_s14 + $0x78] sm:$0xff] }
0x1bc8   :  { %4749 = vmatpush1.bf16.msra.mxu0 %v4748_v56  ;;  %v3472_v56 = vld [vmem:[#allocation3 + $0x388] sm:$0xff] }
0x1bc9   :  { %4751 = vmatprep.subr.bf16.mxu0 %v4750_v27  ;;  %v3474_v27 = vld [vmem:[#allocation3 + $0x398] sm:$0xff] }
0x1bca   :  { %v4790_v49 = vpack.c.bf16 %v3474_v27, %v3472_v56  ;;  %v4828_v56 = vpack.c.bf16 %v3730_v33, %v3729_v4  ;;  %v3747_v27 = vld [vmem:[%s5985_s14 + $0xe0] sm:$0xff] }
0x1bcc   :  { %4753 = vmatpush1.bf16.msra.mxu0 %v4752_v41  ;;  %v3476_v41 = vld [vmem:[#allocation3 + $0x3a8] sm:$0xff] }
0x1bcd   :  { %4755 = vmatprep.subr.bf16.mxu0 %v4754_v9  ;;  %v3478_v9 = vld [vmem:[#allocation3 + $0x3b8] sm:$0xff] }
0x1bce   :  { %v4794_v47 = vpack.c.bf16 %v3478_v9, %v3476_v41  ;;  %v3749_v41 = vld [vmem:[%s5985_s14 + $0xf0] sm:$0xff]  ;;  %v4832_v9 = vpack.c.bf16 %v3732_v8, %v3731_v18 }
0x1bd0   :  { %4757 = vmatpush1.bf16.msra.mxu0 %v4756_v20  ;;  %v3480_v20 = vld [vmem:[#allocation3 + $0x3c8] sm:$0xff] }
0x1bd1   :  { %4759 = vmatprep.subr.bf16.mxu0 %v4758_v12  ;;  %v3482_v12 = vld [vmem:[#allocation3 + $0x3d8] sm:$0xff] }
0x1bd2   :  { %v4798_v25 = vpack.c.bf16 %v3482_v12, %v3480_v20  ;;  %v3487_v12 = vld [vmem:[%s5982_s11] sm:$0x3] }
0x1bd4   :  { %4761 = vmatpush1.bf16.msra.mxu0 %v4760_v17  ;;  %v3484_v17 = vld [vmem:[#allocation3 + $0x3e8] sm:$0xff] }
0x1bd5   :  { %4763 = vmatprep.subr.bf16.mxu0 %v4762_v19  ;;  %v3486_v19 = vld [vmem:[#allocation3 + $0x3f8] sm:$0xff] }
0x1bd6   :  { %v4802_v26 = vpack.c.bf16 %v3486_v19, %v3484_v17 }
0x1bd8   :  { %4765 = vmatpush1.bf16.msra.mxu0 %v4764_v30  ;;  %v4804_v30 = vpack.c.bf16 %v3485_v29, %v3483_v38 }
0x1bd9   :  { %4767 = vmatprep.subr.bf16.mxu0 %v4766_v31  ;;  %v3735_v31 = vld [vmem:[%s5985_s14 + $0x80] sm:$0xff] }
0x1bda   :  { %v4806_v3 = vpack.c.bf16 %v3736_v34, %v3735_v31 }
0x1bdc   :  { %4769 = vmatpush1.bf16.msra.mxu0 %v4768_v45  ;;  %v4808_v45 = vpack.c.bf16 %v3720_v22, %v3719_v11  ;;  %4807 = vmatprep.subr.bf16.mxu1 %v4806_v3 }
0x1bdd   :  { %4771 = vmatprep.subr.bf16.mxu0 %v4770_v40 }
0x1bde   :  { %4809 = vmatpush3.bf16.msra.mxu1 %v4808_v45 }
0x1be0   :  { %4773 = vmatpush1.bf16.msra.mxu0 %v4772_v42  ;;  %v3740_v42 = vld [vmem:[%s5985_s14 + $0xa8] sm:$0xff] }
0x1be1   :  { %4775 = vmatprep.subr.bf16.mxu0 %v4774_v21  ;;  %v4814_v21 = vpack.c.bf16 %v3740_v42, %v3739_v39 }
0x1be4   :  { %4777 = vmatpush1.bf16.msra.mxu0 %v4776_v50  ;;  %v3742_v50 = vld [vmem:[%s5985_s14 + $0xb8] sm:$0xff] }
0x1be5   :  { %4779 = vmatprep.subr.bf16.mxu0 %v4778_v51  ;;  %v4818_v51 = vpack.c.bf16 %v3742_v50, %v3741_v48 }
0x1be8   :  { %4781 = vmatpush1.bf16.msra.mxu0 %v4780_v59  ;;  %v3744_v59 = vld [vmem:[%s5985_s14 + $0xc8] sm:$0xff] }
0x1be9   :  { %4783 = vmatprep.subr.bf16.mxu0 %v4782_v54  ;;  %v4822_v54 = vpack.c.bf16 %v3744_v59, %v3743_v58 }
0x1bec   :  { %4785 = vmatpush1.bf16.msra.mxu0 %v4784_v52  ;;  %v3746_v52 = vld [vmem:[%s5985_s14 + $0xd8] sm:$0xff] }
0x1bed   :  { %4787 = vmatprep.subr.bf16.mxu0 %v4786_v43  ;;  %v4826_v43 = vpack.c.bf16 %v3746_v52, %v3745_v5 }
0x1bf0   :  { %4789 = vmatpush1.bf16.msra.mxu0 %v4788_v7  ;;  %v3748_v7 = vld [vmem:[%s5985_s14 + $0xe8] sm:$0xff] }
0x1bf1   :  { %4791 = vmatprep.subr.bf16.mxu0 %v4790_v49  ;;  %v4830_v49 = vpack.c.bf16 %v3748_v7, %v3747_v27  ;;  %v3689_v7 = vld [vmem:[%s5983_s12] sm:$0x3] }
0x1bf2   :  { %v3694_v8 = vrot.slane %v3689_v7, %v5670_v2 }
0x1bf4   :  { %4793 = vmatpush1.bf16.msra.mxu0 %v4792_v10  ;;  %v3750_v10 = vld [vmem:[%s5985_s14 + $0xf8] sm:$0xff] }
0x1bf5   :  { %4795 = vmatprep.subr.bf16.mxu0 %v4794_v47  ;;  %v3733_v47 = vld [vmem:[%s5985_s14 + $0x70] sm:$0xff]  ;;  %v4834_v0 = vpack.c.bf16 %v3750_v10, %v3749_v41  ;;  %v3698_v10 = vrot.slane %v3689_v7, %v5677_v55 }
0x1bf6   :  { %v4836_v20 = vpack.c.bf16 %v3734_v61, %v3733_v47 }
0x1bf8   :  { %4797 = vmatpush1.bf16.msra.mxu0 %v4796_v6  ;;  %v3492_v6 = vrot.slane %v3487_v12, %v5670_v2 }
0x1bf9   :  { %4799 = vmatprep.subr.bf16.mxu0 %v4798_v25  ;;  %v3496_v25 = vrot.slane %v3487_v12, %v5677_v55 }
0x1bfc   :  { %4801 = vmatpush1.bf16.msra.mxu0 %v4800_v23 }
0x1bfd   :  { %4803 = vmatprep.subr.bf16.mxu0 %v4802_v26 }
0x1c00   :  { %4805 = vmatpush1.bf16.msra.mxu0 %v4804_v30 }
0x1c03   :  { %3635 = vmatmul.mubr.f32.vlgmr.msra.gmra.mrb[12].mxu0 %v3353_v32  ;;  %v3738_v32 = vld [vmem:[%s5985_s14 + $0x98] sm:$0xff] }
0x1c04   :  { %v4810_v40 = vpack.c.bf16 %v3738_v32, %v3737_v62 }
0x1c06   :  { %4811 = vmatprep.subr.bf16.mxu1 %v4810_v40 }
0x1c07   :  { %4813 = vmatpush3.bf16.msra.mxu1 %v4812_v14 }
0x1c08   :  { %4815 = vmatprep.subr.bf16.mxu1 %v4814_v21 }
0x1c0b   :  { %4817 = vmatpush3.bf16.msra.mxu1 %v4816_v28 }
0x1c0c   :  { %4819 = vmatprep.subr.bf16.mxu1 %v4818_v51 }
0x1c0f   :  { %4821 = vmatpush3.bf16.msra.mxu1 %v4820_v57 }
0x1c10   :  { %4823 = vmatprep.subr.bf16.mxu1 %v4822_v54 }
0x1c13   :  { %4825 = vmatpush3.bf16.msra.mxu1 %v4824_v1 }
0x1c14   :  { %4827 = vmatprep.subr.bf16.mxu1 %v4826_v43 }
0x1c17   :  { %4829 = vmatpush3.bf16.msra.mxu1 %v4828_v56 }
0x1c18   :  { %4831 = vmatprep.subr.bf16.mxu1 %v4830_v49  ;;  %v3703_v49 = vld [vmem:[%s5984_s13] sm:$0x3] }
0x1c19   :  { %v3712_v12 = vrot.slane %v3703_v49, %v5677_v55 }
0x1c1b   :  { %4833 = vmatpush3.bf16.msra.mxu1 %v4832_v9 }
0x1c1c   :  { %4835 = vmatprep.subr.bf16.mxu1 %v4834_v0  ;;  %v3708_v0 = vrot.slane %v3703_v49, %v5670_v2  ;;  %v3870_v2 = vld [vmem:[%s5989_s18 + $0x8] sm:$0xff] }
0x1c1f   :  { %4837 = vmatpush3.bf16.msra.mxu1 %v4836_v20 }
0x1c20   :  { %4838 = vmatprep.subr.bf16.mxu1 %v5127_v36 }
0x1cd6   :  { %v3636_v13 = vpop.f32.mrb[12].mxu0 }
0x1cd7   :  { %v4868_v15 = vadd.f32 %v3636_v13, %v3492_v6  ;;  %v3638_v17 = vpop.f32.mrb[13].mxu0 }
0x1cd8   :  { %v4869_v19 = vadd.f32 %v3638_v17, %v3496_v25 }
0x1cd9   :  { %v3641_v23 = vsel %vm3202_vm4, %v4868_v15, 0.0  ;;  %v3657_v26 = vmul.f32 %v4868_v15, %v4868_v15 }
0x1cda   :  { %v3642_v38 = vrot.slane %v3641_v23, 4  ;;  %v3648_v29 = vsel %vm3202_vm4, %v4869_v19, 0.0  ;;  %v3658_v30 = vmul.f32 %v4869_v19, %v4869_v19 }
0x1cdb   :  { %v3659_v31 = vsel %vm3202_vm4, %v3657_v26, 0.0  ;;  %v3649_v34 = vrot.slane %v3648_v29, 4 }
0x1cdc   :  { %v3643_v3 = vadd.f32 %v3642_v38, %v3641_v23  ;;  %v3660_v11 = vrot.slane %v3659_v31, 4  ;;  %v3666_v22 = vsel %vm3202_vm4, %v3658_v30, 0.0  ;;  %v3872_v38 = vld [vmem:[%s5989_s18 + $0x18] sm:$0xff]  ;;  %v3873_v30 = vld [vmem:[%s5989_s18 + $0x20] sm:$0xff] }
0x1cdd   :  { %v3650_v45 = vadd.f32 %v3649_v34, %v3648_v29  ;;  %v3667_v62 = vrot.slane %v3666_v22, 4 }
0x1cde   :  { %v3644_v32 = vrot.slane %v3643_v3, 2  ;;  %v3661_v40 = vadd.f32 %v3660_v11, %v3659_v31  ;;  %v3874_v31 = vld [vmem:[%s5989_s18 + $0x28] sm:$0xff]  ;;  %v3876_v11 = vld [vmem:[%s5989_s18 + $0x38] sm:$0xff] }
0x1cdf   :  { %v3651_v35 = vrot.slane %v3650_v45, 2  ;;  %v3668_v37 = vadd.f32 %v3667_v62, %v3666_v22  ;;  %v4845_v34 = vpack.c.bf16 %v3874_v31, %v3873_v30  ;;  %v3878_v62 = vld [vmem:[%s5989_s18 + $0x48] sm:$0xff] }
0x1ce0   :  { %v3645_v14 = vadd.f32 %v3644_v32, %v3643_v3  ;;  %v3662_v39 = vrot.slane %v3661_v40, 2  ;;  %v3875_v3 = vld [vmem:[%s5989_s18 + $0x30] sm:$0xff] }
0x1ce1   :  { %v3652_v42 = vadd.f32 %v3651_v35, %v3650_v45  ;;  %v3669_v21 = vrot.slane %v3668_v37, 2  ;;  %v4848_v22 = vpack.c.bf16 %v3876_v11, %v3875_v3  ;;  %v3877_v45 = vld [vmem:[%s5989_s18 + $0x40] sm:$0xff]  ;;  %v3880_v35 = vld [vmem:[%s5989_s18 + $0x58] sm:$0xff] }
0x1ce2   :  { %v3646_v44 = vrot.slane %v3645_v14, 1  ;;  %v3663_v46 = vadd.f32 %v3662_v39, %v3661_v40  ;;  %v4851_v32 = vpack.c.bf16 %v3878_v62, %v3877_v45  ;;  %v3879_v40 = vld [vmem:[%s5989_s18 + $0x50] sm:$0xff]  ;;  %v3882_v39 = vld [vmem:[%s5989_s18 + $0x68] sm:$0xff] }
0x1ce3   :  { %v3653_v28 = vrot.slane %v3652_v42, 1  ;;  %v3670_v48 = vadd.f32 %v3669_v21, %v3668_v37  ;;  %v4854_v37 = vpack.c.bf16 %v3880_v35, %v3879_v40  ;;  %v3883_v21 = vld [vmem:[%s5989_s18 + $0x70] sm:$0xff] }
0x1ce4   :  { %v3647_v50 = vadd.f32 %v3646_v44, %v3645_v14  ;;  %v3664_v51 = vrot.slane %v3663_v46, 1  ;;  %v3881_v14 = vld [vmem:[%s5989_s18 + $0x60] sm:$0xff]  ;;  %v3884_v44 = vld [vmem:[%s5989_s18 + $0x78] sm:$0xff] }
0x1ce5   :  { %v3654_v63 = vadd.f32 %v3653_v28, %v3652_v42  ;;  %v3671_v53 = vrot.slane %v3670_v48, 1  ;;  %v4857_v42 = vpack.c.bf16 %v3882_v39, %v3881_v14 }
0x1ce6   :  { %v3655_v57 = vmul.f32 0.5, %v3647_v50  ;;  %v3665_v58 = vadd.f32 %v3664_v51, %v3663_v46  ;;  %v4860_v46 = vpack.c.bf16 %v3884_v44, %v3883_v21 }
0x1ce7   :  { %v3656_v59 = vmul.f32 0.5, %v3654_v63  ;;  %v3672_v54 = vadd.f32 %v3671_v53, %v3670_v48  ;;  %v4174_v48 = vld [vmem:[%s5986_s15] ss:$0 sm:$0xff] }
0x1ce8   :  { %v3673_v60 = vmul.f32 0.5, %v3665_v58  ;;  %v3675_v16 = vmul.f32 %v3655_v57, %v3655_v57  ;;  %v3681_v18 = vsub.f32 %v4868_v15, %v3655_v57  ;;  %v3869_v15 = vld [vmem:[%s5989_s18] sm:$0xff] }
0x1ce9   :  { %v3674_v1 = vmul.f32 0.5, %v3672_v54  ;;  %v3676_v5 = vmul.f32 %v3656_v59, %v3656_v59  ;;  %v3682_v9 = vsub.f32 %v4869_v19, %v3656_v59  ;;  %v4839_v55 = vpack.c.bf16 %v3870_v2, %v3869_v15  ;;  %v3871_v19 = vld [vmem:[%s5989_s18 + $0x10] sm:$0xff]  ;;  %v4177_v2 = vld [vmem:[%s5990_s19] ss:$0 sm:$0xff] }
0x1cea   :  { %v3677_v52 = vsub.f32 %v3673_v60, %v3675_v16  ;;  %v4842_v29 = vpack.c.bf16 %v3872_v38, %v3871_v19 }
0x1ceb   :  { %v3678_v43 = vsub.f32 %v3674_v1, %v3676_v5 }
0x1cec   :  { %v3679_v4 = vmax.f32 %v3677_v52, 0.0 }
0x1ced   :  { %v3680_v33 = vmax.f32 %v3678_v43, 0.0 }
0x1cee   :  { %v3683_v56 = vadd.f32 1e-05, %v3679_v4 }
0x1cef   :  { %v3684_v27 = vadd.f32 1e-05, %v3680_v33 }
0x1cf0   :  { %5044 = vrsqrt.f32 %v3683_v56 }
0x1cf1   :  { %5046 = vrsqrt.f32 %v3684_v27 }
0x1cfa   :  { %v5045_v41 = vpop.eup %5044 }
0x1cfb   :  { %v5047_v47 = vpop.eup %5046  ;;  %v3687_v61 = vmul.f32 %v5045_v41, %v3681_v18 }
0x1cfc   :  { %v3688_v20 = vmul.f32 %v5047_v47, %v3682_v9 }
0x1cfd   :  { %v3701_v6 = vmul.f32 %v3694_v8, %v3687_v61  ;;  %v4175_v61 = vld [vmem:[%s5987_s16] ss:$0 sm:$0xff] }
0x1cfe   :  { %v3702_v25 = vmul.f32 %v3698_v10, %v3688_v20  ;;  %v4176_v20 = vld [vmem:[%s5988_s17] ss:$0 sm:$0xff] }
0x1cff   :  { %v3715_v13 = vadd.f32 %v3708_v0, %v3701_v6 }
0x1d00   :  { %v3716_v17 = vadd.f32 %v3712_v12, %v3702_v25 }
0x1d01   :  { %v3717_v26 = vmax.f32 %v3715_v13, 0.0  ;;  %v4004_v13 = vld [vmem:[%s5993_s22] sm:$0xff] }
0x1d02   :  { %v3718_v23 = vmax.f32 %v3716_v17, 0.0  ;;  %v4005_v17 = vld [vmem:[%s5993_s22 + $0x8] sm:$0xff] }
0x1d04   :  { %3822 = vmatprep.mubr.f32.mxu1 %v3718_v23  ;;  %v4863_v23 = vpack.c.bf16 %v4005_v17, %v4004_v13 }
0x1d05   :  { %3823 = vmatmul.mubr.f32.vlgmr.msra.gmra.mrb[32].mxu1 %v3717_v26  ;;  %v4006_v26 = vld [vmem:[%s5993_s22 + $0x10] sm:$0xff] }
0x1d06   :  { %4424 = vmatprep.mubr.msk.f32.mxu1 %vm5128_vm3, %v5126_v24  ;;  %4840 = vmatpush3.bf16.msra.mxu1 %v4839_v55 }
0x1d07   :  { %4841 = vmatprep.subr.bf16.mxu1 %v5127_v36 }
0x1d0a   :  { %4843 = vmatpush3.bf16.msra.mxu1 %v4842_v29 }
0x1d0b   :  { %4844 = vmatprep.subr.bf16.mxu1 %v5127_v36 }
0x1d0e   :  { %4846 = vmatpush3.bf16.msra.mxu1 %v4845_v34 }
0x1d0f   :  { %4847 = vmatprep.subr.bf16.mxu1 %v5127_v36 }
0x1d12   :  { %4849 = vmatpush3.bf16.msra.mxu1 %v4848_v22 }
0x1d13   :  { %4850 = vmatprep.subr.bf16.mxu1 %v5127_v36 }
0x1d16   :  { %4852 = vmatpush3.bf16.msra.mxu1 %v4851_v32 }
0x1d17   :  { %4853 = vmatprep.subr.bf16.mxu1 %v5127_v36 }
0x1d1a   :  { %4855 = vmatpush3.bf16.msra.mxu1 %v4854_v37 }
0x1d1b   :  { %4856 = vmatprep.subr.bf16.mxu1 %v5127_v36 }
0x1d1e   :  { %4858 = vmatpush3.bf16.msra.mxu1 %v4857_v42 }
0x1d1f   :  { %4859 = vmatprep.subr.bf16.mxu1 %v5127_v36 }
0x1d22   :  { %4861 = vmatpush3.bf16.msra.mxu1 %v4860_v46 }
0x1d23   :  { %4862 = vmatprep.subr.bf16.mxu1 %v5127_v36 }
0x1dd8   :  { %v4265_v28 = vpop.f32.mrb[32].mxu1 }
0x1dd9   :  { %v4266_v50 = vpop.f32.mrb[33].mxu1 }
0x1dda   :  { %v4267_v51 = vadd.f32 %v4266_v50, %v4265_v28 }
0x1ddc   :  { %v3825_v63 = vadd.f32 %v4267_v51, %v4174_v48  ;;  %v4178_v51 = vld [vmem:[%s5991_s20] ss:$0 sm:$0xff]  ;;  %s5096_s20 = scalar_lea.vmem %s4097_s27, 32 }
0x1ddd   :  { %p5097_p2 = scmp.ne.s32.totalorder %s4097_s27, %s5096_s20  ;;  %p5102_p4 = scmp.lt.s32.totalorder %s5096_s20, %s5096_s20 }
0x1dde   :  { %v3828_v53 = vsel %vm3202_vm4, %v3825_v63, 0.0  ;;  %v3836_v57 = vmul.f32 %v3825_v63, %v3825_v63 }
0x1ddf   :  { %v3829_v58 = vrot.slane %v3828_v53, 4  ;;  %p5103_p5 = por %p5102_p4, %p5101_p3 }
0x1de0   :  { %v3837_v59 = vsel %vm3202_vm4, %v3836_v57, 0.0 }
0x1de1   :  { %v3830_v54 = vadd.f32 %v3829_v58, %v3828_v53  ;;  %v3838_v60 = vrot.slane %v3837_v59, 4  ;;  %v4179_v53 = vld [vmem:[%s5992_s21] ss:$0 sm:$0xff]  ;;  %p5104_p6 = pnand %p5103_p5, %p5097_p2 }
0x1de3   :  { %v3831_v16 = vrot.slane %v3830_v54, 2  ;;  %v3839_v1 = vadd.f32 %v3838_v60, %v3837_v59 }
0x1de5   :  { %v3832_v5 = vadd.f32 %v3831_v16, %v3830_v54  ;;  %v3840_v52 = vrot.slane %v3839_v1, 2  ;;  %v4180_v54 = vld [vmem:[%s5994_s23] ss:$0 sm:$0xff] }
0x1de7   :  { %v3833_v43 = vrot.slane %v3832_v5, 1  ;;  %v3841_v4 = vadd.f32 %v3840_v52, %v3839_v1 }
0x1de9   :  { %v3834_v33 = vadd.f32 %v3833_v43, %v3832_v5  ;;  %v3842_v56 = vrot.slane %v3841_v4, 1 }
0x1deb   :  { %v3835_v27 = vmul.f32 0.5, %v3834_v33  ;;  %v3843_v7 = vadd.f32 %v3842_v56, %v3841_v4 }
0x1ded   :  { %v3844_v49 = vmul.f32 0.5, %v3843_v7  ;;  %v3845_v18 = vmul.f32 %v3835_v27, %v3835_v27  ;;  %v3848_v10 = vsub.f32 %v3825_v63, %v3835_v27 }
0x1def   :  { %v3846_v8 = vsub.f32 %v3844_v49, %v3845_v18 }
0x1df1   :  { %v3847_v41 = vmax.f32 %v3846_v8, 0.0 }
0x1df3   :  { %v3849_v9 = vadd.f32 1e-05, %v3847_v41 }
0x1df5   :  { %5048 = vrsqrt.f32 %v3849_v9 }
0x1dff   :  { %v5049_v47 = vpop.eup %5048 }
0x1e00   :  { %v3851_v0 = vmul.f32 %v5049_v47, %v3848_v10 }
0x1e02   :  { %v3859_v12 = vmul.f32 %v4175_v61, %v3851_v0 }
0x1e04   :  { %v3867_v6 = vadd.f32 %v4176_v20, %v3859_v12 }
0x1e06   :  { %v3868_v25 = vmax.f32 %v3867_v6, 0.0 }
0x1e08   :  { %4425 = vmatmul.mubr.f32.vlgmr.msra.gmra.mrb[34].mxu1 %v3868_v25 }
0x1e09   :  { %4435 = vmatprep.mubr.msk.f32.mxu1 %vm5128_vm3, %v5126_v24  ;;  %4864 = vmatpush3.bf16.msra.mxu1 %v4863_v23  ;;  %v4007_v24 = vld [vmem:[%s5993_s22 + $0x18] sm:$0xff] }
0x1e0a   :  { %4865 = vmatprep.subr.bf16.mxu1 %v5127_v36  ;;  %v4866_v15 = vpack.c.bf16 %v4007_v24, %v4006_v26 }
0x1e0d   :  { %4867 = vmatpush3.bf16.msra.mxu1 %v4866_v15 }
0x1edb   :  { %v3958_v55 = vpop.f32.mrb[34].mxu1 }
0x1edc   :  { %v3959_v19 = vadd.f32 %v4177_v2, %v3958_v55  ;;  %v4426_v38 = vpop.f32.mrb[35].mxu1 }
0x1ede   :  { %v3963_v29 = vsel %vm3962_vm5, %v3959_v19, 0.0  ;;  %v3971_v36 = vmul.f32 %v3959_v19, %v3959_v19 }
0x1edf   :  { %v3964_v30 = vrot.slane %v3963_v29, 4 }
0x1ee0   :  { %v3972_v31 = vsel %vm3962_vm5, %v3971_v36, 0.0 }
0x1ee1   :  { %v3965_v34 = vadd.f32 %v3964_v30, %v3963_v29  ;;  %v3973_v3 = vrot.slane %v3972_v31, 4 }
0x1ee3   :  { %v3966_v11 = vrot.slane %v3965_v34, 2  ;;  %v3974_v22 = vadd.f32 %v3973_v3, %v3972_v31 }
0x1ee5   :  { %v3967_v45 = vadd.f32 %v3966_v11, %v3965_v34  ;;  %v3975_v62 = vrot.slane %v3974_v22, 2 }
0x1ee7   :  { %v3968_v32 = vrot.slane %v3967_v45, 1  ;;  %v3976_v40 = vadd.f32 %v3975_v62, %v3974_v22 }
0x1ee9   :  { %v3969_v35 = vadd.f32 %v3968_v32, %v3967_v45  ;;  %v3977_v37 = vrot.slane %v3976_v40, 1 }
0x1eeb   :  { %v3970_v14 = vmul.f32 0.5, %v3969_v35  ;;  %v3978_v39 = vadd.f32 %v3977_v37, %v3976_v40 }
0x1eed   :  { %v3979_v42 = vmul.f32 0.5, %v3978_v39  ;;  %v3980_v21 = vmul.f32 %v3970_v14, %v3970_v14  ;;  %v3983_v48 = vsub.f32 %v3959_v19, %v3970_v14 }
0x1eef   :  { %v3981_v44 = vsub.f32 %v3979_v42, %v3980_v21 }
0x1ef1   :  { %v3982_v46 = vmax.f32 %v3981_v44, 0.0 }
0x1ef3   :  { %v3984_v28 = vadd.f32 1e-05, %v3982_v46 }
0x1ef5   :  { %5050 = vrsqrt.f32 %v3984_v28 }
0x1eff   :  { %v5051_v50 = vpop.eup %5050 }
0x1f00   :  { %v3986_v63 = vmul.f32 %v5051_v50, %v3983_v48 }
0x1f02   :  { %v3994_v57 = vmul.f32 %v4178_v51, %v3986_v63 }
0x1f04   :  { %v4002_v58 = vadd.f32 %v4179_v53, %v3994_v57 }
0x1f06   :  { %v4003_v59 = vmax.f32 %v4002_v58, 0.0 }
0x1f08   :  { %4436 = vmatmul.mubr.msk.f32.vlgmr.msra.gmra.mrb[36].mxu1 %vm287_vm2, %v4003_v59 }
0x1fdb   :  { %v4084_v60 = vpop.f32.mrb[36].mxu1 }
0x1fdc   :  { %v4085_v16 = vadd.f32 %v4180_v54, %v4084_v60  ;;  %v4437_v1 = vpop.f32.mrb[37].mxu1 }
0x1fde   :  { %4089 = vst.msk [vmem:[#allocation6] sm:$0x3] %vm4088_vm6, %v4085_v16 }
0x1fdf   :  { %5107 = shalt.err (!%p5104_p6)
}
0x1fe0   :  { %s5108_s2 = scalar_lea.hbm %s5995_s24, 32 }
0x1fe1   :  { %p5109_p7 = scmp.ne.s32.totalorder %s5995_s24, %s5108_s2  ;;  %p5112_p8 = scmp.lt.u32.totalorder %s5108_s2, %s5995_s24 }
0x1fe3   :  { %p5114_p9 = pnand %p5112_p8, %p5109_p7 }
0x1fe5   :  { %5117 = shalt.err (!%p5114_p9)
}
0x1fe6   :  { %4099 = dma.vmem_to_hbm [thread:$0]  %s4097_s27, 32, %s5995_s24, [#allocation7]  }
0x1fe7   :  { %5122 = dma.done.wait [#allocation7], 32  }
0x1fe8   :  { %5123 = vsyncadd [#allocation7], 4294967264 }
0x1fe9   :  { %4103 = vsyncpa [#allocation7], 1 }
0x1fea   :  { %4104 = vsyncmov [#allocation4] }
0x1fed   :  { %s4105_s28 = vpop.sfrf %4104 }
0x1fee   :  { %p4182_p10 = scmp.ne.s32.totalorder %s4105_s28, 0 }
0x1ff0   :  { %4109 = shalt.err (%p4182_p10)  }
0x1ff1   :  { %4110 = vsyncmov [#allocation5] }
0x1ff4   :  { %s4111_s25 = vpop.sfrf %4110 }
0x1ff5   :  { %p4183_p11 = scmp.ne.s32.totalorder %s4111_s25, 0 }
0x1ff7   :  { %4115 = shalt.err (%p4183_p11)  }

</bundles_post_ra>
